<compile_context>
chip_gen: v6e
topology: v6e:2x2x1
jax: 0.10.0
libtpu: 0.0.40
codegen_flags: <defaults>
</compile_context>

<pallas_src>
import functools
import math

import jax
import jax.numpy as jnp
from jax.experimental import pallas as pl
from jax.experimental.pallas import tpu as pltpu

F32 = jnp.float32
BF16 = jnp.bfloat16
BN_EPS = 1e-5
EXPANSION = 4


# ------------------------------- Pallas kernel ------------------------------ #

def _bottleneck_kernel(*refs, s, ho, wo, has_downsample):
    """Whole Bottleneck block for one batch element, entirely in VMEM.

    refs = (x, mask, w1, b1, w2, b2, w3, b3, [wd, bd], out, y1_scratch)
      x    : (s*s*hq, wq, Cin) bf16  parity-deinterleaved, zero-haloed input
      mask : (S, 1) f32              1 on interior pixels, 0 on halo/pad
      w1   : (Cin, P)   bf16 (BN1 folded)   b1 : (1, P)  f32
      w2   : (9*P, P)   bf16 (BN2 folded)   b2 : (1, P)  f32
      w3   : (P, 4P)    bf16 (BN3 folded)   b3 : (1, 4P) f32
      wd   : (Cin, 4P)  bf16 (BNd folded)   bd : (1, 4P) f32
      out  : (Ho*Wo, 4P) f32
      y1   : (s*s*hq, wq, P) bf16 VMEM scratch (conv1 output, halo already zero)
    """
    if has_downsample:
        (x_ref, mask_ref, w1_ref, b1_ref, w2_ref, b2_ref, w3_ref, b3_ref,
         wd_ref, bd_ref, o_ref, y1_ref) = refs
    else:
        (x_ref, mask_ref, w1_ref, b1_ref, w2_ref, b2_ref, w3_ref, b3_ref,
         o_ref, y1_ref) = refs
        wd_ref = bd_ref = None

    a, wq, cin = x_ref.shape
    hq = a // (s * s)
    planes = w1_ref.shape[1]
    S = a * wq
    M = ho * wo

    # ---- stage 1: 1x1 conv + folded BN1 + ReLU as ONE (S, Cin) x (Cin, P)
    #      matmul; halo/pad positions zeroed by the precomputed mask so the 3x3
    #      conv below gets its zero padding for free (no scratch memset needed).
    x2 = x_ref[...].reshape(S, cin)
    y1 = jnp.dot(x2, w1_ref[...], preferred_element_type=jnp.float32)
    y1 = jnp.maximum(y1 + b1_ref[...], 0.0) * mask_ref[...]
    y1_ref[...] = y1.astype(BF16).reshape(a, wq, planes)

    # ---- stage 2: 3x3 stride-s conv + folded BN2 + ReLU as 9 whole-image
    #      matmuls (M = Ho*Wo). Thanks to the parity layout every tap slab is a
    #      contiguous (ho, wo) block -> plain (non-strided) pl.ds loads.
    acc = jnp.zeros((M, planes), jnp.float32)
    for k in range(9):
        i, j = k // 3, k % 3
        pln = (i % s) * s + (j % s)
        rstart = pln * hq + i // s
        cstart = j // s
        tap = y1_ref[pl.ds(rstart, ho), pl.ds(cstart, wo), :]      # (ho, wo, P)
        wk = w2_ref[pl.ds(k * planes, planes), :]                  # (P, P)
        acc = acc + jnp.dot(tap.reshape(M, planes), wk,
                            preferred_element_type=jnp.float32)
    y2 = jnp.maximum(acc + b2_ref[...], 0.0).astype(BF16)          # (M, P)

    # ---- stage 3: 1x1 conv + folded BN3, one (M, P) x (P, 4P) matmul.
    y3 = jnp.dot(y2, w3_ref[...], preferred_element_type=jnp.float32) + b3_ref[...]

    # ---- residual: identity or fused 1x1 stride-s conv + folded BNd, again a
    #      contiguous slab thanks to the parity layout.
    q = 1 % s
    pln = q * s + q
    rstart = pln * hq + 1 // s
    cstart = 1 // s
    xs = x_ref[pl.ds(rstart, ho), pl.ds(cstart, wo), :]            # (ho, wo, Cin)
    xs2 = xs.reshape(M, cin)
    if has_downsample:
        res = jnp.dot(xs2, wd_ref[...],
                      preferred_element_type=jnp.float32) + bd_ref[...]
    else:                                   # identity (s==1, Cin==4P)
        res = xs2.astype(jnp.float32)

    o_ref[...] = jnp.maximum(y3 + res, 0.0).astype(o_ref.dtype)


# ------------------------------- JAX wrapper -------------------------------- #

def _fold_bn(bn_params):
    gamma, beta, mean, var = bn_params
    scale = gamma / jnp.sqrt(var + BN_EPS)
    bias = beta - mean * scale
    return scale, bias


def _parity_layout(a, s, hq, wq):
    """(n, hq*s, wq*s, c) -> (n, s*s*hq, wq, c); row index = (q*s + p)*hq + r
    where the original padded coords are (s*r + q, s*c + p)."""
    n, _, _, c = a.shape
    a = a.reshape(n, hq, s, wq, s, c)
    a = jnp.transpose(a, (0, 2, 4, 1, 3, 5))
    return a.reshape(n, s * s * hq, wq, c)


@functools.partial(jax.jit, static_argnames=("stride",))
def bottleneck_forward(params, x_nchw, *, stride):
    """PyTorch-style NCHW f32 in/out; whole block runs as one Pallas kernel."""
    has_downsample = 'wd' in params
    n, cin, h, w = x_nchw.shape
    planes = params['w1'].shape[0]
    cexp = EXPANSION * planes
    s = stride
    ho = (h - 1) // s + 1
    wo = (w - 1) // s + 1
    hp, wp = h + 2, w + 2
    hq = -(-hp // s)
    wq = -(-wp // s)
    hp_e, wp_e = hq * s, wq * s
    A = s * s * hq
    S = A * wq
    M = ho * wo
    if not has_downsample:
        assert s == 1 and cin == cexp, "identity residual needs matching shapes"

    # NCHW -> NHWC, zero-pad the halo (rounded up to a stride multiple), bf16,
    # then de-interleave rows/cols by the stride (one-time wrapper cost).
    x = jnp.transpose(x_nchw.astype(F32), (0, 2, 3, 1))
    x = jnp.pad(x, ((0, 0), (1, hp_e - h - 1), (1, wp_e - w - 1), (0, 0)))
    xq = _parity_layout(x.astype(BF16), s, hq, wq)                 # (n, A, wq, Cin)

    # Interior mask (1 on real pixels, 0 on halo / extra pad), same layout.
    m = jnp.zeros((1, hp_e, wp_e, 1), F32).at[:, 1:1 + h, 1:1 + w, :].set(1.0)
    mask = _parity_layout(m, s, hq, wq).reshape(S, 1)

    # Fold BN scale into the (bf16) weight matrices at trace time.
    s1, b1 = _fold_bn(params['bn1'])
    s2, b2 = _fold_bn(params['bn2'])
    s3, b3 = _fold_bn(params['bn3'])
    w1 = (params['w1'][:, :, 0, 0].T * s1[None, :]).astype(BF16)            # (Cin, P)
    w2 = (jnp.transpose(params['w2'], (2, 3, 1, 0)) * s2[None, None, None, :]
          ).reshape(9 * planes, planes).astype(BF16)                        # (9P, P)
    w3 = (params['w3'][:, :, 0, 0].T * s3[None, :]).astype(BF16)            # (P, 4P)
    b1 = b1.reshape(1, planes).astype(F32)
    b2 = b2.reshape(1, planes).astype(F32)
    b3 = b3.reshape(1, cexp).astype(F32)

    args = [xq, mask, w1, b1, w2, b2, w3, b3]
    in_specs = [
        pl.BlockSpec((None, A, wq, cin), lambda i: (i, 0, 0, 0)),
        pl.BlockSpec((S, 1), lambda i: (0, 0)),
        pl.BlockSpec((cin, planes), lambda i: (0, 0)),
        pl.BlockSpec((1, planes), lambda i: (0, 0)),
        pl.BlockSpec((9 * planes, planes), lambda i: (0, 0)),
        pl.BlockSpec((1, planes), lambda i: (0, 0)),
        pl.BlockSpec((planes, cexp), lambda i: (0, 0)),
        pl.BlockSpec((1, cexp), lambda i: (0, 0)),
    ]
    if has_downsample:
        sd, bd = _fold_bn(params['bnd'])
        wd = (params['wd'][:, :, 0, 0].T * sd[None, :]).astype(BF16)        # (Cin, 4P)
        bd = bd.reshape(1, cexp).astype(F32)
        args += [wd, bd]
        in_specs += [pl.BlockSpec((cin, cexp), lambda i: (0, 0)),
                     pl.BlockSpec((1, cexp), lambda i: (0, 0))]

    kern = functools.partial(_bottleneck_kernel, s=s, ho=ho, wo=wo,
                             has_downsample=has_downsample)

    out = pl.pallas_call(
        kern,
        out_shape=jax.ShapeDtypeStruct((n, M, cexp), F32),
        grid=(n,),
        in_specs=in_specs,
        out_specs=pl.BlockSpec((None, M, cexp), lambda i: (i, 0, 0)),
        scratch_shapes=[pltpu.VMEM((A, wq, planes), BF16)],
        compiler_params=pltpu.CompilerParams(
            dimension_semantics=("parallel",)),
    )(*args)
    out = out.reshape(n, ho, wo, cexp)
    return jnp.transpose(out, (0, 3, 1, 2))                                 # -> NCHW


# --------------------------- parameters & reference ------------------------- #

def _conv_w(key, cout, cin, k):
    std = math.sqrt(2.0 / (k * k * cout))
    return std * jax.random.normal(key, (cout, cin, k, k), dtype=F32)


def _bn_params(key, c):
    k1, k2, k3, k4 = jax.random.split(key, 4)
    gamma = 1.0 + 0.1 * jax.random.normal(k1, (c,), F32)
    beta = 0.1 * jax.random.normal(k2, (c,), F32)
    mean = 0.1 * jax.random.normal(k3, (c,), F32)
    var = 1.0 + 0.1 * jax.random.uniform(k4, (c,), F32)
    return gamma, beta, mean, var


def make_bottleneck_params(key, inplanes, planes, stride):
    ks = jax.random.split(key, 8)
    p = {
        'w1': _conv_w(ks[0], planes, inplanes, 1),
        'bn1': _bn_params(ks[1], planes),
        'w2': _conv_w(ks[2], planes, planes, 3),
        'bn2': _bn_params(ks[3], planes),
        'w3': _conv_w(ks[4], planes * EXPANSION, planes, 1),
        'bn3': _bn_params(ks[5], planes * EXPANSION),
    }
    if stride != 1 or inplanes != planes * EXPANSION:
        p['wd'] = _conv_w(ks[6], planes * EXPANSION, inplanes, 1)
        p['bnd'] = _bn_params(ks[7], planes * EXPANSION)
    return p


def bottleneck_reference(params, x, *, stride):
    """Pure-JAX (XLA) reference for the same inference-mode Bottleneck."""
    def conv(inp, w, s, p):
        return jax.lax.conv_general_dilated(
            inp, w, window_strides=(s, s), padding=((p, p), (p, p)),
            dimension_numbers=('NCHW', 'OIHW', 'NCHW'))

    def bn(inp, bnp):
        gamma, beta, mean, var = bnp
        sc = gamma / jnp.sqrt(var + BN_EPS)
        return inp * sc[None, :, None, None] + (beta - mean * sc)[None, :, None, None]

    out = jax.nn.relu(bn(conv(x, params['w1'], 1, 0), params['bn1']))
    out = jax.nn.relu(bn(conv(out, params['w2'], stride, 1), params['bn2']))
    out = bn(conv(out, params['w3'], 1, 0), params['bn3'])
    res = x
    if 'wd' in params:
        res = bn(conv(x, params['wd'], stride, 0), params['bnd'])
    return jax.nn.relu(out + res)


# ----------------------------------- main ------------------------------------ #

if __name__ == "__main__":
    key = jax.random.PRNGKey(0)
    kp1, kp2, kx1, kx2 = jax.random.split(key, 4)

    # Case 1: stride-2 Bottleneck with a 1x1-conv + BN downsample branch.
    p1 = make_bottleneck_params(kp1, inplanes=64, planes=32, stride=2)
    x1 = jax.random.normal(kx1, (2, 64, 16, 16), dtype=F32)
    y1 = jax.block_until_ready(bottleneck_forward(p1, x1, stride=2))
    r1 = jax.block_until_ready(bottleneck_reference(p1, x1, stride=2))
    assert y1.shape == (2, 128, 8, 8), y1.shape
    assert bool(jnp.isfinite(y1).all())
    err1 = float(jnp.max(jnp.abs(y1 - r1)) / (jnp.max(jnp.abs(r1)) + 1e-6))
    assert err1 < 0.06, f"downsample case mismatch: {err1}"

    # Case 2: stride-1 Bottleneck with identity residual (inplanes == 4*planes).
    p2 = make_bottleneck_params(kp2, inplanes=128, planes=32, stride=1)
    x2 = jax.random.normal(kx2, (2, 128, 8, 8), dtype=F32)
    y2 = jax.block_until_ready(bottleneck_forward(p2, x2, stride=1))
    r2 = jax.block_until_ready(bottleneck_reference(p2, x2, stride=1))
    assert y2.shape == (2, 128, 8, 8), y2.shape
    assert bool(jnp.isfinite(y2).all())
    err2 = float(jnp.max(jnp.abs(y2 - r2)) / (jnp.max(jnp.abs(r2)) + 1e-6))
    assert err2 < 0.06, f"identity case mismatch: {err2}"

    print("KERNEL_OK")
</pallas_src>

<mosaic_0001>
module attributes {stable_mosaic.version = 11 : i64} {
  func.func @_bottleneck_kernel(%arg0: i32, %arg1: memref<1x36x9x64xbf16, #tpu.memory_space<vmem>>, %arg2: memref<324x1xf32, #tpu.memory_space<vmem>>, %arg3: memref<64x32xbf16, #tpu.memory_space<vmem>>, %arg4: memref<1x32xf32, #tpu.memory_space<vmem>>, %arg5: memref<288x32xbf16, #tpu.memory_space<vmem>>, %arg6: memref<1x32xf32, #tpu.memory_space<vmem>>, %arg7: memref<32x128xbf16, #tpu.memory_space<vmem>>, %arg8: memref<1x128xf32, #tpu.memory_space<vmem>>, %arg9: memref<64x128xbf16, #tpu.memory_space<vmem>>, %arg10: memref<1x128xf32, #tpu.memory_space<vmem>>, %arg11: memref<1x64x128xf32, #tpu.memory_space<vmem>>, %arg12: memref<36x9x32xbf16, #tpu.memory_space<vmem>>) attributes {dimension_semantics = [#tpu.dimension_semantics<parallel>], iteration_bounds = array<i64: 2>, scalar_prefetch = 0 : i64, scratch_operands = 1 : i64, tpu.core_type = #tpu.core_type<tc>, window_params = [{transform_indices = @transform_0, window_bounds = array<i64: 1, 36, 9, 64>}, {pipeline_mode = #tpu.pipeline_mode<synchronous>, transform_indices = @transform_1, window_bounds = array<i64: 324, 1>}, {pipeline_mode = #tpu.pipeline_mode<synchronous>, transform_indices = @transform_2, window_bounds = array<i64: 64, 32>}, {pipeline_mode = #tpu.pipeline_mode<synchronous>, transform_indices = @transform_3, window_bounds = array<i64: 1, 32>}, {pipeline_mode = #tpu.pipeline_mode<synchronous>, transform_indices = @transform_4, window_bounds = array<i64: 288, 32>}, {pipeline_mode = #tpu.pipeline_mode<synchronous>, transform_indices = @transform_5, window_bounds = array<i64: 1, 32>}, {pipeline_mode = #tpu.pipeline_mode<synchronous>, transform_indices = @transform_6, window_bounds = array<i64: 32, 128>}, {pipeline_mode = #tpu.pipeline_mode<synchronous>, transform_indices = @transform_7, window_bounds = array<i64: 1, 128>}, {pipeline_mode = #tpu.pipeline_mode<synchronous>, transform_indices = @transform_8, window_bounds = array<i64: 64, 128>}, {pipeline_mode = #tpu.pipeline_mode<synchronous>, transform_indices = @transform_9, window_bounds = array<i64: 1, 128>}, {transform_indices = @transform_10, window_bounds = array<i64: 1, 64, 128>}]} {
    %c0 = arith.constant 0 : index
    %c0_0 = arith.constant 0 : index
    %c0_1 = arith.constant 0 : index
    %c0_2 = arith.constant 0 : index
    %0 = vector.load %arg1[%c0, %c0_0, %c0_1, %c0_2] : memref<1x36x9x64xbf16, #tpu.memory_space<vmem>>, vector<1x36x9x64xbf16>
    %1 = vector.shape_cast %0 : vector<1x36x9x64xbf16> to vector<36x9x64xbf16>
    %2 = vector.shape_cast %1 : vector<36x9x64xbf16> to vector<324x64xbf16>
    %c0_3 = arith.constant 0 : index
    %c0_4 = arith.constant 0 : index
    %3 = vector.load %arg3[%c0_3, %c0_4] : memref<64x32xbf16, #tpu.memory_space<vmem>>, vector<64x32xbf16>
    %cst = arith.constant dense<0.000000e+00> : vector<324x32xf32>
    %4 = tpu.matmul %2, %3, %cst {dimension_numbers = #tpu.dot_dimension_numbers<[1], [0], [0], [1], [0, 0, 1, 1], [], []>} : vector<324x64xbf16>, vector<64x32xbf16>, vector<324x32xf32> -> vector<324x32xf32>
    %c0_5 = arith.constant 0 : index
    %c0_6 = arith.constant 0 : index
    %5 = vector.load %arg4[%c0_5, %c0_6] : memref<1x32xf32, #tpu.memory_space<vmem>>, vector<1x32xf32>
    %6 = vector.broadcast %5 : vector<1x32xf32> to vector<324x32xf32>
    %7 = arith.addf %4, %6 : vector<324x32xf32>
    %cst_7 = arith.constant 0.000000e+00 : f32
    %8 = vector.broadcast %cst_7 : f32 to vector<324x32xf32>
    %9 = arith.maximumf %7, %8 : vector<324x32xf32>
    %c0_8 = arith.constant 0 : index
    %c0_9 = arith.constant 0 : index
    %10 = vector.load %arg2[%c0_8, %c0_9] : memref<324x1xf32, #tpu.memory_space<vmem>>, vector<324x1xf32>
    %11 = vector.broadcast %10 : vector<324x1xf32> to vector<324x32xf32>
    %12 = arith.mulf %9, %11 : vector<324x32xf32>
    %13 = arith.truncf %12 : vector<324x32xf32> to vector<324x32xbf16>
    %14 = vector.shape_cast %13 : vector<324x32xbf16> to vector<36x9x32xbf16>
    %c0_10 = arith.constant 0 : index
    %c0_11 = arith.constant 0 : index
    %c0_12 = arith.constant 0 : index
    %15 = vector.load %arg12[%c0_10, %c0_11, %c0_12] : memref<36x9x32xbf16, #tpu.memory_space<vmem>>, vector<36x9x32xbf16>
    tpu.vector_store %arg12[%c0_10, %c0_11, %c0_12], %14 {strides = array<i32>} : memref<36x9x32xbf16, #tpu.memory_space<vmem>>, vector<36x9x32xbf16>,
    %cst_13 = arith.constant 0.000000e+00 : f32
    %16 = vector.broadcast %cst_13 : f32 to vector<64x32xf32>
    %c0_14 = arith.constant 0 : index
    %c0_15 = arith.constant 0 : index
    %c0_16 = arith.constant 0 : index
    %17 = vector.load %arg12[%c0_14, %c0_15, %c0_16] : memref<36x9x32xbf16, #tpu.memory_space<vmem>>, vector<8x8x32xbf16>
    %c0_17 = arith.constant 0 : index
    %c0_18 = arith.constant 0 : index
    %18 = vector.load %arg5[%c0_17, %c0_18] : memref<288x32xbf16, #tpu.memory_space<vmem>>, vector<32x32xbf16>
    %19 = vector.shape_cast %17 : vector<8x8x32xbf16> to vector<64x32xbf16>
    %cst_19 = arith.constant dense<0.000000e+00> : vector<64x32xf32>
    %20 = tpu.matmul %19, %18, %cst_19 {dimension_numbers = #tpu.dot_dimension_numbers<[1], [0], [0], [1], [0, 0, 1, 1], [], []>} : vector<64x32xbf16>, vector<32x32xbf16>, vector<64x32xf32> -> vector<64x32xf32>
    %21 = arith.addf %16, %20 : vector<64x32xf32>
    %c9 = arith.constant 9 : index
    %c0_20 = arith.constant 0 : index
    %c0_21 = arith.constant 0 : index
    %22 = vector.load %arg12[%c9, %c0_20, %c0_21] : memref<36x9x32xbf16, #tpu.memory_space<vmem>>, vector<8x8x32xbf16>
    %c32 = arith.constant 32 : index
    %c0_22 = arith.constant 0 : index
    %23 = vector.load %arg5[%c32, %c0_22] : memref<288x32xbf16, #tpu.memory_space<vmem>>, vector<32x32xbf16>
    %24 = vector.shape_cast %22 : vector<8x8x32xbf16> to vector<64x32xbf16>
    %cst_23 = arith.constant dense<0.000000e+00> : vector<64x32xf32>
    %25 = tpu.matmul %24, %23, %cst_23 {dimension_numbers = #tpu.dot_dimension_numbers<[1], [0], [0], [1], [0, 0, 1, 1], [], []>} : vector<64x32xbf16>, vector<32x32xbf16>, vector<64x32xf32> -> vector<64x32xf32>
    %26 = arith.addf %21, %25 : vector<64x32xf32>
    %c0_24 = arith.constant 0 : index
    %c1 = arith.constant 1 : index
    %c0_25 = arith.constant 0 : index
    %27 = vector.load %arg12[%c0_24, %c1, %c0_25] : memref<36x9x32xbf16, #tpu.memory_space<vmem>>, vector<8x8x32xbf16>
    %c64 = arith.constant 64 : index
    %c0_26 = arith.constant 0 : index
    %28 = vector.load %arg5[%c64, %c0_26] : memref<288x32xbf16, #tpu.memory_space<vmem>>, vector<32x32xbf16>
    %29 = vector.shape_cast %27 : vector<8x8x32xbf16> to vector<64x32xbf16>
    %cst_27 = arith.constant dense<0.000000e+00> : vector<64x32xf32>
    %30 = tpu.matmul %29, %28, %cst_27 {dimension_numbers = #tpu.dot_dimension_numbers<[1], [0], [0], [1], [0, 0, 1, 1], [], []>} : vector<64x32xbf16>, vector<32x32xbf16>, vector<64x32xf32> -> vector<64x32xf32>
    %31 = arith.addf %26, %30 : vector<64x32xf32>
    %c18 = arith.constant 18 : index
    %c0_28 = arith.constant 0 : index
    %c0_29 = arith.constant 0 : index
    %32 = vector.load %arg12[%c18, %c0_28, %c0_29] : memref<36x9x32xbf16, #tpu.memory_space<vmem>>, vector<8x8x32xbf16>
    %c96 = arith.constant 96 : index
    %c0_30 = arith.constant 0 : index
    %33 = vector.load %arg5[%c96, %c0_30] : memref<288x32xbf16, #tpu.memory_space<vmem>>, vector<32x32xbf16>
    %34 = vector.shape_cast %32 : vector<8x8x32xbf16> to vector<64x32xbf16>
    %cst_31 = arith.constant dense<0.000000e+00> : vector<64x32xf32>
    %35 = tpu.matmul %34, %33, %cst_31 {dimension_numbers = #tpu.dot_dimension_numbers<[1], [0], [0], [1], [0, 0, 1, 1], [], []>} : vector<64x32xbf16>, vector<32x32xbf16>, vector<64x32xf32> -> vector<64x32xf32>
    %36 = arith.addf %31, %35 : vector<64x32xf32>
    %c27 = arith.constant 27 : index
    %c0_32 = arith.constant 0 : index
    %c0_33 = arith.constant 0 : index
    %37 = vector.load %arg12[%c27, %c0_32, %c0_33] : memref<36x9x32xbf16, #tpu.memory_space<vmem>>, vector<8x8x32xbf16>
    %c128 = arith.constant 128 : index
    %c0_34 = arith.constant 0 : index
    %38 = vector.load %arg5[%c128, %c0_34] : memref<288x32xbf16, #tpu.memory_space<vmem>>, vector<32x32xbf16>
    %39 = vector.shape_cast %37 : vector<8x8x32xbf16> to vector<64x32xbf16>
    %cst_35 = arith.constant dense<0.000000e+00> : vector<64x32xf32>
    %40 = tpu.matmul %39, %38, %cst_35 {dimension_numbers = #tpu.dot_dimension_numbers<[1], [0], [0], [1], [0, 0, 1, 1], [], []>} : vector<64x32xbf16>, vector<32x32xbf16>, vector<64x32xf32> -> vector<64x32xf32>
    %41 = arith.addf %36, %40 : vector<64x32xf32>
    %c18_36 = arith.constant 18 : index
    %c1_37 = arith.constant 1 : index
    %c0_38 = arith.constant 0 : index
    %42 = vector.load %arg12[%c18_36, %c1_37, %c0_38] : memref<36x9x32xbf16, #tpu.memory_space<vmem>>, vector<8x8x32xbf16>
    %c160 = arith.constant 160 : index
    %c0_39 = arith.constant 0 : index
    %43 = vector.load %arg5[%c160, %c0_39] : memref<288x32xbf16, #tpu.memory_space<vmem>>, vector<32x32xbf16>
    %44 = vector.shape_cast %42 : vector<8x8x32xbf16> to vector<64x32xbf16>
    %cst_40 = arith.constant dense<0.000000e+00> : vector<64x32xf32>
    %45 = tpu.matmul %44, %43, %cst_40 {dimension_numbers = #tpu.dot_dimension_numbers<[1], [0], [0], [1], [0, 0, 1, 1], [], []>} : vector<64x32xbf16>, vector<32x32xbf16>, vector<64x32xf32> -> vector<64x32xf32>
    %46 = arith.addf %41, %45 : vector<64x32xf32>
    %c1_41 = arith.constant 1 : index
    %c0_42 = arith.constant 0 : index
    %c0_43 = arith.constant 0 : index
    %47 = vector.load %arg12[%c1_41, %c0_42, %c0_43] : memref<36x9x32xbf16, #tpu.memory_space<vmem>>, vector<8x8x32xbf16>
    %c192 = arith.constant 192 : index
    %c0_44 = arith.constant 0 : index
    %48 = vector.load %arg5[%c192, %c0_44] : memref<288x32xbf16, #tpu.memory_space<vmem>>, vector<32x32xbf16>
    %49 = vector.shape_cast %47 : vector<8x8x32xbf16> to vector<64x32xbf16>
    %cst_45 = arith.constant dense<0.000000e+00> : vector<64x32xf32>
    %50 = tpu.matmul %49, %48, %cst_45 {dimension_numbers = #tpu.dot_dimension_numbers<[1], [0], [0], [1], [0, 0, 1, 1], [], []>} : vector<64x32xbf16>, vector<32x32xbf16>, vector<64x32xf32> -> vector<64x32xf32>
    %51 = arith.addf %46, %50 : vector<64x32xf32>
    %c10 = arith.constant 10 : index
    %c0_46 = arith.constant 0 : index
    %c0_47 = arith.constant 0 : index
    %52 = vector.load %arg12[%c10, %c0_46, %c0_47] : memref<36x9x32xbf16, #tpu.memory_space<vmem>>, vector<8x8x32xbf16>
    %c224 = arith.constant 224 : index
    %c0_48 = arith.constant 0 : index
    %53 = vector.load %arg5[%c224, %c0_48] : memref<288x32xbf16, #tpu.memory_space<vmem>>, vector<32x32xbf16>
    %54 = vector.shape_cast %52 : vector<8x8x32xbf16> to vector<64x32xbf16>
    %cst_49 = arith.constant dense<0.000000e+00> : vector<64x32xf32>
    %55 = tpu.matmul %54, %53, %cst_49 {dimension_numbers = #tpu.dot_dimension_numbers<[1], [0], [0], [1], [0, 0, 1, 1], [], []>} : vector<64x32xbf16>, vector<32x32xbf16>, vector<64x32xf32> -> vector<64x32xf32>
    %56 = arith.addf %51, %55 : vector<64x32xf32>
    %c1_50 = arith.constant 1 : index
    %c1_51 = arith.constant 1 : index
    %c0_52 = arith.constant 0 : index
    %57 = vector.load %arg12[%c1_50, %c1_51, %c0_52] : memref<36x9x32xbf16, #tpu.memory_space<vmem>>, vector<8x8x32xbf16>
    %c256 = arith.constant 256 : index
    %c0_53 = arith.constant 0 : index
    %58 = vector.load %arg5[%c256, %c0_53] : memref<288x32xbf16, #tpu.memory_space<vmem>>, vector<32x32xbf16>
    %59 = vector.shape_cast %57 : vector<8x8x32xbf16> to vector<64x32xbf16>
    %cst_54 = arith.constant dense<0.000000e+00> : vector<64x32xf32>
    %60 = tpu.matmul %59, %58, %cst_54 {dimension_numbers = #tpu.dot_dimension_numbers<[1], [0], [0], [1], [0, 0, 1, 1], [], []>} : vector<64x32xbf16>, vector<32x32xbf16>, vector<64x32xf32> -> vector<64x32xf32>
    %61 = arith.addf %56, %60 : vector<64x32xf32>
    %c0_55 = arith.constant 0 : index
    %c0_56 = arith.constant 0 : index
    %62 = vector.load %arg6[%c0_55, %c0_56] : memref<1x32xf32, #tpu.memory_space<vmem>>, vector<1x32xf32>
    %63 = vector.broadcast %62 : vector<1x32xf32> to vector<64x32xf32>
    %64 = arith.addf %61, %63 : vector<64x32xf32>
    %cst_57 = arith.constant 0.000000e+00 : f32
    %65 = vector.broadcast %cst_57 : f32 to vector<64x32xf32>
    %66 = arith.maximumf %64, %65 : vector<64x32xf32>
    %67 = arith.truncf %66 : vector<64x32xf32> to vector<64x32xbf16>
    %c0_58 = arith.constant 0 : index
    %c0_59 = arith.constant 0 : index
    %68 = vector.load %arg7[%c0_58, %c0_59] : memref<32x128xbf16, #tpu.memory_space<vmem>>, vector<32x128xbf16>
    %cst_60 = arith.constant dense<0.000000e+00> : vector<64x128xf32>
    %69 = tpu.matmul %67, %68, %cst_60 {dimension_numbers = #tpu.dot_dimension_numbers<[1], [0], [0], [1], [0, 0, 1, 1], [], []>} : vector<64x32xbf16>, vector<32x128xbf16>, vector<64x128xf32> -> vector<64x128xf32>
    %c0_61 = arith.constant 0 : index
    %c0_62 = arith.constant 0 : index
    %70 = vector.load %arg8[%c0_61, %c0_62] : memref<1x128xf32, #tpu.memory_space<vmem>>, vector<1x128xf32>
    %71 = vector.broadcast %70 : vector<1x128xf32> to vector<64x128xf32>
    %72 = arith.addf %69, %71 : vector<64x128xf32>
    %c0_63 = arith.constant 0 : index
    %c27_64 = arith.constant 27 : index
    %c0_65 = arith.constant 0 : index
    %c0_66 = arith.constant 0 : index
    %73 = vector.load %arg1[%c0_63, %c27_64, %c0_65, %c0_66] : memref<1x36x9x64xbf16, #tpu.memory_space<vmem>>, vector<1x8x8x64xbf16>
    %74 = vector.shape_cast %73 : vector<1x8x8x64xbf16> to vector<8x8x64xbf16>
    %75 = vector.shape_cast %74 : vector<8x8x64xbf16> to vector<64x64xbf16>
    %c0_67 = arith.constant 0 : index
    %c0_68 = arith.constant 0 : index
    %76 = vector.load %arg9[%c0_67, %c0_68] : memref<64x128xbf16, #tpu.memory_space<vmem>>, vector<64x128xbf16>
    %cst_69 = arith.constant dense<0.000000e+00> : vector<64x128xf32>
    %77 = tpu.matmul %75, %76, %cst_69 {dimension_numbers = #tpu.dot_dimension_numbers<[1], [0], [0], [1], [0, 0, 1, 1], [], []>} : vector<64x64xbf16>, vector<64x128xbf16>, vector<64x128xf32> -> vector<64x128xf32>
    %c0_70 = arith.constant 0 : index
    %c0_71 = arith.constant 0 : index
    %78 = vector.load %arg10[%c0_70, %c0_71] : memref<1x128xf32, #tpu.memory_space<vmem>>, vector<1x128xf32>
    %79 = vector.broadcast %78 : vector<1x128xf32> to vector<64x128xf32>
    %80 = arith.addf %77, %79 : vector<64x128xf32>
    %81 = arith.addf %72, %80 : vector<64x128xf32>
    %cst_72 = arith.constant 0.000000e+00 : f32
    %82 = vector.broadcast %cst_72 : f32 to vector<64x128xf32>
    %83 = arith.maximumf %81, %82 : vector<64x128xf32>
    %c0_73 = arith.constant 0 : index
    %c0_74 = arith.constant 0 : index
    %c0_75 = arith.constant 0 : index
    %84 = vector.load %arg11[%c0_73, %c0_74, %c0_75] : memref<1x64x128xf32, #tpu.memory_space<vmem>>, vector<1x64x128xf32>
    %85 = vector.shape_cast %84 : vector<1x64x128xf32> to vector<64x128xf32>
    %86 = vector.shape_cast %83 : vector<64x128xf32> to vector<1x64x128xf32>
    tpu.vector_store %arg11[%c0_73, %c0_74, %c0_75], %86 {strides = array<i32>} : memref<1x64x128xf32, #tpu.memory_space<vmem>>, vector<1x64x128xf32>,
    return
  }
  func.func @transform_0(%arg0: i32) -> (i32, i32, i32, i32) {
    %c0_i32 = arith.constant 0 : i32
    %c0_i32_0 = arith.constant 0 : i32
    %c0_i32_1 = arith.constant 0 : i32
    %c0_i32_2 = arith.constant 0 : i32
    return %arg0, %c0_i32, %c0_i32_0, %c0_i32_1 : i32, i32, i32, i32
  }
  func.func @transform_1(%arg0: i32) -> (i32, i32) {
    %c0_i32 = arith.constant 0 : i32
    %c0_i32_0 = arith.constant 0 : i32
    %c0_i32_1 = arith.constant 0 : i32
    return %c0_i32, %c0_i32_0 : i32, i32
  }
  func.func @transform_2(%arg0: i32) -> (i32, i32) {
    %c0_i32 = arith.constant 0 : i32
    %c0_i32_0 = arith.constant 0 : i32
    %c0_i32_1 = arith.constant 0 : i32
    return %c0_i32, %c0_i32_0 : i32, i32
  }
  func.func @transform_3(%arg0: i32) -> (i32, i32) {
    %c0_i32 = arith.constant 0 : i32
    %c0_i32_0 = arith.constant 0 : i32
    %c0_i32_1 = arith.constant 0 : i32
    return %c0_i32, %c0_i32_0 : i32, i32
  }
  func.func @transform_4(%arg0: i32) -> (i32, i32) {
    %c0_i32 = arith.constant 0 : i32
    %c0_i32_0 = arith.constant 0 : i32
    %c0_i32_1 = arith.constant 0 : i32
    return %c0_i32, %c0_i32_0 : i32, i32
  }
  func.func @transform_5(%arg0: i32) -> (i32, i32) {
    %c0_i32 = arith.constant 0 : i32
    %c0_i32_0 = arith.constant 0 : i32
    %c0_i32_1 = arith.constant 0 : i32
    return %c0_i32, %c0_i32_0 : i32, i32
  }
  func.func @transform_6(%arg0: i32) -> (i32, i32) {
    %c0_i32 = arith.constant 0 : i32
    %c0_i32_0 = arith.constant 0 : i32
    %c0_i32_1 = arith.constant 0 : i32
    return %c0_i32, %c0_i32_0 : i32, i32
  }
  func.func @transform_7(%arg0: i32) -> (i32, i32) {
    %c0_i32 = arith.constant 0 : i32
    %c0_i32_0 = arith.constant 0 : i32
    %c0_i32_1 = arith.constant 0 : i32
    return %c0_i32, %c0_i32_0 : i32, i32
  }
  func.func @transform_8(%arg0: i32) -> (i32, i32) {
    %c0_i32 = arith.constant 0 : i32
    %c0_i32_0 = arith.constant 0 : i32
    %c0_i32_1 = arith.constant 0 : i32
    return %c0_i32, %c0_i32_0 : i32, i32
  }
  func.func @transform_9(%arg0: i32) -> (i32, i32) {
    %c0_i32 = arith.constant 0 : i32
    %c0_i32_0 = arith.constant 0 : i32
    %c0_i32_1 = arith.constant 0 : i32
    return %c0_i32, %c0_i32_0 : i32, i32
  }
  func.func @transform_10(%arg0: i32) -> (i32, i32, i32) {
    %c0_i32 = arith.constant 0 : i32
    %c0_i32_0 = arith.constant 0 : i32
    %c0_i32_1 = arith.constant 0 : i32
    return %arg0, %c0_i32, %c0_i32_0 : i32, i32, i32
  }
}

</mosaic_0001>

<bundles_post_ra>
// kernel: bottleneck_forward.1
= control target key start
LH: loop header
LB: loop body
LE: loop exit
PB: predicated region body
PF: predicated region fallthrough
CT: control target
= control target key end

     0   :  { %15 = vsyncpa [#allocation4], 0  ;;  %s11574_s0 = inlined_call_operand.vmem [shape: bf16[2,36,9,64], index: 0, kind: input, shape index: {}]   ;;  %s11575_s1 = inlined_call_operand.vmem [shape: f32[324,1], index: 1, kind: input, shape index: {}]   ;;  %s11576_s2 = inlined_call_operand.vmem [shape: bf16[64,32], index: 2, kind: input, shape index: {}]   ;;  %s11577_s3 = inlined_call_operand.vmem [shape: f32[1,32], index: 3, kind: input, shape index: {}]   ;;  %s11578_s4 = inlined_call_operand.vmem [shape: bf16[288,32], index: 4, kind: input, shape index: {}]   ;;  %s11579_s5 = inlined_call_operand.vmem [shape: f32[1,32], index: 5, kind: input, shape index: {}]   ;;  %s11580_s6 = inlined_call_operand.vmem [shape: bf16[32,128], index: 6, kind: input, shape index: {}]   ;;  %s11581_s7 = inlined_call_operand.vmem [shape: f32[1,128], index: 7, kind: input, shape index: {}]   ;;  %s11582_s8 = inlined_call_operand.vmem [shape: bf16[64,128], index: 8, kind: input, shape index: {}]   ;;  %s11583_s9 = inlined_call_operand.vmem [shape: f32[1,128], index: 9, kind: input, shape index: {}]   ;;  %s11584_s10 = inlined_call_operand.hbm [shape: f32[2,64,128], index: 10, kind: output, shape index: {}]  }
   0x1   :  { %17 = vsyncpa [#allocation4 + $0x1], 0  ;;  %s9954_s13 = smov 0   ;;  %s9956_s14 = smov 0  }
   0x2   :  { %s9958_s15 = smov 0   ;;  %s9960_s16 = smov 0  }
   0x3 LB: > { %s9975_s17 = sadd.s32 4294967295, %s9889_s16   ;;  %s8981_s18 = sadd.s32 4294967294, %s9889_s16   ;;  %s9889_s16 = sphi %s9960_s16, %s11594_s16   ;;  %s9885_s15 = sphi %s9958_s15, %s11593_s15   ;;  %s9881_s14 = sphi %s9956_s14, %s11592_s14   ;;  %s9877_s13 = sphi %s9954_s13, %s11591_s13  }
   0x4   : > { %s9979_s19 = sadd.s32 1, %s9889_s16   ;;  %s245_s20 = sadd.s32 1, %s9885_s15 }
   0x5   : > { %s242_s21 = ssub.s32 %s9889_s16, %s9979_s19  ;;  %p255_p0 = scmp.ne.s32.totalorder %s9885_s15, %s9881_s14 }
   0x6   : > { %p243_p1 = scmp.eq.s32.totalorder %s242_s21, 0  ;;  %p256_p2 = scmp.eq.s32.totalorder %s9975_s17, 1 }
   0x7   : > { %p261_p3 = scmp.ne.s32.totalorder %s9881_s14, %s9877_s13  ;;  %p262_p4 = scmp.eq.s32.totalorder %s8981_s18, 1 }
   0x8   : > { %s9990_s22 = scalar_select %p243_p1, %s9885_s15, %s245_s20  }
   0x9   : > { %p9992_p5 = por %p256_p2, %p255_p0  ;;  %p9996_p6 = por %p262_p4, %p261_p3 }
   0xa   : > { %p8984_p7 = scmp.ge.s32.totalorder %s9889_s16, 1  ;;  %p315_p8 = scmp.lt.s32.totalorder %s9889_s16, 3 }
   0xc   : > { %p316_p9 = pnand %p8984_p7, %p315_p8 }
   0xd   : > { %p353_p10 = scmp.lt.s32.totalorder (!%p316_p9), %s9975_s17, 1  ;;  %s350_s26 = sand.u32 (!%p316_p9), 1, %s9881_s14  }
   0xe   : > { %319 = sbr.rel (%p316_p9) target bundleno = 1014 (0x3f6), region = 60  ;;  %s9400_s12 = sshll.u32 (!%p316_p9), %s9975_s17, 10 }
   0xf   : > { %s11526_s21 = scalar_lea.hbm (!%p316_p9), %s11584_s10, %s9400_s12  ;;  %s9896_s27 = smov (!%p316_p9), [#allocation3]  }
  0x10   : > { %s9833_s28 = sshll.u32 (!%p316_p9), %s9896_s27, 4  ;;  %s9834_s28 = int_to_ptr.vmem [resolvable:$false] %s9833_s28 }
  0x13   : > { %v9771_v0 = vld [vmem:[%s11576_s2 + $0x18] sm:$0xff]   ;;  %v9891_v1 = vmov 0.0   ;;  %v514_v2 = vlaneseq  ;;  %v9772_v3 = vld [vmem:[%s11576_s2 + $0x10] sm:$0xff]   ;;  %vm9892_vm0 = vmmov 0   ;;  %s354_s29 = scalar_select %p353_p10, %s9975_s17, 1  ;;  %v9894_v8 = vmov 0  }
  0x14   : > { %9494 = vmatprep.subr.bf16.mxu0 %v9891_v1  ;;  %9502 = vmatprep.mubr.msk.bf16.mxu0 %vm9892_vm0, %v9891_v1  ;;  %v3706_v4 = vld [vmem:[%s11575_s1 + $0x50] sm:$0xff]  ;;  %v9893_v5 = vmov 1966171168   ;;  %v3708_v9 = vld [vmem:[%s11575_s1 + $0x60] sm:$0xff]  ;;  %v9773_v10 = vld [vmem:[%s11576_s2 + $0x8] sm:$0xff]   ;;  %vm3391_vm1 = vcmask 523264  }
  0x15   : > { %9495 = vmatpush3.bf16.msra.mxu0 %v9771_v0  ;;  %v512_v6 = vunpack.c.l.s4 %v9893_v5  ;;  %v10017_v7 = vshrl.u32 %v514_v2, 7  ;;  %9769 = vset.pattern.permute.xlu0 %v9894_v8  ;;  %s9722_s25 = smul.u32 288, %s354_s29  ;;  %v3707_v12 = vld [vmem:[%s11575_s1 + $0x58] sm:$0xff]  ;;  %v3709_v13 = vld [vmem:[%s11575_s1 + $0x68] sm:$0xff]  ;;  %v9774_v16 = vld [vmem:[%s11576_s2] sm:$0xff]   ;;  %vm6973_vm2 = vcmask 253952  }
  0x16   : > { %9496 = vmatprep.subr.bf16.mxu0 %v9891_v1  ;;  %9770 = vset.pattern.permute.xlu1 %v9894_v8  ;;  %v3710_v22 = vld [vmem:[%s11575_s1 + $0x70] sm:$0xff]  ;;  %v3711_v27 = vld [vmem:[%s11575_s1 + $0x78] sm:$0xff]  ;;  %v3712_v39 = vld [vmem:[%s11575_s1 + $0x80] sm:$0xff]  ;;  %vm6974_vm3 = vsmask.f32 256  ;;  %vm6971_vm4 = vcmask 257024  }
  0x17   : > { %3789 = vperm.xlu0 %9769, %v3706_v4   ;;  %v513_v11 = vunpack.c.0.s8 %v512_v6  ;;  %3799 = vperm.xlu1 %9770, %v3708_v9   ;;  %s10032_s11 = scalar_lea.vmem %s11574_s0, %s9722_s25  ;;  %v3713_v45 = vld [vmem:[%s11575_s1 + $0x88] sm:$0xff]  ;;  %v3714_v54 = vld [vmem:[%s11575_s1 + $0x90] sm:$0xff]  ;;  %v3715_v55 = vld [vmem:[%s11575_s1 + $0x98] sm:$0xff]  ;;  %vm7176_vm6 = vcmask 261120   ;;  %vm7383_vm7 = vsmask.f32 3328 }
  0x18   : > { %v8987_v14 = vld.sshfl [vmem:[%s10032_s11] sm:$0x33 pattern:$0x75316420]  ;;  %vm10577_vm5 = vmand %vm6973_vm2, %vm6974_vm3  ;;  %vm7384_vm8 = vsmask.f32 7440 }
  0x19   : > { %9497 = vmatpush3.bf16.msra.mxu0 %v9772_v3  ;;  %v10039_v15 = vsub.s32 %v513_v11, %v10017_v7  ;;  %v8988_v17 = vld.sshfl [vmem:[%s10032_s11 + $0x4] sm:$0x1 pattern:$0x75316420]  ;;  %v510_v18 = vcombine.high %v8987_v14, %v8987_v14  ;;  %vm11183_vm9 = vmor %vm7383_vm7, %vm7384_vm8  ;;  %s11534_s25 = scalar_lea.sflag [#allocation4], %s350_s26 }
  0x1a   : > { %9498 = vmatprep.subr.bf16.mxu0 %v9891_v1  ;;  %v8989_v19 = vld.sshfl [vmem:[%s10032_s11 + $0x8] sm:$0x33 pattern:$0x75316420] }
  0x1b   : > { %3794 = vperm.xlu0 %9769, %v3707_v12   ;;  %v517_v20 = vrot.slane %v8987_v14, %v10039_v15  ;;  %v540_v21 = vrot.slane %v8988_v17, %v10039_v15  ;;  %3804 = vperm.xlu1 %9770, %v3709_v13   ;;  %v524_v23 = vrot.slane %v510_v18, %v10039_v15  ;;  %v8990_v26 = vld.sshfl [vmem:[%s10032_s11 + $0xc] sm:$0x1 pattern:$0x75316420] }
  0x1c   : > { %v548_v24 = vcombine.high %v8989_v19, %v8989_v19  ;;  %v555_v25 = vrot.slane %v8989_v19, %v10039_v15  ;;  %v8991_v28 = vld.sshfl [vmem:[%s10032_s11 + $0x10] sm:$0x33 pattern:$0x75316420]  ;;  %v578_v29 = vrot.slane %v8990_v26, %v10039_v15  ;;  %v3697_v19 = vld [vmem:[%s11575_s1 + $0x8] sm:$0xff] }
  0x1d   : > { %9499 = vmatpush3.bf16.msra.mxu0 %v9773_v10  ;;  %v2372_v34 = vcombine.low %v517_v20, %v524_v23  ;;  %v9150_v35 = vcombine.high %v517_v20, %v524_v23  ;;  %v8992_v36 = vld.sshfl [vmem:[%s10032_s11 + $0x14] sm:$0x1 pattern:$0x75316420]  ;;  %v586_v37 = vcombine.high %v8991_v28, %v8991_v28  ;;  %v593_v38 = vrot.slane %v8991_v28, %v10039_v15 }
  0x1e   : > { %9500 = vmatprep.subr.bf16.mxu0 %v9891_v1  ;;  %v562_v30 = vrot.slane %v548_v24, %v10039_v15  ;;  %v563_v31 = vcombine.high %v555_v25, %v555_v25  ;;  %v1881_v32 = vunpack.i.h.s16 %v555_v25  ;;  %v9060_v33 = vpack.i.b16 %v555_v25, %v540_v21  ;;  %v8993_v44 = vld.sshfl [vmem:[%s10032_s11 + $0x18] sm:$0x33 pattern:$0x75316420] }
  0x1f   : > { %3809 = vperm.xlu0 %9769, %v3710_v22   ;;  %3814 = vperm.xlu1 %9770, %v3711_v27   ;;  %v2382_v46 = vrot.slane %v2372_v34, %v10039_v15  ;;  %v2389_v47 = vrot.slane %v9150_v35, %v10039_v15  ;;  %v600_v48 = vrot.slane %v586_v37, %v10039_v15  ;;  %v8994_v60 = vld.sshfl [vmem:[%s10032_s11 + $0x1c] sm:$0x1 pattern:$0x75316420]  ;;  %v3696_v37 = vld [vmem:[%s11575_s1] sm:$0xff] }
  0x20   : > { %v564_v40 = vcombine.high %v562_v30, %v562_v30  ;;  %v1883_v41 = vunpack.i.h.s16 %v562_v30  ;;  %v1885_v42 = vunpack.i.h.s16 %v563_v31  ;;  %v9061_v43 = vpack.i.b16 %v562_v30, %v1881_v32  ;;  %v8995_v2 = vld.sshfl [vmem:[%s10032_s11 + $0x20] sm:$0x33 pattern:$0x75316420]  ;;  %v3699_v24 = vld [vmem:[%s11575_s1 + $0x18] sm:$0xff] }
  0x21   : > { %9501 = vmatpush3.bf16.msra.mxu0 %v9774_v16  ;;  %v601_v49 = vcombine.high %v593_v38, %v593_v38  ;;  %v616_v53 = vrot.slane %v8992_v36, %v10039_v15  ;;  %v2404_v56 = vcombine.low %v2382_v46, %v2389_v47  ;;  %v602_v57 = vcombine.high %v600_v48, %v600_v48  ;;  %v8996_v8 = vld.sshfl [vmem:[%s10032_s11 + $0x24] sm:$0x1 pattern:$0x75316420] }
  0x22   : > { %v9062_v50 = vpack.i.b16 %v563_v31, %v1883_v41  ;;  %v9063_v51 = vpack.i.b16 %v564_v40, %v1885_v42  ;;  %v2374_v52 = vcombine.low %v9060_v33, %v9061_v43  ;;  %v624_v58 = vcombine.high %v8993_v44, %v8993_v44  ;;  %v8997_v13 = vld.sshfl [vmem:[%s10032_s11 + $0x28] sm:$0x33 pattern:$0x75316420] }
  0x23   : > { %3819 = vperm.xlu0 %9769, %v3712_v39   ;;  %v631_v59 = vrot.slane %v8993_v44, %v10039_v15  ;;  %3824 = vperm.xlu1 %9770, %v3713_v45   ;;  %v1887_v63 = vunpack.i.h.s16 %v564_v40  ;;  %v2422_v0 = vcombine.low %v600_v48, %v601_v49  ;;  %v2412_v3 = vrot.slane %v2404_v56, %v10039_v15  ;;  %v8998_v42 = vld.sshfl [vmem:[%s10032_s11 + $0x2c] sm:$0x1 pattern:$0x75316420] }
  0x24   : > { %v2375_v61 = vcombine.low %v9062_v50, %v9063_v51  ;;  %v2396_v62 = vrot.slane %v2374_v52, %v10039_v15  ;;  %v638_v4 = vrot.slane %v624_v58, %v10039_v15  ;;  %v654_v18 = vrot.slane %v8994_v60, %v10039_v15  ;;  %v8999_v47 = vld.sshfl [vmem:[%s10032_s11 + $0x30] sm:$0x33 pattern:$0x75316420] }
  0x25   : > { %v639_v5 = vcombine.high %v631_v59, %v631_v59  ;;  %v1899_v6 = vunpack.i.h.s16 %v631_v59  ;;  %v9064_v10 = vpack.i.b16 %v578_v29, %v1887_v63  ;;  %v9065_v11 = vpack.i.b16 %v631_v59, %v616_v53  ;;  %v9000_v52 = vld.sshfl [vmem:[%s10032_s11 + $0x34] sm:$0x1 pattern:$0x75316420] }
  0x26   : > { %v2403_v9 = vrot.slane %v2375_v61, %v10039_v15  ;;  %v2438_v12 = vrot.slane %v2422_v0, %v10039_v15  ;;  %v1901_v14 = vunpack.i.h.s16 %v638_v4  ;;  %v640_v17 = vcombine.high %v638_v4, %v638_v4  ;;  %v3698_v53 = vld [vmem:[%s11575_s1 + $0x10] sm:$0xff]  ;;  %v9001_v56 = vld.sshfl [vmem:[%s10032_s11 + $0x38] sm:$0x33 pattern:$0x75316420] }
  0x27   : > { %3829 = vperm.xlu0 %9769, %v3714_v54   ;;  %v9066_v16 = vpack.i.b16 %v638_v4, %v1899_v6  ;;  %3834 = vperm.xlu1 %9770, %v3715_v55   ;;  %v2421_v21 = vcombine.low %v9064_v10, %v593_v38  ;;  %v2423_v22 = vcombine.low %v602_v57, %v9065_v11  ;;  %v1903_v36 = vunpack.i.h.s16 %v639_v5  ;;  %v3700_v4 = vld [vmem:[%s11575_s1 + $0x20] sm:$0xff]  ;;  %v3701_v10 = vld [vmem:[%s11575_s1 + $0x28] sm:$0xff] }
  0x28   : > { %v2405_v20 = vcombine.low %v2396_v62, %v2403_v9  ;;  %v662_v23 = vcombine.high %v8995_v2, %v8995_v2  ;;  %v9067_v25 = vpack.i.b16 %v639_v5, %v1901_v14  ;;  %v669_v26 = vrot.slane %v8995_v2, %v10039_v15 }
  0x29   : > { %v692_v27 = vrot.slane %v8996_v8, %v10039_v15  ;;  %v700_v28 = vcombine.high %v8997_v13, %v8997_v13  ;;  %v2431_v30 = vrot.slane %v2421_v21, %v10039_v15  ;;  %v2445_v31 = vrot.slane %v2423_v22, %v10039_v15  ;;  %v9002_v21 = vld.sshfl [vmem:[%s10032_s11 + $0x3c] sm:$0x1 pattern:$0x75316420] }
  0x2a   : > { %v2419_v29 = vrot.slane %v2405_v20, %v10039_v15  ;;  %v676_v32 = vrot.slane %v662_v23, %v10039_v15  ;;  %v2424_v33 = vcombine.low %v9066_v16, %v9067_v25  ;;  %v707_v34 = vrot.slane %v8997_v13, %v10039_v15  ;;  %v3703_v16 = vld [vmem:[%s11575_s1 + $0x38] sm:$0xff] }
  0x2b   : > { %3744 = vperm.xlu0 %9769, %v3697_v19   ;;  %v714_v35 = vrot.slane %v700_v28, %v10039_v15  ;;  %3754 = vperm.xlu1 %9770, %v3699_v24   ;;  %v2453_v39 = vcombine.low %v2431_v30, %v2438_v12  ;;  %v1905_v40 = vunpack.i.h.s16 %v640_v17  ;;  %v9068_v45 = vpack.i.b16 %v640_v17, %v1903_v36 }
  0x2c   : > { %v2420_v38 = vcombine.low %v2412_v3, %v2419_v29  ;;  %v2471_v41 = vcombine.low %v669_v26, %v676_v32  ;;  %v2452_v43 = vrot.slane %v2424_v33, %v10039_v15  ;;  %v1917_v44 = vunpack.i.h.s16 %v707_v34 }
  0x2d   : > { %v9070_v46 = vpack.i.b16 %v707_v34, %v692_v27  ;;  %v2461_v48 = vrot.slane %v2453_v39, %v10039_v15  ;;  %v9069_v49 = vpack.i.b16 %v654_v18, %v1905_v40  ;;  %v9151_v50 = vcombine.high %v669_v26, %v676_v32  ;;  %v9003_v26 = vld.sshfl [vmem:[%s10032_s11 + $0x40] sm:$0x33 pattern:$0x75316420] }
  0x2e   : > { %9503 = vmatmul.mubr.msk.bf16.vlgmr.msra.gmra.mxu0 %vm3391_vm1, %v2420_v38  ;;  %v2487_v51 = vrot.slane %v2471_v41, %v10039_v15  ;;  %v2454_v54 = vcombine.low %v2445_v31, %v2452_v43  ;;  %v9071_v55 = vpack.i.b16 %v714_v35, %v1917_v44  ;;  %v715_v57 = vcombine.high %v707_v34, %v707_v34  ;;  %v3702_v31 = vld [vmem:[%s11575_s1 + $0x30] sm:$0xff]  ;;  %v10153_v40 = vld.sshfl [vmem:[%s10032_s11 + $0x44] sm:$0x1 pattern:$0x75316420] }
  0x2f   : > { %9506 = vmatprep.mubr.msk.bf16.mxu0 %vm9892_vm0, %v9891_v1  ;;  %v716_v58 = vcombine.high %v714_v35, %v714_v35  ;;  %v2470_v59 = vcombine.low %v9068_v45, %v9069_v49  ;;  %v2494_v60 = vrot.slane %v9151_v50, %v10039_v15  ;;  %v730_v61 = vrot.slane %v8998_v42, %v10039_v15  ;;  %v3704_v45 = vld [vmem:[%s11575_s1 + $0x40] sm:$0xff]  ;;  %v3705_v50 = vld [vmem:[%s11575_s1 + $0x48] sm:$0xff] }
  0x30   : > { %v738_v62 = vcombine.high %v8999_v47, %v8999_v47  ;;  %3739 = vperm.xlu0 %9769, %v3696_v37   ;;  %v2468_v63 = vrot.slane %v2454_v54, %v10039_v15  ;;  %v2473_v0 = vcombine.low %v9070_v46, %v9071_v55  ;;  %v745_v2 = vrot.slane %v8999_v47, %v10039_v15  ;;  %v9005_v54 = vld.sshfl [vmem:[%s10032_s11 + $0x48] sm:$0x33 pattern:$0x75316420] }
  0x31   : > { %v768_v3 = vrot.slane %v9000_v52, %v10039_v15  ;;  %3749 = vperm.xlu1 %9770, %v3698_v53   ;;  %v2480_v5 = vrot.slane %v2470_v59, %v10039_v15  ;;  %v783_v8 = vrot.slane %v9001_v56, %v10039_v15  ;;  %v1919_v9 = vunpack.i.h.s16 %v714_v35 }
  0x32   : > { %v752_v6 = vrot.slane %v738_v62, %v10039_v15  ;;  %v2469_v11 = vcombine.low %v2461_v48, %v2468_v63  ;;  %v2501_v12 = vrot.slane %v2473_v0, %v10039_v15  ;;  %v753_v13 = vcombine.high %v745_v2, %v745_v2 }
  0x33   : > { %v1921_v14 = vunpack.i.h.s16 %v715_v57  ;;  %v2502_v17 = vcombine.low %v2480_v5, %v2487_v51  ;;  %v1923_v19 = vunpack.i.h.s16 %v716_v58  ;;  %v9072_v20 = vpack.i.b16 %v715_v57, %v1919_v9  ;;  %v3719_v9 = vld [vmem:[%s11575_s1 + $0xb8] sm:$0xff] }
  0x34   : > { %v754_v18 = vcombine.high %v752_v6, %v752_v6  ;;  %3759 = vperm.xlu0 %9769, %v3700_v4   ;;  %v2503_v22 = vcombine.low %v2494_v60, %v2501_v12  ;;  %v9075_v24 = vpack.i.b16 %v783_v8, %v768_v3  ;;  %v2521_v25 = vcombine.low %v752_v6, %v753_v13  ;;  %v9007_v3 = vld.sshfl [vmem:[%s10032_s11 + $0x50] sm:$0x33 pattern:$0x75316420] }
  0x35   : > { %v9073_v23 = vpack.i.b16 %v716_v58, %v1921_v14  ;;  %3764 = vperm.xlu1 %9770, %v3701_v10   ;;  %v2510_v27 = vrot.slane %v2502_v17, %v10039_v15  ;;  %v9074_v28 = vpack.i.b16 %v730_v61, %v1923_v19  ;;  %v776_v29 = vcombine.high %v9001_v56, %v9001_v56  ;;  %v3717_v56 = vld [vmem:[%s11575_s1 + $0xa8] sm:$0xff] }
  0x36   : > { %9507 = vmatmul.mubr.msk.bf16.gmra.mxu0 %vm3391_vm1, %v2469_v11  ;;  %v791_v30 = vcombine.high %v783_v8, %v783_v8  ;;  %v2517_v32 = vrot.slane %v2503_v22, %v10039_v15  ;;  %v2522_v34 = vcombine.low %v754_v18, %v9075_v24  ;;  %v2543_v35 = vrot.slane %v2521_v25, %v10039_v15  ;;  %v9006_v61 = vld.sshfl [vmem:[%s10032_s11 + $0x4c] sm:$0x1 pattern:$0x75316420] }
  0x37   : > { %9510 = vmatprep.mubr.msk.bf16.mxu0 %vm9892_vm0, %v9891_v1  ;;  %v2519_v33 = vcombine.low %v9072_v20, %v9073_v23  ;;  %v2520_v36 = vcombine.low %v9074_v28, %v745_v2  ;;  %v790_v37 = vrot.slane %v776_v29, %v10039_v15  ;;  %v806_v38 = vrot.slane %v9002_v21, %v10039_v15  ;;  %v3720_v23 = vld [vmem:[%s11575_s1 + $0xc0] sm:$0xff]  ;;  %v3721_v28 = vld [vmem:[%s11575_s1 + $0xc8] sm:$0xff] }
  0x38   : > { %v814_v39 = vcombine.high %v9003_v26, %v9003_v26  ;;  %3774 = vperm.xlu0 %9769, %v3703_v16   ;;  %v2518_v41 = vcombine.low %v2510_v27, %v2517_v32  ;;  %v2550_v43 = vrot.slane %v2522_v34, %v10039_v15  ;;  %v821_v44 = vrot.slane %v9003_v26, %v10039_v15  ;;  %v3716_v34 = vld [vmem:[%s11575_s1 + $0xa0] sm:$0xff] }
  0x39   : > { %v2529_v42 = vrot.slane %v2519_v33, %v10039_v15  ;;  %3769 = vperm.xlu1 %9770, %v3702_v31   ;;  %v2536_v46 = vrot.slane %v2520_v36, %v10039_v15  ;;  %v792_v47 = vcombine.high %v790_v37, %v790_v37  ;;  %v1935_v49 = vunpack.i.h.s16 %v783_v8  ;;  %v9008_v33 = vld.sshfl [vmem:[%s10032_s11 + $0x54] sm:$0x1 pattern:$0x75316420] }
  0x3a   : > { %v828_v48 = vrot.slane %v814_v39, %v10039_v15  ;;  %v2552_v51 = vcombine.low %v2543_v35, %v2550_v43  ;;  %v1937_v52 = vunpack.i.h.s16 %v790_v37  ;;  %v1939_v53 = vunpack.i.h.s16 %v791_v30  ;;  %v9009_v39 = vld.sshfl [vmem:[%s10032_s11 + $0x58] sm:$0x33 pattern:$0x75316420] }
  0x3b   : > { %v844_v55 = vrot.slane %v10153_v40, %v10039_v15  ;;  %v2551_v57 = vcombine.low %v2529_v42, %v2536_v46  ;;  %v1941_v58 = vunpack.i.h.s16 %v792_v47  ;;  %v9076_v59 = vpack.i.b16 %v790_v37, %v1935_v49  ;;  %v3718_v40 = vld [vmem:[%s11575_s1 + $0xb0] sm:$0xff]  ;;  %v9011_v49 = vld.sshfl [vmem:[%s10032_s11 + $0x60] sm:$0x33 pattern:$0x75316420] }
  0x3c   : > { %v2570_v60 = vcombine.low %v821_v44, %v828_v48  ;;  %3779 = vperm.xlu0 %9769, %v3704_v45   ;;  %v2566_v62 = vrot.slane %v2552_v51, %v10039_v15  ;;  %v9077_v63 = vpack.i.b16 %v791_v30, %v1937_v52  ;;  %v9078_v0 = vpack.i.b16 %v792_v47, %v1939_v53 }
  0x3d   : > { %v9152_v2 = vcombine.high %v821_v44, %v828_v48  ;;  %3784 = vperm.xlu1 %9770, %v3705_v50   ;;  %v2559_v4 = vrot.slane %v2551_v57, %v10039_v15  ;;  %v9079_v5 = vpack.i.b16 %v806_v38, %v1941_v58  ;;  %v852_v8 = vcombine.high %v9005_v54, %v9005_v54  ;;  %v9010_v44 = vld.sshfl [vmem:[%s10032_s11 + $0x5c] sm:$0x1 pattern:$0x75316420] }
  0x3e   : > { %9511 = vmatmul.mubr.msk.bf16.gmra.mxu0 %vm3391_vm1, %v2518_v41  ;;  %v2592_v6 = vrot.slane %v2570_v60, %v10039_v15  ;;  %v2568_v10 = vcombine.low %v9076_v59, %v9077_v63  ;;  %v859_v12 = vrot.slane %v9005_v54, %v10039_v15  ;;  %v882_v13 = vrot.slane %v9006_v61, %v10039_v15  ;;  %v3724_v63 = vld [vmem:[%s11575_s1 + $0xe0] sm:$0xff] }
  0x3f   : > { %9514 = vmatprep.mubr.msk.bf16.mxu0 %vm9892_vm0, %v9891_v1  ;;  %v2599_v11 = vrot.slane %v9152_v2, %v10039_v15  ;;  %v2567_v14 = vcombine.low %v2559_v4, %v2566_v62  ;;  %v2569_v16 = vcombine.low %v9078_v0, %v9079_v5  ;;  %v866_v17 = vrot.slane %v852_v8, %v10039_v15  ;;  %v3725_v0 = vld [vmem:[%s11575_s1 + $0xe8] sm:$0xff] }
  0x40   : > { %v890_v18 = vcombine.high %v9007_v3, %v9007_v3  ;;  %3844 = vperm.xlu0 %9769, %v3717_v56   ;;  %v2578_v19 = vrot.slane %v2568_v10, %v10039_v15  ;;  %v867_v21 = vcombine.high %v859_v12, %v859_v12  ;;  %v897_v22 = vrot.slane %v9007_v3, %v10039_v15 }
  0x41   : > { %v2601_v20 = vcombine.low %v2592_v6, %v2599_v11  ;;  %3854 = vperm.xlu1 %9770, %v3719_v9   ;;  %v2585_v24 = vrot.slane %v2569_v16, %v10039_v15  ;;  %v868_v25 = vcombine.high %v866_v17, %v866_v17  ;;  %v1953_v27 = vunpack.i.h.s16 %v859_v12  ;;  %v9012_v6 = vld.sshfl [vmem:[%s10032_s11 + $0x64] sm:$0x1 pattern:$0x75316420] }
  0x42   : > { %v904_v26 = vrot.slane %v890_v18, %v10039_v15  ;;  %v905_v30 = vcombine.high %v897_v22, %v897_v22  ;;  %v1955_v31 = vunpack.i.h.s16 %v866_v17  ;;  %v1957_v32 = vunpack.i.h.s16 %v867_v21 }
  0x43   : > { %v10198_v29 = vrot.slane %v2601_v20, %v10039_v15  ;;  %v2600_v35 = vcombine.low %v2578_v19, %v2585_v24  ;;  %v1959_v36 = vunpack.i.h.s16 %v868_v25  ;;  %v9080_v37 = vpack.i.b16 %v859_v12, %v844_v55  ;;  %v9013_v12 = vld.sshfl [vmem:[%s10032_s11 + $0x68] sm:$0x33 pattern:$0x75316420] }
  0x44   : > { %v9081_v38 = vpack.i.b16 %v866_v17, %v1953_v27  ;;  %3859 = vperm.xlu0 %9769, %v3720_v23   ;;  %v9082_v41 = vpack.i.b16 %v867_v21, %v1955_v31  ;;  %v9083_v42 = vpack.i.b16 %v868_v25, %v1957_v32  ;;  %v2620_v43 = vcombine.low %v904_v26, %v905_v30  ;;  %v9014_v19 = vld.sshfl [vmem:[%s10032_s11 + $0x6c] sm:$0x1 pattern:$0x75316420] }
  0x45   : > { %v906_v45 = vcombine.high %v904_v26, %v904_v26  ;;  %3864 = vperm.xlu1 %9770, %v3721_v28   ;;  %v2608_v46 = vrot.slane %v2600_v35, %v10039_v15  ;;  %v9084_v47 = vpack.i.b16 %v882_v13, %v1959_v36  ;;  %v920_v50 = vrot.slane %v9008_v33, %v10039_v15  ;;  %v3722_v13 = vld [vmem:[%s11575_s1 + $0xd0] sm:$0xff] }
  0x46   : > { %9515 = vmatmul.mubr.msk.bf16.gmra.mxu0 %vm3391_vm1, %v2567_v14  ;;  %v2617_v48 = vcombine.low %v9080_v37, %v9081_v38  ;;  %v2618_v51 = vcombine.low %v9082_v41, %v9083_v42  ;;  %v2648_v52 = vrot.slane %v2620_v43, %v10039_v15  ;;  %v928_v53 = vcombine.high %v9009_v39, %v9009_v39  ;;  %v9015_v24 = vld.sshfl [vmem:[%s10032_s11 + $0x70] sm:$0x33 pattern:$0x75316420] }
  0x47   : > { %9518 = vmatprep.mubr.msk.bf16.mxu0 %vm9892_vm0, %v9891_v1  ;;  %v935_v54 = vrot.slane %v9009_v39, %v10039_v15  ;;  %v2616_v55 = vcombine.low %v2608_v46, %v10198_v29  ;;  %v2619_v56 = vcombine.low %v9084_v47, %v897_v22  ;;  %v958_v58 = vrot.slane %v9010_v44, %v10039_v15  ;;  %v3723_v29 = vld [vmem:[%s11575_s1 + $0xd8] sm:$0xff]  ;;  %v3726_v42 = vld [vmem:[%s11575_s1 + $0xf0] sm:$0xff] }
  0x48   : > { %v2627_v57 = vrot.slane %v2617_v48, %v10039_v15  ;;  %3839 = vperm.xlu0 %9769, %v3716_v34   ;;  %v2634_v59 = vrot.slane %v2618_v51, %v10039_v15  ;;  %v942_v60 = vrot.slane %v928_v53, %v10039_v15  ;;  %v966_v62 = vcombine.high %v9011_v49, %v9011_v49  ;;  %v3727_v47 = vld [vmem:[%s11575_s1 + $0xf8] sm:$0xff]  ;;  %v3728_v53 = vld [vmem:[%s11575_s1 + $0x100] sm:$0xff] }
  0x49   : > { %v943_v61 = vcombine.high %v935_v54, %v935_v54  ;;  %3849 = vperm.xlu1 %9770, %v3718_v40   ;;  %v2641_v2 = vrot.slane %v2619_v56, %v10039_v15  ;;  %v973_v3 = vrot.slane %v9011_v49, %v10039_v15  ;;  %v1971_v4 = vunpack.i.h.s16 %v935_v54 }
  0x4a   : > { %v9085_v5 = vpack.i.b16 %v935_v54, %v920_v50  ;;  %v2649_v8 = vcombine.low %v2627_v57, %v2634_v59  ;;  %v944_v9 = vcombine.high %v942_v60, %v942_v60  ;;  %v980_v10 = vrot.slane %v966_v62, %v10039_v15  ;;  %v9017_v57 = vld.sshfl [vmem:[%s10032_s11 + $0x78] sm:$0x33 pattern:$0x75316420] }
  0x4b   : > { %v1973_v11 = vunpack.i.h.s16 %v942_v60  ;;  %v2650_v14 = vcombine.low %v2641_v2, %v2648_v52  ;;  %v1975_v16 = vunpack.i.h.s16 %v943_v61  ;;  %v9086_v17 = vpack.i.b16 %v942_v60, %v1971_v4  ;;  %v9016_v52 = vld.sshfl [vmem:[%s10032_s11 + $0x74] sm:$0x1 pattern:$0x75316420] }
  0x4c   : > { %v2666_v18 = vcombine.low %v906_v45, %v9085_v5  ;;  %3879 = vperm.xlu0 %9769, %v3724_v63   ;;  %v2657_v20 = vrot.slane %v2649_v8, %v10039_v15  ;;  %v1977_v21 = vunpack.i.h.s16 %v944_v9  ;;  %v2669_v23 = vcombine.low %v973_v3, %v980_v10  ;;  %v9018_v63 = vld.sshfl [vmem:[%s10032_s11 + $0x7c] sm:$0x1 pattern:$0x75316420]  ;;  %v3729_v5 = vld [vmem:[%s11575_s1 + $0x108] sm:$0xff] }
  0x4d   : > { %v9087_v22 = vpack.i.b16 %v943_v61, %v1973_v11  ;;  %3884 = vperm.xlu1 %9770, %v3725_v0   ;;  %v2664_v25 = vrot.slane %v2650_v14, %v10039_v15  ;;  %v9088_v26 = vpack.i.b16 %v944_v9, %v1975_v16  ;;  %v996_v28 = vrot.slane %v9012_v6, %v10039_v15 }
  0x4e   : > { %9519 = vmatmul.mubr.msk.bf16.gmra.mxu0 %vm3391_vm1, %v2616_v55  ;;  %v2676_v27 = vrot.slane %v2666_v18, %v10039_v15  ;;  %v9089_v30 = vpack.i.b16 %v958_v58, %v1977_v21  ;;  %v2697_v32 = vrot.slane %v2669_v23, %v10039_v15  ;;  %v1004_v33 = vcombine.high %v9013_v12, %v9013_v12  ;;  %v3731_v21 = vld [vmem:[%s11575_s1 + $0x118] sm:$0xff] }
  0x4f   : > { %9522 = vmatprep.mubr.msk.bf16.mxu0 %vm9892_vm0, %v9891_v1  ;;  %v2667_v31 = vcombine.low %v9086_v17, %v9087_v22  ;;  %v2665_v34 = vcombine.low %v2657_v20, %v2664_v25  ;;  %v1011_v35 = vrot.slane %v9013_v12, %v10039_v15  ;;  %v1034_v36 = vrot.slane %v9014_v19, %v10039_v15  ;;  %v3730_v20 = vld [vmem:[%s11575_s1 + $0x110] sm:$0xff] }
  0x50   : > { %v1049_v37 = vrot.slane %v9015_v24, %v10039_v15  ;;  %3869 = vperm.xlu0 %9769, %v3722_v13   ;;  %v2668_v38 = vcombine.low %v9088_v26, %v9089_v30  ;;  %v1018_v40 = vrot.slane %v1004_v33, %v10039_v15  ;;  %v9153_v41 = vcombine.high %v973_v3, %v980_v10  ;;  %v9019_v26 = vld.sshfl [vmem:[%s10032_s11 + $0x80] sm:$0x33 pattern:$0x75316420] }
  0x51   : > { %v2683_v39 = vrot.slane %v2667_v31, %v10039_v15  ;;  %3874 = vperm.xlu1 %9770, %v3723_v29   ;;  %v1019_v43 = vcombine.high %v1011_v35, %v1011_v35  ;;  %v1989_v44 = vunpack.i.h.s16 %v1011_v35  ;;  %v9090_v45 = vpack.i.b16 %v1011_v35, %v996_v28  ;;  %v9020_v31 = vld.sshfl [vmem:[%s10032_s11 + $0x84] sm:$0x1 pattern:$0x75316420] }
  0x52   : > { %v1042_v46 = vcombine.high %v9015_v24, %v9015_v24  ;;  %v2690_v48 = vrot.slane %v2668_v38, %v10039_v15  ;;  %v1020_v50 = vcombine.high %v1018_v40, %v1018_v40  ;;  %v1991_v51 = vunpack.i.h.s16 %v1018_v40 }
  0x53   : > { %v2698_v49 = vcombine.low %v2676_v27, %v2683_v39  ;;  %v1993_v54 = vunpack.i.h.s16 %v1019_v43  ;;  %v9091_v55 = vpack.i.b16 %v1018_v40, %v1989_v44  ;;  %v2725_v56 = vrot.slane %v9153_v41, %v10039_v15 }
  0x54   : > { %v1056_v58 = vrot.slane %v1042_v46, %v10039_v15  ;;  %3889 = vperm.xlu0 %9769, %v3726_v42   ;;  %v2699_v59 = vcombine.low %v2690_v48, %v2697_v32  ;;  %v1995_v61 = vunpack.i.h.s16 %v1020_v50  ;;  %v9092_v62 = vpack.i.b16 %v1019_v43, %v1991_v51  ;;  %v3733_v32 = vld [vmem:[%s11575_s1 + $0x128] sm:$0xff] }
  0x55   : > { %v2706_v60 = vrot.slane %v2698_v49, %v10039_v15  ;;  %3894 = vperm.xlu1 %9770, %v3727_v47   ;;  %v9093_v0 = vpack.i.b16 %v1020_v50, %v1993_v54  ;;  %v2716_v2 = vcombine.low %v9090_v45, %v9091_v55  ;;  %v1057_v3 = vcombine.high %v1049_v37, %v1049_v37  ;;  %v10299_v42 = vld.sshfl [vmem:[%s10032_s11 + $0x8c] sm:$0x1 pattern:$0x75316420]  ;;  %v3732_v47 = vld [vmem:[%s11575_s1 + $0x120] sm:$0xff] }
  0x56   : > { %9523 = vmatmul.mubr.msk.bf16.gmra.mxu0 %vm3391_vm1, %v2665_v34  ;;  %v1058_v4 = vcombine.high %v1056_v58, %v1056_v58  ;;  %v2713_v6 = vrot.slane %v2699_v59, %v10039_v15  ;;  %v9094_v8 = vpack.i.b16 %v1034_v36, %v1995_v61  ;;  %v1072_v9 = vrot.slane %v9016_v52, %v10039_v15 }
  0x57   : > { %9526 = vmatprep.mubr.msk.bf16.mxu0 %vm9892_vm0, %v9891_v1  ;;  %v1080_v10 = vcombine.high %v9017_v57, %v9017_v57  ;;  %v2717_v11 = vcombine.low %v9092_v62, %v9093_v0  ;;  %v2732_v12 = vrot.slane %v2716_v2, %v10039_v15  ;;  %v1087_v13 = vrot.slane %v9017_v57, %v10039_v15  ;;  %v9023_v2 = vld.sshfl [vmem:[%s10032_s11 + $0x90] sm:$0x33 pattern:$0x75316420] }
  0x58   : > { %v1110_v14 = vrot.slane %v9018_v63, %v10039_v15  ;;  %3899 = vperm.xlu0 %9769, %v3728_v53   ;;  %v2714_v16 = vcombine.low %v2706_v60, %v2713_v6  ;;  %v2718_v17 = vcombine.low %v9094_v8, %v1049_v37  ;;  %v2764_v19 = vcombine.low %v1056_v58, %v1057_v3  ;;  %v9021_v37 = vld.sshfl [vmem:[%s10032_s11 + $0x88] sm:$0x33 pattern:$0x75316420]  ;;  %v3734_v60 = vld [vmem:[%s11575_s1 + $0x130] sm:$0xff]  ;;  %v3735_v3 = vld [vmem:[%s11575_s1 + $0x138] sm:$0xff] }
  0x59   : > { %v1094_v18 = vrot.slane %v1080_v10, %v10039_v15  ;;  %3904 = vperm.xlu1 %9770, %v3729_v5   ;;  %v2739_v22 = vrot.slane %v2717_v11, %v10039_v15  ;;  %v2747_v23 = vcombine.low %v2725_v56, %v2732_v12  ;;  %v1095_v24 = vcombine.high %v1087_v13, %v1087_v13 }
  0x5a   : > { %v2007_v25 = vunpack.i.h.s16 %v1087_v13  ;;  %v2746_v27 = vrot.slane %v2718_v17, %v10039_v15  ;;  %v9095_v30 = vpack.i.b16 %v1087_v13, %v1072_v9  ;;  %v2774_v36 = vrot.slane %v2764_v19, %v10039_v15  ;;  %v9024_v13 = vld.sshfl [vmem:[%s10032_s11 + $0x94] sm:$0x1 pattern:$0x75316420] }
  0x5b   : > { %v1096_v28 = vcombine.high %v1094_v18, %v1094_v18  ;;  %v2009_v29 = vunpack.i.h.s16 %v1094_v18  ;;  %v2755_v33 = vrot.slane %v2747_v23, %v10039_v15  ;;  %v2011_v34 = vunpack.i.h.s16 %v1095_v24 }
  0x5c   : > { %v9096_v35 = vpack.i.b16 %v1094_v18, %v2007_v25  ;;  %3909 = vperm.xlu0 %9769, %v3730_v20   ;;  %v2748_v38 = vcombine.low %v2739_v22, %v2746_v27  ;;  %v2765_v41 = vcombine.low %v1058_v4, %v9095_v30  ;;  %v1118_v44 = vcombine.high %v9019_v26, %v9019_v26  ;;  %v9025_v18 = vld.sshfl [vmem:[%s10032_s11 + $0x98] sm:$0x33 pattern:$0x75316420]  ;;  %v3736_v20 = vld [vmem:[%s11575_s1 + $0x140] sm:$0xf] }
  0x5d   : > { %v2013_v39 = vunpack.i.h.s16 %v1096_v28  ;;  %v9097_v40 = vpack.i.b16 %v1095_v24, %v2009_v29  ;;  %3914 = vperm.xlu1 %9770, %v3731_v21   ;;  %v9098_v43 = vpack.i.b16 %v1096_v28, %v2011_v34  ;;  %v1125_v45 = vrot.slane %v9019_v26, %v10039_v15 }
  0x5e   : > { %9527 = vmatmul.mubr.msk.bf16.gmra.mxu0 %vm3391_vm1, %v2714_v16  ;;  %v1148_v46 = vrot.slane %v9020_v31, %v10039_v15  ;;  %v2762_v48 = vrot.slane %v2748_v38, %v10039_v15  ;;  %v2781_v51 = vrot.slane %v2765_v41, %v10039_v15  ;;  %v1132_v52 = vrot.slane %v1118_v44, %v10039_v15 }
  0x5f   : > { %9530 = vmatprep.mubr.msk.bf16.mxu0 %vm9892_vm0, %v9891_v1  ;;  %v9099_v49 = vpack.i.b16 %v1110_v14, %v2013_v39  ;;  %v2766_v50 = vcombine.low %v9096_v35, %v9097_v40  ;;  %v1156_v53 = vcombine.high %v9021_v37, %v9021_v37  ;;  %v1163_v54 = vrot.slane %v9021_v37, %v10039_v15 }
  0x60   : > { %v1186_v55 = vrot.slane %v10299_v42, %v10039_v15  ;;  %3924 = vperm.xlu0 %9769, %v3733_v32   ;;  %v2763_v56 = vcombine.low %v2755_v33, %v2762_v48  ;;  %v2796_v59 = vcombine.low %v2774_v36, %v2781_v51  ;;  %v2813_v6 = vcombine.low %v1125_v45, %v1132_v52  ;;  %v9026_v33 = vld.sshfl [vmem:[%s10032_s11 + $0x9c] sm:$0x1 pattern:$0x75316420] }
  0x61   : > { %v2767_v57 = vcombine.low %v9098_v43, %v9099_v49  ;;  %v2788_v58 = vrot.slane %v2766_v50, %v10039_v15  ;;  %3919 = vperm.xlu1 %9770, %v3732_v47   ;;  %v1170_v61 = vrot.slane %v1156_v53, %v10039_v15  ;;  %v1171_v62 = vcombine.high %v1163_v54, %v1163_v54  ;;  %v9027_v43 = vld.sshfl [vmem:[%s10032_s11 + $0xa0] sm:$0x33 pattern:$0x75316420] }
  0x62   : > { %v2025_v63 = vunpack.i.h.s16 %v1163_v54  ;;  %v9100_v0 = vpack.i.b16 %v1163_v54, %v1148_v46  ;;  %v2804_v5 = vrot.slane %v2796_v59, %v10039_v15  ;;  %v9154_v8 = vcombine.high %v1125_v45, %v1132_v52  ;;  %v9028_v47 = vld.sshfl [vmem:[%s10032_s11 + $0xa4] sm:$0x1 pattern:$0x75316420] }
  0x63   : > { %v2795_v4 = vrot.slane %v2767_v57, %v10039_v15  ;;  %v1172_v9 = vcombine.high %v1170_v61, %v1170_v61  ;;  %v2027_v10 = vunpack.i.h.s16 %v1170_v61  ;;  %v2029_v11 = vunpack.i.h.s16 %v1171_v62  ;;  %v9029_v53 = vld.sshfl [vmem:[%s10032_s11 + $0xa8] sm:$0x33 pattern:$0x75316420] }
  0x64   : > { %v9101_v12 = vpack.i.b16 %v1170_v61, %v2025_v63  ;;  %3929 = vperm.xlu0 %9769, %v3734_v60   ;;  %v2823_v16 = vrot.slane %v2813_v6, %v10039_v15  ;;  %v2830_v17 = vrot.slane %v9154_v8, %v10039_v15  ;;  %v1194_v19 = vcombine.high %v9023_v2, %v9023_v2 }
  0x65   : > { %v2797_v14 = vcombine.low %v2788_v58, %v2795_v4  ;;  %3934 = vperm.xlu1 %9770, %v3735_v3   ;;  %v9102_v21 = vpack.i.b16 %v1171_v62, %v2027_v10  ;;  %v9103_v22 = vpack.i.b16 %v1172_v9, %v2029_v11  ;;  %v1201_v24 = vrot.slane %v9023_v2, %v10039_v15  ;;  %v9030_v11 = vld.sshfl [vmem:[%s10032_s11 + $0xac] sm:$0x1 pattern:$0x75316420] }
  0x66   : > { %9531 = vmatmul.mubr.msk.bf16.gmra.mxu0 %vm3391_vm1, %v2763_v56  ;;  %v2815_v23 = vcombine.low %v9100_v0, %v9101_v12  ;;  %v2845_v26 = vcombine.low %v2823_v16, %v2830_v17  ;;  %v1208_v27 = vrot.slane %v1194_v19, %v10039_v15  ;;  %v1224_v28 = vrot.slane %v9024_v13, %v10039_v15  ;;  %v9031_v17 = vld.sshfl [vmem:[%s10032_s11 + $0xb0] sm:$0x33 pattern:$0x75316420] }
  0x67   : > { %9534 = vmatprep.mubr.msk.bf16.mxu0 %vm9892_vm0, %v9891_v1  ;;  %v2811_v25 = vrot.slane %v2797_v14, %v10039_v15  ;;  %v2816_v29 = vcombine.low %v9102_v21, %v9103_v22  ;;  %v1209_v31 = vcombine.high %v1201_v24, %v1201_v24  ;;  %v1232_v32 = vcombine.high %v9025_v18, %v9025_v18  ;;  %v9032_v22 = vld.sshfl [vmem:[%s10032_s11 + $0xb4] sm:$0x1 pattern:$0x75316420] }
  0x68   : > { %v2837_v30 = vrot.slane %v2815_v23, %v10039_v15  ;;  %3939 = vperm.xlu0 %9769, %v3736_v20   ;;  %v2853_v35 = vrot.slane %v2845_v26, %v10039_v15  ;;  %v1210_v36 = vcombine.high %v1208_v27, %v1208_v27  ;;  %v1239_v37 = vrot.slane %v9025_v18, %v10039_v15  ;;  %v9033_v26 = vld.sshfl [vmem:[%s10032_s11 + $0xb8] sm:$0x33 pattern:$0x75316420] }
  0x69   : > { %v2812_v34 = vcombine.low %v2804_v5, %v2811_v25  ;;  %v2844_v38 = vrot.slane %v2816_v29, %v10039_v15  ;;  %v1246_v39 = vrot.slane %v1232_v32, %v10039_v15  ;;  %v2031_v40 = vunpack.i.h.s16 %v1172_v9 }
  0x6a   : > { %v2863_v41 = vcombine.low %v1208_v27, %v1209_v31  ;;  %v1247_v44 = vcombine.high %v1239_v37, %v1239_v37  ;;  %v2043_v45 = vunpack.i.h.s16 %v1239_v37  ;;  %v9105_v46 = vpack.i.b16 %v1239_v37, %v1224_v28 }
  0x6b   : > { %v1262_v48 = vrot.slane %v9026_v33, %v10039_v15  ;;  %v2846_v49 = vcombine.low %v2837_v30, %v2844_v38  ;;  %v2045_v50 = vunpack.i.h.s16 %v1246_v39  ;;  %v9104_v51 = vpack.i.b16 %v1186_v55, %v2031_v40 }
  0x6c   : > { %v2879_v52 = vrot.slane %v2863_v41, %v10039_v15  ;;  %v9106_v54 = vpack.i.b16 %v1246_v39, %v2043_v45  ;;  %v2864_v56 = vcombine.low %v1210_v36, %v9105_v46  ;;  %v1248_v57 = vcombine.high %v1246_v39, %v1246_v39 }
  0x6d   : > { %v1270_v58 = vcombine.high %v9027_v43, %v9027_v43  ;;  %v2860_v59 = vrot.slane %v2846_v49, %v10039_v15  ;;  %v9107_v60 = vpack.i.b16 %v1247_v44, %v2045_v50  ;;  %v2862_v61 = vcombine.low %v9104_v51, %v1201_v24 }
  0x6e   : > { %9535 = vmatmul.mubr.msk.bf16.gmra.mxu0 %vm3391_vm1, %v2812_v34  ;;  %v1277_v62 = vrot.slane %v9027_v43, %v10039_v15  ;;  %v2886_v42 = vrot.slane %v2864_v56, %v10039_v15  ;;  %v1300_v63 = vrot.slane %v9028_v47, %v10039_v15  ;;  %v1308_v0 = vcombine.high %v9029_v53, %v9029_v53 }
  0x6f   : > { %9538 = vmatprep.mubr.msk.bf16.mxu0 %vm9892_vm0, %v9891_v1  ;;  %v1284_v55 = vrot.slane %v1270_v58, %v10039_v15  ;;  %v2861_v2 = vcombine.low %v2853_v35, %v2860_v59  ;;  %v2865_v3 = vcombine.low %v9106_v54, %v9107_v60  ;;  %v2872_v4 = vrot.slane %v2862_v61, %v10039_v15  ;;  %v9035_v58 = vld.sshfl [vmem:[%s10032_s11 + $0xc0] sm:$0x33 pattern:$0x75316420] }
  0x70   : > { %v1315_v5 = vrot.slane %v9029_v53, %v10039_v15  ;;  %v1322_v6 = vrot.slane %v1308_v0, %v10039_v15  ;;  %v2047_v8 = vunpack.i.h.s16 %v1247_v44  ;;  %v2049_v9 = vunpack.i.h.s16 %v1248_v57  ;;  %v9034_v53 = vld.sshfl [vmem:[%s10032_s11 + $0xbc] sm:$0x1 pattern:$0x75316420] }
  0x71   : > { %v2912_v10 = vcombine.low %v1277_v62, %v1284_v55  ;;  %v2893_v12 = vrot.slane %v2865_v3, %v10039_v15  ;;  %v2894_v13 = vcombine.low %v2872_v4, %v2879_v52  ;;  %v9155_v20 = vcombine.high %v1277_v62, %v1284_v55 }
  0x72   : > { %v2061_v14 = vunpack.i.h.s16 %v1315_v5  ;;  %v9110_v16 = vpack.i.b16 %v1315_v5, %v1300_v63  ;;  %v9108_v18 = vpack.i.b16 %v1248_v57, %v2047_v8  ;;  %v9109_v19 = vpack.i.b16 %v1262_v48, %v2049_v9  ;;  %v9036_v8 = vld.sshfl [vmem:[%s10032_s11 + $0xc4] sm:$0x1 pattern:$0x75316420] }
  0x73   : > { %v2928_v21 = vrot.slane %v2912_v10, %v10039_v15  ;;  %v2895_v23 = vcombine.low %v2886_v42, %v2893_v12  ;;  %v2902_v24 = vrot.slane %v2894_v13, %v10039_v15  ;;  %v1323_v27 = vcombine.high %v1315_v5, %v1315_v5 }
  0x74   : > { %v9111_v25 = vpack.i.b16 %v1322_v6, %v2061_v14  ;;  %v2911_v28 = vcombine.low %v9108_v18, %v9109_v19  ;;  %v2935_v29 = vrot.slane %v9155_v20, %v10039_v15  ;;  %v1324_v30 = vcombine.high %v1322_v6, %v1322_v6  ;;  %v9037_v18 = vld.sshfl [vmem:[%s10032_s11 + $0xc8] sm:$0x33 pattern:$0x75316420] }
  0x75   : > { %v1338_v31 = vrot.slane %v9030_v11, %v10039_v15  ;;  %v2909_v32 = vrot.slane %v2895_v23, %v10039_v15  ;;  %v1346_v34 = vcombine.high %v9031_v17, %v9031_v17  ;;  %v1353_v35 = vrot.slane %v9031_v17, %v10039_v15 }
  0x76   : > { %9539 = vmatmul.mubr.msk.bf16.gmra.mxu0 %vm3391_vm1, %v2861_v2  ;;  %v2914_v33 = vcombine.low %v9110_v16, %v9111_v25  ;;  %v2921_v36 = vrot.slane %v2911_v28, %v10039_v15  ;;  %v1376_v37 = vrot.slane %v9032_v22, %v10039_v15  ;;  %v1391_v38 = vrot.slane %v9033_v26, %v10039_v15  ;;  %v9038_v22 = vld.sshfl [vmem:[%s10032_s11 + $0xcc] sm:$0x1 pattern:$0x75316420] }
  0x77   : > { %9542 = vmatprep.mubr.msk.bf16.mxu0 %vm9892_vm0, %v9891_v1  ;;  %v2063_v39 = vunpack.i.h.s16 %v1322_v6  ;;  %v2910_v40 = vcombine.low %v2902_v24, %v2909_v32  ;;  %v1360_v43 = vrot.slane %v1346_v34, %v10039_v15  ;;  %v1361_v44 = vcombine.high %v1353_v35, %v1353_v35 }
  0x78   : > { %v2942_v41 = vrot.slane %v2914_v33, %v10039_v15  ;;  %v2943_v45 = vcombine.low %v2921_v36, %v2928_v21  ;;  %v2065_v46 = vunpack.i.h.s16 %v1323_v27  ;;  %v2067_v47 = vunpack.i.h.s16 %v1324_v30 }
  0x79   : > { %v9112_v48 = vpack.i.b16 %v1323_v27, %v2063_v39  ;;  %v1362_v50 = vcombine.high %v1360_v43, %v1360_v43  ;;  %v9115_v51 = vpack.i.b16 %v1391_v38, %v1376_v37  ;;  %v2962_v52 = vcombine.low %v1360_v43, %v1361_v44 }
  0x7a   : > { %v2944_v49 = vcombine.low %v2935_v29, %v2942_v41  ;;  %v2951_v54 = vrot.slane %v2943_v45, %v10039_v15  ;;  %v9113_v56 = vpack.i.b16 %v1324_v30, %v2065_v46  ;;  %v9114_v57 = vpack.i.b16 %v1338_v31, %v2067_v47  ;;  %v9039_v31 = vld.sshfl [vmem:[%s10032_s11 + $0xd0] sm:$0x33 pattern:$0x75316420] }
  0x7b   : > { %v1384_v59 = vcombine.high %v9033_v26, %v9033_v26  ;;  %v2963_v61 = vcombine.low %v1362_v50, %v9115_v51  ;;  %v2984_v62 = vrot.slane %v2962_v52, %v10039_v15  ;;  %v1399_v42 = vcombine.high %v1391_v38, %v1391_v38 }
  0x7c   : > { %v2958_v60 = vrot.slane %v2944_v49, %v10039_v15  ;;  %v2960_v55 = vcombine.low %v9112_v48, %v9113_v56  ;;  %v2961_v63 = vcombine.low %v9114_v57, %v1353_v35  ;;  %v1414_v2 = vrot.slane %v9034_v53, %v10039_v15 }
  0x7d   : > { %v1398_v0 = vrot.slane %v1384_v59, %v10039_v15  ;;  %v2991_v4 = vrot.slane %v2963_v61, %v10039_v15  ;;  %v1422_v5 = vcombine.high %v9035_v58, %v9035_v58  ;;  %v1429_v6 = vrot.slane %v9035_v58, %v10039_v15 }
  0x7e   : > { %9543 = vmatmul.mubr.msk.bf16.gmra.mxu0 %vm3391_vm1, %v2910_v40  ;;  %v2959_v3 = vcombine.low %v2951_v54, %v2958_v60  ;;  %v2970_v9 = vrot.slane %v2960_v55, %v10039_v15  ;;  %v2977_v10 = vrot.slane %v2961_v63, %v10039_v15  ;;  %v2079_v12 = vunpack.i.h.s16 %v1391_v38  ;;  %v9040_v54 = vld.sshfl [vmem:[%s10032_s11 + $0xd4] sm:$0x1 pattern:$0x75316420] }
  0x7f   : > { %9546 = vmatprep.mubr.msk.bf16.mxu0 %vm9892_vm0, %v9891_v1  ;;  %v1400_v11 = vcombine.high %v1398_v0, %v1398_v0  ;;  %v2993_v13 = vcombine.low %v2984_v62, %v2991_v4  ;;  %v1436_v14 = vrot.slane %v1422_v5, %v10039_v15  ;;  %v2081_v16 = vunpack.i.h.s16 %v1398_v0  ;;  %v9041_v60 = vld.sshfl [vmem:[%s10032_s11 + $0xd8] sm:$0x33 pattern:$0x75316420] }
  0x80   : > { %v2083_v17 = vunpack.i.h.s16 %v1399_v42  ;;  %v2992_v19 = vcombine.low %v2970_v9, %v2977_v10  ;;  %v9116_v21 = vpack.i.b16 %v1398_v0, %v2079_v12  ;;  %v1452_v23 = vrot.slane %v9036_v8, %v10039_v15  ;;  %v9042_v63 = vld.sshfl [vmem:[%s10032_s11 + $0xdc] sm:$0x1 pattern:$0x75316420] }
  0x81   : > { %v2085_v20 = vunpack.i.h.s16 %v1400_v11  ;;  %v3007_v24 = vrot.slane %v2993_v13, %v10039_v15  ;;  %v9117_v25 = vpack.i.b16 %v1399_v42, %v2081_v16  ;;  %v3011_v27 = vcombine.low %v1429_v6, %v1436_v14 }
  0x82   : > { %v9118_v26 = vpack.i.b16 %v1400_v11, %v2083_v17  ;;  %v3000_v28 = vrot.slane %v2992_v19, %v10039_v15  ;;  %v9156_v30 = vcombine.high %v1429_v6, %v1436_v14  ;;  %v1460_v32 = vcombine.high %v9037_v18, %v9037_v18 }
  0x83   : > { %v9119_v29 = vpack.i.b16 %v1414_v2, %v2085_v20  ;;  %v3009_v33 = vcombine.low %v9116_v21, %v9117_v25  ;;  %v3033_v34 = vrot.slane %v3011_v27, %v10039_v15  ;;  %v1467_v35 = vrot.slane %v9037_v18, %v10039_v15 }
  0x84   : > { %v1490_v36 = vrot.slane %v9038_v22, %v10039_v15  ;;  %v3008_v37 = vcombine.low %v3000_v28, %v3007_v24  ;;  %v3040_v39 = vrot.slane %v9156_v30, %v10039_v15  ;;  %v1474_v40 = vrot.slane %v1460_v32, %v10039_v15  ;;  %v9044_v28 = vld.sshfl [vmem:[%s10032_s11 + $0xe4] sm:$0x1 pattern:$0x75316420] }
  0x85   : > { %v3010_v38 = vcombine.low %v9118_v26, %v9119_v29  ;;  %v3019_v41 = vrot.slane %v3009_v33, %v10039_v15  ;;  %v1475_v43 = vcombine.high %v1467_v35, %v1467_v35  ;;  %v1498_v44 = vcombine.high %v9039_v31, %v9039_v31  ;;  %v9045_v33 = vld.sshfl [vmem:[%s10032_s11 + $0xe8] sm:$0x33 pattern:$0x75316420] }
  0x86   : > { %9547 = vmatmul.mubr.msk.bf16.gmra.mxu0 %vm3391_vm1, %v2959_v3  ;;  %v1505_v45 = vrot.slane %v9039_v31, %v10039_v15  ;;  %v3042_v47 = vcombine.low %v3033_v34, %v3040_v39  ;;  %v1476_v48 = vcombine.high %v1474_v40, %v1474_v40  ;;  %v2097_v49 = vunpack.i.h.s16 %v1467_v35  ;;  %v9043_v3 = vld.sshfl [vmem:[%s10032_s11 + $0xe0] sm:$0x33 pattern:$0x75316420] }
  0x87   : > { %9550 = vmatprep.mubr.msk.bf16.mxu0 %vm9892_vm0, %v9891_v1  ;;  %v3026_v46 = vrot.slane %v3010_v38, %v10039_v15  ;;  %v1512_v50 = vrot.slane %v1498_v44, %v10039_v15  ;;  %v2099_v52 = vunpack.i.h.s16 %v1474_v40  ;;  %v2101_v53 = vunpack.i.h.s16 %v1475_v43 }
  0x88   : > { %v1513_v51 = vcombine.high %v1505_v45, %v1505_v45  ;;  %v3056_v57 = vrot.slane %v3042_v47, %v10039_v15  ;;  %v2103_v58 = vunpack.i.h.s16 %v1476_v48  ;;  %v9120_v59 = vpack.i.b16 %v1467_v35, %v1452_v23 }
  0x89   : > { %v3041_v56 = vcombine.low %v3019_v41, %v3026_v46  ;;  %v9121_v61 = vpack.i.b16 %v1474_v40, %v2097_v49  ;;  %v9122_v62 = vpack.i.b16 %v1475_v43, %v2099_v52  ;;  %v9123_v42 = vpack.i.b16 %v1476_v48, %v2101_v53  ;;  %v9046_v41 = vld.sshfl [vmem:[%s10032_s11 + $0xec] sm:$0x1 pattern:$0x75316420] }
  0x8a   : > { %v3061_v55 = vcombine.low %v1512_v50, %v1513_v51  ;;  %v9124_v2 = vpack.i.b16 %v1490_v36, %v2103_v58  ;;  %v1514_v4 = vcombine.high %v1512_v50, %v1512_v50  ;;  %v1528_v5 = vrot.slane %v9040_v54, %v10039_v15  ;;  %v9047_v53 = vld.sshfl [vmem:[%s10032_s11 + $0xf0] sm:$0x33 pattern:$0x75316420] }
  0x8b   : > { %v3049_v0 = vrot.slane %v3041_v56, %v10039_v15  ;;  %v3058_v6 = vcombine.low %v9120_v59, %v9121_v61  ;;  %v3059_v8 = vcombine.low %v9122_v62, %v9123_v42  ;;  %v1536_v10 = vcombine.high %v9041_v60, %v9041_v60 }
  0x8c   : > { %v3089_v9 = vrot.slane %v3061_v55, %v10039_v15  ;;  %v3060_v12 = vcombine.low %v9124_v2, %v1505_v45  ;;  %v1543_v13 = vrot.slane %v9041_v60, %v10039_v15  ;;  %v1566_v14 = vrot.slane %v9042_v63, %v10039_v15  ;;  %v9048_v63 = vld.sshfl [vmem:[%s10032_s11 + $0xf4] sm:$0x1 pattern:$0x75316420] }
  0x8d   : > { %v3057_v11 = vcombine.low %v3049_v0, %v3056_v57  ;;  %v3068_v16 = vrot.slane %v3058_v6, %v10039_v15  ;;  %v3075_v17 = vrot.slane %v3059_v8, %v10039_v15  ;;  %v1550_v18 = vrot.slane %v1536_v10, %v10039_v15 }
  0x8e   : > { %9551 = vmatmul.mubr.msk.bf16.gmra.mxu0 %vm3391_vm1, %v3008_v37  ;;  %v1574_v19 = vcombine.high %v9043_v3, %v9043_v3  ;;  %v3082_v20 = vrot.slane %v3060_v12, %v10039_v15  ;;  %v1551_v21 = vcombine.high %v1543_v13, %v1543_v13  ;;  %v1581_v22 = vrot.slane %v9043_v3, %v10039_v15 }
  0x8f   : > { %9554 = vmatprep.mubr.msk.bf16.mxu0 %vm9892_vm0, %v9891_v1  ;;  %v2115_v23 = vunpack.i.h.s16 %v1543_v13  ;;  %v3090_v24 = vcombine.low %v3068_v16, %v3075_v17  ;;  %v1552_v25 = vcombine.high %v1550_v18, %v1550_v18  ;;  %v2117_v27 = vunpack.i.h.s16 %v1550_v18 }
  0x90   : > { %v1588_v26 = vrot.slane %v1574_v19, %v10039_v15  ;;  %v3091_v29 = vcombine.low %v3082_v20, %v3089_v9  ;;  %v2119_v30 = vunpack.i.h.s16 %v1551_v21  ;;  %v9125_v31 = vpack.i.b16 %v1543_v13, %v1528_v5 }
  0x91   : > { %v9126_v32 = vpack.i.b16 %v1550_v18, %v2115_v23  ;;  %v3098_v34 = vrot.slane %v3090_v24, %v10039_v15  ;;  %v2121_v35 = vunpack.i.h.s16 %v1552_v25  ;;  %v9127_v36 = vpack.i.b16 %v1551_v21, %v2117_v27 }
  0x92   : > { %v3110_v37 = vcombine.low %v1581_v22, %v1588_v26  ;;  %v3105_v38 = vrot.slane %v3091_v29, %v10039_v15  ;;  %v9128_v39 = vpack.i.b16 %v1552_v25, %v2119_v30  ;;  %v3107_v40 = vcombine.low %v1514_v4, %v9125_v31  ;;  %v9049_v4 = vld.sshfl [vmem:[%s10032_s11 + $0xf8] sm:$0x33 pattern:$0x75316420] }
  0x93   : > { %v1604_v43 = vrot.slane %v9044_v28, %v10039_v15  ;;  %v9129_v44 = vpack.i.b16 %v1566_v14, %v2121_v35  ;;  %v3108_v45 = vcombine.low %v9126_v32, %v9127_v36  ;;  %v1612_v46 = vcombine.high %v9045_v33, %v9045_v33  ;;  %v9050_v14 = vld.sshfl [vmem:[%s10032_s11 + $0xfc] sm:$0x1 pattern:$0x75316420] }
  0x94   : > { %v3106_v47 = vcombine.low %v3098_v34, %v3105_v38  ;;  %v3117_v48 = vrot.slane %v3107_v40, %v10039_v15  ;;  %v3138_v49 = vrot.slane %v3110_v37, %v10039_v15  ;;  %v1619_v50 = vrot.slane %v9045_v33, %v10039_v15  ;;  %v9051_v37 = vld.sshfl [vmem:[%s10032_s11 + $0x100] sm:$0x33 pattern:$0x75316420] }
  0x95   : > { %v3109_v51 = vcombine.low %v9128_v39, %v9129_v44  ;;  %v3124_v52 = vrot.slane %v3108_v45, %v10039_v15  ;;  %v1626_v54 = vrot.slane %v1612_v46, %v10039_v15  ;;  %v1642_v56 = vrot.slane %v9046_v41, %v10039_v15 }
  0x96   : > { %9555 = vmatmul.mubr.msk.bf16.gmra.mxu0 %vm3391_vm1, %v3057_v11  ;;  %v1627_v57 = vcombine.high %v1619_v50, %v1619_v50  ;;  %v2133_v58 = vunpack.i.h.s16 %v1619_v50  ;;  %v9130_v59 = vpack.i.b16 %v1619_v50, %v1604_v43  ;;  %v9157_v60 = vcombine.high %v1581_v22, %v1588_v26  ;;  %v9052_v43 = vld.sshfl [vmem:[%s10032_s11 + $0x104] sm:$0x1 pattern:$0x75316420] }
  0x97   : > { %9558 = vmatprep.mubr.msk.bf16.mxu0 %vm9892_vm0, %v9891_v1  ;;  %v3131_v61 = vrot.slane %v3109_v51, %v10039_v15  ;;  %v3139_v62 = vcombine.low %v3117_v48, %v3124_v52  ;;  %v1628_v42 = vcombine.high %v1626_v54, %v1626_v54  ;;  %v2135_v55 = vunpack.i.h.s16 %v1626_v54  ;;  %v9053_v48 = vld.sshfl [vmem:[%s10032_s11 + $0x108] sm:$0x33 pattern:$0x75316420] }
  0x98   : > { %v1657_v0 = vrot.slane %v9047_v53, %v10039_v15  ;;  %v2137_v2 = vunpack.i.h.s16 %v1627_v57  ;;  %v9131_v3 = vpack.i.b16 %v1626_v54, %v2133_v58  ;;  %v1650_v5 = vcombine.high %v9047_v53, %v9047_v53 }
  0x99   : > { %v3140_v6 = vcombine.low %v3131_v61, %v3138_v49  ;;  %v2139_v8 = vunpack.i.h.s16 %v1628_v42  ;;  %v9132_v9 = vpack.i.b16 %v1627_v57, %v2135_v55  ;;  %v3166_v10 = vrot.slane %v9157_v60, %v10039_v15 }
  0x9a   : > { %v3147_v11 = vrot.slane %v3139_v62, %v10039_v15  ;;  %v9133_v12 = vpack.i.b16 %v1628_v42, %v2137_v2  ;;  %v3157_v13 = vcombine.low %v9130_v59, %v9131_v3  ;;  %v1664_v16 = vrot.slane %v1650_v5, %v10039_v15  ;;  %v9054_v5 = vld.sshfl [vmem:[%s10032_s11 + $0x10c] sm:$0x1 pattern:$0x75316420] }
  0x9b   : > { %v9134_v17 = vpack.i.b16 %v1642_v56, %v2139_v8  ;;  %v1665_v18 = vcombine.high %v1657_v0, %v1657_v0  ;;  %v1680_v19 = vrot.slane %v9048_v63, %v10039_v15  ;;  %v1688_v20 = vcombine.high %v9049_v4, %v9049_v4 }
  0x9c   : > { %v3154_v21 = vrot.slane %v3140_v6, %v10039_v15  ;;  %v3158_v22 = vcombine.low %v9132_v9, %v9133_v12  ;;  %v3173_v23 = vrot.slane %v3157_v13, %v10039_v15  ;;  %v1695_v24 = vrot.slane %v9049_v4, %v10039_v15 }
  0x9d   : > { %v3159_v25 = vcombine.low %v9134_v17, %v1657_v0  ;;  %v1666_v26 = vcombine.high %v1664_v16, %v1664_v16  ;;  %v1702_v27 = vrot.slane %v1688_v20, %v10039_v15  ;;  %v1718_v28 = vrot.slane %v9050_v14, %v10039_v15 }
  0x9e   : > { %9559 = vmatmul.mubr.msk.bf16.gmra.mxu0 %vm3391_vm1, %v3106_v47  ;;  %v3180_v29 = vrot.slane %v3158_v22, %v10039_v15  ;;  %v3188_v30 = vcombine.low %v3166_v10, %v3173_v23  ;;  %v1703_v31 = vcombine.high %v1695_v24, %v1695_v24  ;;  %v2151_v32 = vunpack.i.h.s16 %v1695_v24  ;;  %v9055_v10 = vld.sshfl [vmem:[%s10032_s11 + $0x110] sm:$0x33 pattern:$0x75316420] }
  0x9f   : > { %9562 = vmatprep.mubr.msk.bf16.mxu0 %vm9892_vm0, %v9891_v1  ;;  %v3187_v33 = vrot.slane %v3159_v25, %v10039_v15  ;;  %v1704_v34 = vcombine.high %v1702_v27, %v1702_v27  ;;  %v2153_v35 = vunpack.i.h.s16 %v1702_v27  ;;  %v9135_v36 = vpack.i.b16 %v1695_v24, %v1680_v19 }
  0xa0   : > { %v3155_v38 = vcombine.low %v3147_v11, %v3154_v21  ;;  %v2155_v39 = vunpack.i.h.s16 %v1703_v31  ;;  %v9136_v40 = vpack.i.b16 %v1702_v27, %v2151_v32  ;;  %v3205_v41 = vcombine.low %v1664_v16, %v1665_v18  ;;  %v9056_v16 = vld.sshfl [vmem:[%s10032_s11 + $0x114] sm:$0x1 pattern:$0x75316420] }
  0xa1   : > { %v3189_v44 = vcombine.low %v3180_v29, %v3187_v33  ;;  %v2157_v45 = vunpack.i.h.s16 %v1704_v34  ;;  %v9137_v46 = vpack.i.b16 %v1703_v31, %v2153_v35  ;;  %v3206_v47 = vcombine.low %v1666_v26, %v9135_v36  ;;  %v9057_v21 = vld.sshfl [vmem:[%s10032_s11 + $0x118] sm:$0x33 pattern:$0x75316420] }
  0xa2   : > { %v3196_v49 = vrot.slane %v3188_v30, %v10039_v15  ;;  %v9138_v50 = vpack.i.b16 %v1704_v34, %v2155_v39  ;;  %v3215_v51 = vrot.slane %v3205_v41, %v10039_v15  ;;  %v1726_v52 = vcombine.high %v9051_v37, %v9051_v37 }
  0xa3   : > { %v9139_v53 = vpack.i.b16 %v1718_v28, %v2157_v45  ;;  %v3207_v54 = vcombine.low %v9136_v40, %v9137_v46  ;;  %v3222_v56 = vrot.slane %v3206_v47, %v10039_v15  ;;  %v1733_v57 = vrot.slane %v9051_v37, %v10039_v15 }
  0xa4   : > { %v1740_v58 = vrot.slane %v1726_v52, %v10039_v15  ;;  %v1756_v59 = vrot.slane %v9052_v43, %v10039_v15  ;;  %v1764_v60 = vcombine.high %v9053_v48, %v9053_v48  ;;  %v1771_v61 = vrot.slane %v9053_v48, %v10039_v15 }
  0xa5   : > { %v3203_v62 = vrot.slane %v3189_v44, %v10039_v15  ;;  %v3208_v42 = vcombine.low %v9138_v50, %v9139_v53  ;;  %v3229_v55 = vrot.slane %v3207_v54, %v10039_v15  ;;  %v3237_v63 = vcombine.low %v3215_v51, %v3222_v56 }
  0xa6   : > { %9563 = vmatmul.mubr.msk.bf16.gmra.mxu0 %vm3391_vm1, %v3155_v38  ;;  %v1778_v0 = vrot.slane %v1764_v60, %v10039_v15  ;;  %v1779_v2 = vcombine.high %v1771_v61, %v1771_v61  ;;  %v2169_v3 = vunpack.i.h.s16 %v1771_v61  ;;  %v9140_v4 = vpack.i.b16 %v1771_v61, %v1756_v59 }
  0xa7   : > { %9566 = vmatprep.mubr.msk.bf16.mxu0 %vm9892_vm0, %v9891_v1  ;;  %v3236_v6 = vrot.slane %v3208_v42, %v10039_v15  ;;  %v3254_v8 = vcombine.low %v1733_v57, %v1740_v58  ;;  %v9158_v9 = vcombine.high %v1733_v57, %v1740_v58  ;;  %v3204_v17 = vcombine.low %v3196_v49, %v3203_v62  ;;  %v9058_v42 = vld.sshfl [vmem:[%s10032_s11 + $0x11c] sm:$0x1 pattern:$0x75316420] }
  0xa8   : > { %v1780_v11 = vcombine.high %v1778_v0, %v1778_v0  ;;  %v2171_v12 = vunpack.i.h.s16 %v1778_v0  ;;  %v2173_v13 = vunpack.i.h.s16 %v1779_v2  ;;  %v9141_v14 = vpack.i.b16 %v1778_v0, %v2169_v3 }
  0xa9   : > { %v3238_v18 = vcombine.low %v3229_v55, %v3236_v6  ;;  %v3245_v19 = vrot.slane %v3237_v63, %v10039_v15  ;;  %v3264_v20 = vrot.slane %v3254_v8, %v10039_v15  ;;  %v1802_v25 = vcombine.high %v9055_v10, %v9055_v10 }
  0xaa   : > { %v9142_v22 = vpack.i.b16 %v1779_v2, %v2171_v12  ;;  %v9143_v23 = vpack.i.b16 %v1780_v11, %v2173_v13  ;;  %v3256_v24 = vcombine.low %v9140_v4, %v9141_v14  ;;  %v3271_v26 = vrot.slane %v9158_v9, %v10039_v15 }
  0xab   : > { %v1794_v27 = vrot.slane %v9054_v5, %v10039_v15  ;;  %v1809_v28 = vrot.slane %v9055_v10, %v10039_v15  ;;  %v1832_v29 = vrot.slane %v9056_v16, %v10039_v15  ;;  %v3252_v30 = vrot.slane %v3238_v18, %v10039_v15  ;;  %v10530_v16 = vpop.permute.xlu0 %3789  ;;  %v10534_v18 = vpop.permute.xlu1 %3799 }
  0xac   : > { %v3257_v31 = vcombine.low %v9142_v22, %v9143_v23  ;;  %v1816_v32 = vrot.slane %v1802_v25, %v10039_v15  ;;  %v1840_v33 = vcombine.high %v9057_v21, %v9057_v21  ;;  %v3278_v34 = vrot.slane %v3256_v24, %v10039_v15  ;;  %v9777_v24 = vld [vmem:[%s11578_s4 + $0x10] sm:$0xff]  }
  0xad   : > { %v1817_v35 = vcombine.high %v1809_v28, %v1809_v28  ;;  %v1847_v36 = vrot.slane %v9057_v21, %v10039_v15  ;;  %v2175_v40 = vunpack.i.h.s16 %v1780_v11  ;;  %v3253_v45 = vcombine.low %v3245_v19, %v3252_v30 }
  0xae   : > { %9567 = vmatmul.mubr.msk.bf16.gmra.mxu0 %vm3391_vm1, %v3204_v17  ;;  %v3285_v37 = vrot.slane %v3257_v31, %v10039_v15  ;;  %v1818_v38 = vcombine.high %v1816_v32, %v1816_v32  ;;  %v1854_v39 = vrot.slane %v1840_v33, %v10039_v15  ;;  %v3286_v46 = vcombine.low %v3264_v20, %v3271_v26  ;;  %v10557_v26 = vld [vmem:[%s11577_s3] ss:$0 sm:$0xff] }
  0xaf   : > { %9570 = vmatprep.mubr.msk.bf16.mxu0 %vm9892_vm0, %v9891_v1  ;;  %v1855_v41 = vcombine.high %v1847_v36, %v1847_v36  ;;  %v2187_v43 = vunpack.i.h.s16 %v1847_v36  ;;  %v9145_v44 = vpack.i.b16 %v1847_v36, %v1832_v29  ;;  %v9144_v48 = vpack.i.b16 %v1794_v27, %v2175_v40  ;;  %v10532_v17 = vpop.permute.xlu0 %3794  ;;  %v10538_v20 = vpop.permute.xlu1 %3804 }
  0xb0   : > { %v2189_v47 = vunpack.i.h.s16 %v1854_v39  ;;  %v3287_v49 = vcombine.low %v3278_v34, %v3285_v37  ;;  %v3304_v51 = vcombine.low %v1816_v32, %v1817_v35  ;;  %v3294_v56 = vrot.slane %v3286_v46, %v10039_v15 }
  0xb1   : > { %v9146_v50 = vpack.i.b16 %v1854_v39, %v2187_v43  ;;  %v3305_v52 = vcombine.low %v1818_v38, %v9145_v44  ;;  %v3303_v54 = vcombine.low %v9144_v48, %v1809_v28  ;;  %v1856_v58 = vcombine.high %v1854_v39, %v1854_v39 }
  0xb2   : > { %v9147_v53 = vpack.i.b16 %v1855_v41, %v2189_v47  ;;  %v3301_v59 = vrot.slane %v3287_v49, %v10039_v15  ;;  %v3320_v61 = vrot.slane %v3304_v51, %v10039_v15  ;;  %v1870_v63 = vrot.slane %v9058_v42, %v10039_v15 }
  0xb3   : > { %v3313_v60 = vrot.slane %v3303_v54, %v10039_v15  ;;  %v3327_v62 = vrot.slane %v3305_v52, %v10039_v15  ;;  %v2191_v0 = vunpack.i.h.s16 %v1855_v41  ;;  %v2193_v5 = vunpack.i.h.s16 %v1856_v58  ;;  %v10536_v19 = vpop.permute.xlu0 %3809  ;;  %v10542_v22 = vpop.permute.xlu1 %3814 }
  0xb4   : > { %v3306_v57 = vcombine.low %v9146_v50, %v9147_v53  ;;  %v3302_v2 = vcombine.low %v3294_v56, %v3301_v59  ;;  %v9895_v38 = vmov 1935823168  }
  0xb5   : > { %v3335_v3 = vcombine.low %v3313_v60, %v3320_v61  ;;  %v9148_v9 = vpack.i.b16 %v1856_v58, %v2191_v0  ;;  %v9149_v10 = vpack.i.b16 %v1870_v63, %v2193_v5  ;;  %v5534_v39 = vunpack.c.l.s4 %v9895_v38 }
  0xb6   : > { %9571 = vmatmul.mubr.msk.bf16.gmra.mxu0 %vm3391_vm1, %v3253_v45  ;;  %v3334_v55 = vrot.slane %v3306_v57, %v10039_v15 }
  0xb7   : > { %9574 = vmatprep.mubr.msk.bf16.mxu0 %vm9892_vm0, %v9891_v1  ;;  %v3343_v6 = vrot.slane %v3335_v3, %v10039_v15  ;;  %v3352_v12 = vcombine.low %v9148_v9, %v9149_v10  ;;  %v10540_v21 = vpop.permute.xlu0 %3819  ;;  %v10552_v25 = vpop.permute.xlu1 %3824  ;;  %v5535_v49 = vunpack.c.0.s8 %v5534_v39 }
  0xb8   : > { %v3336_v4 = vcombine.low %v3327_v62, %v3334_v55 }
  0xb9   : > { %v3359_v13 = vrot.slane %v3352_v12, %v10039_v15  ;;  %v10570_v62 = vsub.s32 %v5535_v49, %v10017_v7 }
  0xba   : > { %v3350_v8 = vrot.slane %v3336_v4, %v10039_v15 }
  0xbb   : > { %v3366_v14 = vrot.slane %v3359_v13, %v10039_v15  ;;  %v10547_v23 = vpop.permute.xlu0 %3829  ;;  %v10560_v31 = vpop.permute.xlu1 %3834 }
  0xbc   : > { %v3351_v11 = vcombine.low %v3343_v6, %v3350_v8 }
  0xbe   : > { %9575 = vmatmul.mubr.msk.bf16.gmra.mxu0 %vm3391_vm1, %v3302_v2 }
  0xbf   : > { %9578 = vmatprep.mubr.msk.bf16.mxu0 %vm9892_vm0, %v9891_v1  ;;  %v3745_v27 = vpop.permute.xlu0 %3744  ;;  %v3755_v44 = vpop.permute.xlu1 %3754 }
  0xc3   : > { %v3740_v35 = vpop.permute.xlu0 %3739  ;;  %v3750_v61 = vpop.permute.xlu1 %3749 }
  0xc6   : > { %9579 = vmatmul.mubr.msk.bf16.gmra.mxu0 %vm3391_vm1, %v3351_v11 }
  0xc7   : > { %9582 = vmatprep.mubr.msk.bf16.mxu0 %vm9892_vm0, %v9891_v1  ;;  %v9776_v1 = vld [vmem:[%s11578_s4 + $0x18] sm:$0xff]  }
  0xc8   : > { %9586 = vmatprep.subr.bf16.mxu1 %v9776_v1 }
  0xc9   : > { %9587 = vmatpush3.bf16.msra.mxu1 %v9776_v1 }
  0xca   : > { %9588 = vmatprep.subr.bf16.mxu1 %v9777_v24 }
  0xcd   : > { %9589 = vmatpush3.bf16.msra.mxu1 %v9777_v24 }
  0xce   : > { %9583 = vmatmul.mubr.msk.bf16.gmra.mxu0 %vm3391_vm1, %v3366_v14 }
  0xee   : > { %v3489_v28 = vpop.f32.mrf.mxu0 }
  0xef   : > { %v3490_v29 = vadd.f32 %v10557_v26, %v3489_v28 }
  0xf0   : > { %v9504_v30 = vpop.f32.mrf.mxu0 }
  0xf1   : > { %v3655_v33 = vmax.f32 %v3490_v29, 0.0  ;;  %v6976_v30 = vld [vmem:[#allocation2 + $0x4] sm:$0x1] }
  0xf2   : > { %v3492_v32 = vpop.f32.mrf.mxu0 }
  0xf3   : > { %v3493_v34 = vadd.f32 %v10557_v26, %v3492_v32  ;;  %v3942_v41 = vmul.f32 %v3740_v35, %v3655_v33 }
  0xf4   : > { %v9505_v36 = vpop.f32.mrf.mxu0 }
  0xf5   : > { %v3656_v37 = vmax.f32 %v3493_v34, 0.0 }
  0xf6   : > { %v3497_v40 = vpop.f32.mrf.mxu0 }
  0xf7   : > { %v3943_v43 = vmul.f32 %v3745_v27, %v3656_v37  ;;  %v3498_v45 = vadd.f32 %v10557_v26, %v3497_v40 }
  0xf8   : > { %v9508_v46 = vpop.f32.mrf.mxu0 }
  0xf9   : > { %v3983_v47 = vpack.c.bf16 %v3943_v43, %v3942_v41  ;;  %v9184_v48 = vpack.c.bf16 %v3943_v43, %v3943_v43  ;;  %v3657_v54 = vmax.f32 %v3498_v45, 0.0 }
  0xfa   : > { %v3500_v50 = vpop.f32.mrf.mxu0 }
  0xfb   : > { %v4032_v51 = vrot.slane %v3983_v47, %v10039_v15  ;;  %v4039_v52 = vrot.slane %v9184_v48, %v10039_v15  ;;  %v3501_v53 = vadd.f32 %v10557_v26, %v3500_v50  ;;  %v3944_v6 = vmul.f32 %v3750_v61, %v3657_v54 }
  0xfc   : > { %v9509_v56 = vpop.f32.mrf.mxu0 }
  0xfd   : > { %v4040_v57 = vcombine.high %v4032_v51, %v4032_v51  ;;  %v4041_v58 = vcombine.high %v4039_v52, %v4039_v52  ;;  %v4048_v59 = vrot.slane %v4032_v51, %v10039_v15  ;;  %v4055_v60 = vrot.slane %v4039_v52, %v10039_v15 }
  0xfe   : > { %v3658_v42 = vmax.f32 %v3501_v53, 0.0  ;;  %v3505_v55 = vpop.f32.mrf.mxu0 }
  0xff   : > { %v4062_v63 = vrot.slane %v4040_v57, %v10039_v15  ;;  %v4069_v0 = vrot.slane %v4041_v58, %v10039_v15  ;;  %v4070_v2 = vcombine.high %v4048_v59, %v4048_v59  ;;  %v4071_v3 = vcombine.high %v4055_v60, %v4055_v60  ;;  %v3760_v58 = vpop.permute.xlu0 %3759 }
 0x100   : > { %v5035_v4 = vunpack.i.l.s16 %v4055_v60  ;;  %v5036_v5 = vunpack.i.h.s16 %v4055_v60  ;;  %v3945_v8 = vmul.f32 %v3755_v44, %v3658_v42  ;;  %v9512_v9 = vpop.f32.mrf.mxu0  ;;  %v3506_v33 = vadd.f32 %v10557_v26, %v3505_v55 }
 0x101   : > { %v4072_v10 = vcombine.high %v4062_v63, %v4062_v63  ;;  %v4073_v11 = vcombine.high %v4069_v0, %v4069_v0  ;;  %v5038_v12 = vunpack.i.h.s16 %v4069_v0  ;;  %v5040_v7 = vunpack.i.h.s16 %v4071_v3  ;;  %v6980_v9 = vld [vmem:[#allocation2 + $0xc] sm:$0x1] }
 0x102   : > { %v5531_v13 = vcombine.low %v4048_v59, %v4070_v2  ;;  %v5561_v14 = vrot.slane %v5035_v4, %v10570_v62  ;;  %v3984_v1 = vpack.c.bf16 %v3945_v8, %v3944_v6  ;;  %v3508_v24 = vpop.f32.mrf.mxu0  ;;  %v9185_v32 = vpack.c.bf16 %v3945_v8, %v3945_v8 }
 0x103   : > { %v9206_v27 = vpack.i.b16 %v4073_v11, %v5040_v7  ;;  %v5532_v28 = vcombine.low %v4062_v63, %v4072_v10  ;;  %v9204_v34 = vpack.i.b16 %v4069_v0, %v5036_v5  ;;  %v9205_v35 = vpack.i.b16 %v4071_v3, %v5038_v12  ;;  %v10598_v63 = vld [vmem:[%s11578_s4 + $0x8] sm:$0xff]  }
 0x104   : > { %v5568_v36 = vrot.slane %v5561_v14, %v10570_v62  ;;  %v4081_v37 = vrot.slane %v3984_v1, %v10039_v15  ;;  %v9513_v38 = vpop.f32.mrf.mxu0  ;;  %v5539_v39 = vrot.slane %v5531_v13, %v10570_v62  ;;  %v4088_v41 = vrot.slane %v9185_v32, %v10039_v15  ;;  %9598 = vmatprep.subr.bf16.mxu1 %v10598_v63  ;;  %v3775_v32 = vpop.permute.xlu0 %3774 }
 0x105   : > { %v5546_v40 = vrot.slane %v5532_v28, %v10570_v62  ;;  %v5042_v43 = vunpack.i.h.s16 %v4073_v11  ;;  %v5569_v44 = vcombine.low %v9204_v34, %v9206_v27  ;;  %v3659_v52 = vmax.f32 %v3506_v33, 0.0  ;;  %v3765_v11 = vpop.permute.xlu1 %3764 }
 0x106   : > { %v6977_v45 = vsel %vm10577_vm5, %v5568_v36, %v6976_v30  ;;  %v4089_v46 = vcombine.high %v4081_v37, %v4081_v37  ;;  %v4097_v47 = vrot.slane %v4081_v37, %v10039_v15  ;;  %v3513_v48 = vpop.f32.mrf.mxu0  ;;  %v4090_v50 = vcombine.high %v4088_v41, %v4088_v41  ;;  %v6984_v37 = vld [vmem:[#allocation2 + $0x14] sm:$0x1] }
 0x107   : > { %v5547_v49 = vcombine.low %v5539_v39, %v5546_v40  ;;  %6978 = vst [vmem:[#allocation2 + $0x4] sm:$0x1] %v6977_v45  ;;  %v4104_v51 = vrot.slane %v4088_v41, %v10039_v15  ;;  %v3509_v55 = vadd.f32 %v10557_v26, %v3508_v24  ;;  %v5577_v6 = vrot.slane %v5569_v44, %v10570_v62 }
 0x108   : > { %v4111_v53 = vrot.slane %v4089_v46, %v10039_v15  ;;  %v4119_v54 = vcombine.high %v4097_v47, %v4097_v47  ;;  %v5044_v56 = vunpack.i.h.s16 %v4097_v47  ;;  %v9207_v57 = vpack.i.b16 %v4097_v47, %v5042_v43  ;;  %v9516_v59 = vpop.f32.mrf.mxu0 }
 0x109   : > { %v5554_v60 = vrot.slane %v5547_v49, %v10570_v62  ;;  %v4118_v61 = vrot.slane %v4090_v50, %v10039_v15  ;;  %v4120_v42 = vcombine.high %v4104_v51, %v4104_v51  ;;  %v3946_v10 = vmul.f32 %v3760_v58, %v3659_v52 }
 0x10a   : > { %v4121_v0 = vcombine.high %v4111_v53, %v4111_v53  ;;  %v5570_v2 = vcombine.low %v9205_v35, %v9207_v57  ;;  %v5599_v3 = vrot.slane %v5044_v56, %v10570_v62  ;;  %v5608_v4 = vcombine.low %v4119_v54, %v4104_v51  ;;  %v3516_v5 = vpop.f32.mrf.mxu0  ;;  %v3770_v54 = vpop.permute.xlu1 %3769 }
 0x10b   : > { %6972 = vst.msk [vmem:[#allocation2] sm:$0xf] %vm6971_vm4, %v5554_v60  ;;  %v5053_v8 = vunpack.i.l.s16 %v4118_v61  ;;  %v5054_v12 = vunpack.i.h.s16 %v4118_v61  ;;  %v4122_v24 = vcombine.high %v4118_v61, %v4118_v61  ;;  %v5056_v27 = vunpack.i.h.s16 %v4120_v42 }
 0x10c   : > { %v5584_v7 = vrot.slane %v5570_v2, %v10570_v62  ;;  %v5606_v13 = vrot.slane %v5599_v3, %v10570_v62  ;;  %v5607_v14 = vcombine.low %v4111_v53, %v4121_v0  ;;  %v9517_v1 = vpop.f32.mrf.mxu0  ;;  %v3660_v30 = vmax.f32 %v3509_v55, 0.0  ;;  %v3780_v0 = vpop.permute.xlu0 %3779 }
 0x10d   : > { %v5637_v28 = vrot.slane %v5053_v8, %v10570_v62  ;;  %v5622_v35 = vrot.slane %v5608_v4, %v10570_v62  ;;  %v3514_v41 = vadd.f32 %v10557_v26, %v3513_v48  ;;  %v3517_v43 = vadd.f32 %v10557_v26, %v3516_v5 }
 0x10e   : > { %v5585_v33 = vcombine.low %v5577_v6, %v5584_v7  ;;  %v5615_v34 = vrot.slane %v5607_v14, %v10570_v62  ;;  %v6981_v36 = vsel %vm10577_vm5, %v5606_v13, %v6980_v9  ;;  %v3521_v38 = vpop.f32.mrf.mxu0  ;;  %v3947_v40 = vmul.f32 %v3765_v11, %v3660_v30 }
 0x10f   : > { %v5644_v39 = vrot.slane %v5637_v28, %v10570_v62  ;;  %6982 = vst [vmem:[#allocation2 + $0xc] sm:$0x1] %v6981_v36  ;;  %v10614_v44 = vpack.i.b16 %v4120_v42, %v5054_v12  ;;  %v3522_v47 = vadd.f32 %v10557_v26, %v3521_v38  ;;  %v3661_v53 = vmax.f32 %v3514_v41, 0.0 }
 0x110   : > { %v5592_v45 = vrot.slane %v5585_v33, %v10570_v62  ;;  %v5623_v46 = vcombine.low %v5615_v34, %v5622_v35  ;;  %v9520_v49 = vpop.f32.mrf.mxu0  ;;  %v3985_v51 = vpack.c.bf16 %v3947_v40, %v3946_v10  ;;  %v9186_v52 = vpack.c.bf16 %v3947_v40, %v3947_v40 }
 0x111   : > { %v6985_v50 = vsel %vm10577_vm5, %v5644_v39, %v6984_v37  ;;  %v9209_v56 = vpack.i.b16 %v4122_v24, %v5056_v27  ;;  %v3662_v57 = vmax.f32 %v3517_v43, 0.0  ;;  %v3663_v58 = vmax.f32 %v3522_v47, 0.0 }
 0x112   : > { %v5630_v48 = vrot.slane %v5623_v46, %v10570_v62  ;;  %6979 = vst.msk [vmem:[#allocation2 + $0x8] sm:$0xf] %vm6971_vm4, %v5592_v45  ;;  %6986 = vst [vmem:[#allocation2 + $0x14] sm:$0x1] %v6985_v50  ;;  %v3524_v59 = vpop.f32.mrf.mxu0  ;;  %v10622_v60 = vld [vmem:[#allocation2] sm:$0xf]  ;;  %v4130_v61 = vrot.slane %v3985_v51, %v10039_v15  ;;  %v4137_v42 = vrot.slane %v9186_v52, %v10039_v15  ;;  %v5058_v55 = vunpack.i.h.s16 %v4122_v24 }
 0x113   : > { %v10627_v2 = vadd.f32 %v10557_v26, %v3524_v59  ;;  %v3948_v3 = vmul.f32 %v3770_v54, %v3661_v53  ;;  %v3949_v4 = vmul.f32 %v3775_v32, %v3662_v57  ;;  %v10630_v5 = vmul.f32 %v3780_v0, %v3663_v58  ;;  %v6988_v54 = vld [vmem:[#allocation2 + $0x1c] sm:$0x1] }
 0x114   : > { %6983 = vst.msk [vmem:[#allocation2 + $0x10] sm:$0xf] %vm6971_vm4, %v5630_v48  ;;  %v9521_v6 = vpop.f32.mrf.mxu0  ;;  %v7387_v8 = vshrl.u32 %v10622_v60, 16  ;;  %v4138_v9 = vcombine.high %v4130_v61, %v4130_v61  ;;  %v4139_v10 = vcombine.high %v4137_v42, %v4137_v42  ;;  %v4146_v11 = vrot.slane %v4130_v61, %v10039_v15  ;;  %v6992_v48 = vld [vmem:[#allocation2 + $0x24] sm:$0x1] }
 0x115   : > { %v4153_v12 = vrot.slane %v4137_v42, %v10039_v15  ;;  %v3986_v7 = vpack.c.bf16 %v3949_v4, %v3948_v3  ;;  %v9187_v13 = vpack.c.bf16 %v3949_v4, %v3949_v4  ;;  %v3664_v14 = vmax.f32 %v10627_v2, 0.0 }
 0x116   : > { %v10636_v1 = vpop.f32.mrf.mxu0  ;;  %v7390_v24 = vshll.u32 %v10622_v60, 16  ;;  %v4160_v27 = vrot.slane %v4138_v9, %v10039_v15  ;;  %v4167_v28 = vrot.slane %v4139_v10, %v10039_v15  ;;  %v4168_v30 = vcombine.high %v4146_v11, %v4146_v11 }
 0x117   : > { %v4169_v32 = vcombine.high %v4153_v12, %v4153_v12  ;;  %v5060_v33 = vunpack.i.h.s16 %v4146_v11  ;;  %v9210_v34 = vpack.i.b16 %v4146_v11, %v5058_v55  ;;  %v4179_v35 = vrot.slane %v3986_v7, %v10039_v15 }
 0x118   : > { %v4186_v36 = vrot.slane %v9187_v13, %v10039_v15  ;;  %v9524_v37 = vpop.f32.mrf.mxu0  ;;  %v4170_v38 = vcombine.high %v4160_v27, %v4160_v27  ;;  %v4171_v39 = vcombine.high %v4167_v28, %v4167_v28  ;;  %v5062_v40 = vunpack.i.h.s16 %v4160_v27 }
 0x119   : > { %v5071_v41 = vunpack.i.l.s16 %v4169_v32  ;;  %v5072_v43 = vunpack.i.h.s16 %v4169_v32  ;;  %v9211_v45 = vpack.i.b16 %v4160_v27, %v5060_v33  ;;  %v5645_v46 = vcombine.low %v10614_v44, %v9210_v34 }
 0x11a   : > { %v5683_v47 = vcombine.low %v4168_v30, %v4153_v12  ;;  %v10644_v49 = vpop.f32.mrf.mxu0  ;;  %v5074_v50 = vunpack.i.h.s16 %v4171_v39  ;;  %v5675_v51 = vrot.slane %v5062_v40, %v10570_v62  ;;  %v5684_v52 = vcombine.low %v4170_v38, %v4167_v28 }
 0x11b   : > { %v5713_v53 = vrot.slane %v5071_v41, %v10570_v62  ;;  %v9212_v57 = vpack.i.b16 %v4171_v39, %v5072_v43  ;;  %v5646_v58 = vcombine.low %v9209_v56, %v9211_v45  ;;  %v5653_v59 = vrot.slane %v5645_v46, %v10570_v62 }
 0x11c   : > { %v5691_v61 = vrot.slane %v5683_v47, %v10570_v62  ;;  %v9525_v42 = vpop.f32.mrf.mxu0  ;;  %v5682_v44 = vrot.slane %v5675_v51, %v10570_v62  ;;  %v5698_v55 = vrot.slane %v5684_v52, %v10570_v62  ;;  %v4187_v3 = vcombine.high %v4179_v35, %v4179_v35  ;;  %v3785_v52 = vpop.permute.xlu1 %3784 }
 0x11d   : > { %v5720_v0 = vrot.slane %v5713_v53, %v10570_v62  ;;  %v5660_v4 = vrot.slane %v5646_v58, %v10570_v62  ;;  %v4188_v6 = vcombine.high %v4186_v36, %v4186_v36  ;;  %v4195_v9 = vrot.slane %v4179_v35, %v10039_v15 }
 0x11e   : > { %v4202_v10 = vrot.slane %v4186_v36, %v10039_v15  ;;  %v10656_v56 = vpop.f32.mrf.mxu0  ;;  %v5699_v11 = vcombine.low %v5691_v61, %v5698_v55  ;;  %v6989_v12 = vsel %vm10577_vm5, %v5682_v44, %v6988_v54  ;;  %v4209_v13 = vrot.slane %v4187_v3, %v10039_v15  ;;  %v6996_v55 = vld [vmem:[#allocation2 + $0x2c] sm:$0x1] }
 0x11f   : > { %v6993_v7 = vsel %vm10577_vm5, %v5720_v0, %v6992_v48  ;;  %v5661_v27 = vcombine.low %v5653_v59, %v5660_v4  ;;  %6990 = vst [vmem:[#allocation2 + $0x1c] sm:$0x1] %v6989_v12  ;;  %v4216_v28 = vrot.slane %v4188_v6, %v10039_v15  ;;  %v4217_v30 = vcombine.high %v4195_v9, %v4195_v9 }
 0x120   : > { %6994 = vst [vmem:[#allocation2 + $0x24] sm:$0x1] %v6993_v7  ;;  %v4218_v32 = vcombine.high %v4202_v10, %v4202_v10  ;;  %v9528_v33 = vpop.f32.mrf.mxu0  ;;  %v5706_v34 = vrot.slane %v5699_v11, %v10570_v62  ;;  %v4219_v35 = vcombine.high %v4209_v13, %v4209_v13  ;;  %v5076_v36 = vunpack.i.h.s16 %v4195_v9 }
 0x121   : > { %v5078_v37 = vunpack.i.h.s16 %v4209_v13  ;;  %v5668_v38 = vrot.slane %v5661_v27, %v10570_v62  ;;  %v4220_v39 = vcombine.high %v4216_v28, %v4216_v28  ;;  %v5080_v40 = vunpack.i.h.s16 %v4217_v30 }
 0x122   : > { %v9213_v41 = vpack.i.b16 %v4195_v9, %v5074_v50  ;;  %v10666_v43 = vpop.f32.mrf.mxu0  ;;  %6991 = vst.msk [vmem:[#allocation2 + $0x20] sm:$0xf] %vm6971_vm4, %v5706_v34  ;;  %v9214_v45 = vpack.i.b16 %v4209_v13, %v5076_v36  ;;  %v5759_v47 = vcombine.low %v4219_v35, %v4216_v28  ;;  %v5760_v51 = vcombine.low %v4202_v10, %v4218_v32  ;;  %v7000_v10 = vld [vmem:[#allocation2 + $0x34] sm:$0x1] }
 0x123   : > { %v9215_v46 = vpack.i.b16 %v4217_v30, %v5078_v37  ;;  %6987 = vst.msk [vmem:[#allocation2 + $0x18] sm:$0xf] %vm6971_vm4, %v5668_v38  ;;  %v5089_v53 = vunpack.i.l.s16 %v4220_v39  ;;  %v5090_v54 = vunpack.i.h.s16 %v4220_v39  ;;  %v5751_v48 = vrot.slane %v5080_v40, %v10570_v62 }
 0x124   : > { %v3951_v58 = vmul.f32 %v3785_v52, %v3664_v14  ;;  %v9529_v59 = vpop.f32.mrf.mxu0  ;;  %v5721_v50 = vcombine.low %v9212_v57, %v9214_v45  ;;  %v5767_v42 = vrot.slane %v5759_v47, %v10570_v62  ;;  %v5774_v44 = vrot.slane %v5760_v51, %v10570_v62 }
 0x125   : > { %v5722_v61 = vcombine.low %v9213_v41, %v9215_v46  ;;  %v5758_v0 = vrot.slane %v5751_v48, %v10570_v62  ;;  %v5789_v3 = vrot.slane %v5089_v53, %v10570_v62  ;;  %v3530_v11 = vadd.f32 %v10557_v26, %v10636_v1 }
 0x126   : > { %v3987_v4 = vpack.c.bf16 %v3951_v58, %v10630_v5  ;;  %v9188_v6 = vpack.c.bf16 %v3951_v58, %v3951_v58  ;;  %v10678_v9 = vpop.f32.mrf.mxu0  ;;  %v5729_v2 = vrot.slane %v5721_v50, %v10570_v62  ;;  %v5775_v57 = vcombine.low %v5767_v42, %v5774_v44 }
 0x127   : > { %v5736_v14 = vrot.slane %v5722_v61, %v10570_v62  ;;  %v5796_v12 = vrot.slane %v5789_v3, %v10570_v62  ;;  %v6997_v7 = vsel %vm10577_vm5, %v5758_v0, %v6996_v55  ;;  %v3665_v32 = vmax.f32 %v3530_v11, 0.0 }
 0x128   : > { %v4228_v13 = vrot.slane %v3987_v4, %v10039_v15  ;;  %v4235_v5 = vrot.slane %v9188_v6, %v10039_v15  ;;  %v9532_v27 = vpop.f32.mrf.mxu0  ;;  %v5782_v30 = vrot.slane %v5775_v57, %v10570_v62  ;;  %6998 = vst [vmem:[#allocation2 + $0x2c] sm:$0x1] %v6997_v7  ;;  %v3533_v33 = vadd.f32 %v10557_v26, %v10644_v49 }
 0x129   : > { %v5737_v28 = vcombine.low %v5729_v2, %v5736_v14  ;;  %v7001_v1 = vsel %vm10577_vm5, %v5796_v12, %v7000_v10  ;;  %v3952_v40 = vmul.f32 %v10530_v16, %v3665_v32  ;;  %v10707_v58 = vadd.f32 %v10557_v26, %v10656_v56  ;;  %v7004_v27 = vld [vmem:[#allocation2 + $0x3c] sm:$0x1] }
 0x12a   : > { %v4236_v34 = vcombine.high %v4228_v13, %v4228_v13  ;;  %v4237_v35 = vcombine.high %v4235_v5, %v4235_v5  ;;  %v4244_v36 = vrot.slane %v4228_v13, %v10039_v15  ;;  %v10695_v37 = vpop.f32.mrf.mxu0  ;;  %6999 = vst.msk [vmem:[#allocation2 + $0x30] sm:$0xf] %vm6971_vm4, %v5782_v30  ;;  %7002 = vst [vmem:[#allocation2 + $0x34] sm:$0x1] %v7001_v1  ;;  %v3666_v41 = vmax.f32 %v3533_v33, 0.0 }
 0x12b   : > { %v5744_v38 = vrot.slane %v5737_v28, %v10570_v62  ;;  %v4251_v39 = vrot.slane %v4235_v5, %v10039_v15  ;;  %v3667_v10 = vmax.f32 %v10707_v58, 0.0 }
 0x12c   : > { %v4258_v49 = vrot.slane %v4236_v34, %v10039_v15  ;;  %v4265_v45 = vrot.slane %v4237_v35, %v10039_v15  ;;  %v4266_v46 = vcombine.high %v4244_v36, %v4244_v36  ;;  %v5092_v47 = vunpack.i.h.s16 %v4244_v36  ;;  %v9533_v51 = vpop.f32.mrf.mxu0 }
 0x12d   : > { %6995 = vst.msk [vmem:[#allocation2 + $0x28] sm:$0xf] %vm6971_vm4, %v5744_v38  ;;  %v4267_v52 = vcombine.high %v4251_v39, %v4251_v39  ;;  %v9216_v53 = vpack.i.b16 %v4244_v36, %v5090_v54  ;;  %v3953_v48 = vmul.f32 %v10532_v17, %v3666_v41 }
 0x12e   : > { %v4268_v59 = vcombine.high %v4258_v49, %v4258_v49  ;;  %v4269_v16 = vcombine.high %v4265_v45, %v4265_v45  ;;  %v5094_v50 = vunpack.i.h.s16 %v4258_v49  ;;  %v5096_v61 = vunpack.i.h.s16 %v4266_v46  ;;  %v10709_v42 = vpop.f32.mrf.mxu0 }
 0x12f   : > { %v9217_v44 = vpack.i.b16 %v4258_v49, %v5092_v47  ;;  %v5835_v55 = vcombine.low %v4251_v39, %v4267_v52  ;;  %v3988_v0 = vpack.c.bf16 %v3953_v48, %v3952_v40  ;;  %v9189_v3 = vpack.c.bf16 %v3953_v48, %v3953_v48 }
 0x130   : > { %v5098_v4 = vunpack.i.h.s16 %v4268_v59  ;;  %v9218_v6 = vpack.i.b16 %v4266_v46, %v5094_v50  ;;  %v9219_v2 = vpack.i.b16 %v4268_v59, %v5096_v61  ;;  %v5836_v54 = vcombine.low %v4265_v45, %v4269_v16  ;;  %v9536_v14 = vpop.f32.mrf.mxu0 }
 0x131   : > { %v5843_v17 = vrot.slane %v5835_v55, %v10570_v62  ;;  %v4277_v56 = vrot.slane %v3988_v0, %v10039_v15  ;;  %v4284_v57 = vrot.slane %v9189_v3, %v10039_v15 }
 0x132   : > { %v5797_v11 = vcombine.low %v9216_v53, %v9218_v6  ;;  %v5798_v12 = vcombine.low %v9217_v44, %v9219_v2  ;;  %v5827_v7 = vrot.slane %v5098_v4, %v10570_v62  ;;  %v5850_v13 = vrot.slane %v5836_v54, %v10570_v62  ;;  %v3556_v5 = vpop.f32.mrf.mxu0  ;;  %v7008_v2 = vld [vmem:[#allocation2 + $0x44] sm:$0x1] }
 0x133   : > { %v4285_v28 = vcombine.high %v4277_v56, %v4277_v56  ;;  %v4286_v30 = vcombine.high %v4284_v57, %v4284_v57  ;;  %v4293_v32 = vrot.slane %v4277_v56, %v10039_v15  ;;  %v10719_v33 = vrot.slane %v4284_v57, %v10039_v15 }
 0x134   : > { %v5805_v1 = vrot.slane %v5797_v11, %v10570_v62  ;;  %v5812_v34 = vrot.slane %v5798_v12, %v10570_v62  ;;  %v5834_v35 = vrot.slane %v5827_v7, %v10570_v62  ;;  %v5851_v36 = vcombine.low %v5843_v17, %v5850_v13  ;;  %v9537_v38 = vpop.f32.mrf.mxu0  ;;  %v7012_v13 = vld [vmem:[#allocation2 + $0x4c] sm:$0x1] }
 0x135   : > { %v4307_v39 = vrot.slane %v4285_v28, %v10039_v15  ;;  %v4314_v40 = vrot.slane %v4286_v30, %v10039_v15  ;;  %v4315_v41 = vcombine.high %v4293_v32, %v4293_v32  ;;  %v5107_v49 = vunpack.i.l.s16 %v4293_v32 }
 0x136   : > { %v5813_v45 = vcombine.low %v5805_v1, %v5812_v34  ;;  %v5858_v46 = vrot.slane %v5851_v36, %v10570_v62  ;;  %v7005_v47 = vsel %vm10577_vm5, %v5834_v35, %v7004_v27  ;;  %v5108_v51 = vunpack.i.h.s16 %v4293_v32  ;;  %v3561_v52 = vpop.f32.mrf.mxu0 }
 0x137   : > { %7006 = vst [vmem:[#allocation2 + $0x3c] sm:$0x1] %v7005_v47  ;;  %v4317_v53 = vcombine.high %v4307_v39, %v4307_v39  ;;  %v4318_v48 = vcombine.high %v4314_v40, %v4314_v40  ;;  %v5110_v58 = vunpack.i.h.s16 %v4307_v39  ;;  %v5112_v59 = vunpack.i.h.s16 %v4315_v41 }
 0x138   : > { %v5820_v16 = vrot.slane %v5813_v45, %v10570_v62  ;;  %7007 = vst.msk [vmem:[#allocation2 + $0x40] sm:$0xf] %vm6971_vm4, %v5858_v46  ;;  %v5116_v50 = vunpack.i.h.s16 %v10719_v33  ;;  %v9220_v61 = vpack.i.b16 %v4307_v39, %v5108_v51  ;;  %v5865_v44 = vrot.slane %v5107_v49, %v10570_v62  ;;  %v9540_v55 = vpop.f32.mrf.mxu0 }
 0x139   : > { %v5114_v0 = vunpack.i.h.s16 %v4317_v53  ;;  %v9221_v3 = vpack.i.b16 %v4315_v41, %v5110_v58  ;;  %v9222_v4 = vpack.i.b16 %v4317_v53, %v5112_v59  ;;  %v10733_v6 = vcombine.low %v4314_v40, %v4318_v48 }
 0x13a   : > { %7003 = vst.msk [vmem:[#allocation2 + $0x38] sm:$0xf] %vm6971_vm4, %v5820_v16  ;;  %v5872_v54 = vrot.slane %v5865_v44, %v10570_v62  ;;  %v5903_v14 = vrot.slane %v5116_v50, %v10570_v62  ;;  %v3954_v17 = vmul.f32 %v10534_v18, %v3667_v10  ;;  %v3541_v56 = vadd.f32 %v10557_v26, %v10666_v43  ;;  %v3564_v57 = vpop.f32.mrf.mxu0 }
 0x13b   : > { %v9223_v11 = vpack.i.b16 %v10719_v33, %v5114_v0  ;;  %v5873_v12 = vcombine.low %v9220_v61, %v9222_v4  ;;  %v5919_v7 = vrot.slane %v10733_v6, %v10570_v62  ;;  %v4316_v27 = vcombine.high %v10719_v33, %v10719_v33 }
 0x13c   : > { %v5910_v28 = vrot.slane %v5903_v14, %v10570_v62  ;;  %v7009_v30 = vsel %vm10577_vm5, %v5872_v54, %v7008_v2  ;;  %v3668_v18 = vmax.f32 %v3541_v56, 0.0  ;;  %v3546_v43 = vadd.f32 %v10557_v26, %v10678_v9  ;;  %v9541_v10 = vpop.f32.mrf.mxu0 }
 0x13d   : > { %v5874_v32 = vcombine.low %v9221_v3, %v9223_v11  ;;  %v5881_v1 = vrot.slane %v5873_v12, %v10570_v62  ;;  %7010 = vst [vmem:[#allocation2 + $0x44] sm:$0x1] %v7009_v30  ;;  %v3549_v34 = vadd.f32 %v10557_v26, %v10695_v37  ;;  %v3554_v33 = vadd.f32 %v10557_v26, %v10709_v42 }
 0x13e   : > { %v7013_v35 = vsel %vm10577_vm5, %v5910_v28, %v7012_v13  ;;  %v3955_v36 = vmul.f32 %v10538_v20, %v3668_v18  ;;  %v3669_v38 = vmax.f32 %v3546_v43, 0.0  ;;  %v3557_v39 = vadd.f32 %v10557_v26, %v3556_v5  ;;  %v10760_v9 = vpop.f32.mrf.mxu0 }
 0x13f   : > { %v5888_v40 = vrot.slane %v5874_v32, %v10570_v62  ;;  %7014 = vst [vmem:[#allocation2 + $0x4c] sm:$0x1] %v7013_v35  ;;  %v3670_v41 = vmax.f32 %v3549_v34, 0.0  ;;  %v3671_v49 = vmax.f32 %v3554_v33, 0.0  ;;  %v3562_v37 = vadd.f32 %v10557_v26, %v3561_v52 }
 0x140   : > { %v3989_v45 = vpack.c.bf16 %v3955_v36, %v3954_v17  ;;  %v9190_v46 = vpack.c.bf16 %v3955_v36, %v3955_v36  ;;  %v3956_v42 = vmul.f32 %v10536_v19, %v3669_v38  ;;  %v3672_v47 = vmax.f32 %v3557_v39, 0.0  ;;  %v9544_v51 = vpop.f32.mrf.mxu0 }
 0x141   : > { %v5889_v53 = vcombine.low %v5881_v1, %v5888_v40  ;;  %v3957_v20 = vmul.f32 %v10542_v22, %v3670_v41  ;;  %v10767_v5 = vmul.f32 %v10540_v21, %v3671_v49  ;;  %v3673_v48 = vmax.f32 %v3562_v37, 0.0  ;;  %v7016_v37 = vld [vmem:[#allocation2 + $0x54] sm:$0x1] }
 0x142   : > { %v4326_v58 = vrot.slane %v3989_v45, %v10039_v15  ;;  %v4333_v59 = vrot.slane %v9190_v46, %v10039_v15  ;;  %v10772_v16 = vmul.f32 %v10552_v25, %v3672_v47  ;;  %v10775_v52 = vadd.f32 %v10557_v26, %v3564_v57  ;;  %v10777_v19 = vpop.f32.mrf.mxu0 }
 0x143   : > { %v5896_v50 = vrot.slane %v5889_v53, %v10570_v62  ;;  %v3990_v61 = vpack.c.bf16 %v3957_v20, %v3956_v42  ;;  %v9191_v22 = vpack.c.bf16 %v3957_v20, %v3957_v20  ;;  %v10781_v21 = vmul.f32 %v10547_v23, %v3673_v48  ;;  %v7020_v53 = vld [vmem:[#allocation2 + $0x5c] sm:$0x1] }
 0x144   : > { %v4334_v44 = vcombine.high %v4326_v58, %v4326_v58  ;;  %v4335_v55 = vcombine.high %v4333_v59, %v4333_v59  ;;  %v4342_v0 = vrot.slane %v4326_v58, %v10039_v15  ;;  %v10785_v3 = vrot.slane %v4333_v59, %v10039_v15  ;;  %v9545_v25 = vpop.f32.mrf.mxu0 }
 0x145   : > { %7011 = vst.msk [vmem:[#allocation2 + $0x48] sm:$0xf] %vm6971_vm4, %v5896_v50  ;;  %v4375_v26 = vrot.slane %v3990_v61, %v10039_v15  ;;  %v4382_v4 = vrot.slane %v9191_v22, %v10039_v15  ;;  %v3991_v2 = vpack.c.bf16 %v10772_v16, %v10767_v5  ;;  %v9192_v23 = vpack.c.bf16 %v10772_v16, %v10772_v16 }
 0x146   : > { %v4356_v54 = vrot.slane %v4334_v44, %v10039_v15  ;;  %v4363_v14 = vrot.slane %v4335_v55, %v10039_v15  ;;  %v4364_v17 = vcombine.high %v4342_v0, %v4342_v0  ;;  %v5132_v56 = vunpack.i.h.s16 %v10785_v3  ;;  %v10797_v57 = vpop.f32.mrf.mxu0 }
 0x147   : > { %v5912_v11 = vcombine.low %v4316_v27, %v4342_v0  ;;  %v4365_v12 = vcombine.high %v10785_v3, %v10785_v3  ;;  %v4383_v13 = vcombine.high %v4375_v26, %v4375_v26  ;;  %v4384_v28 = vcombine.high %v4382_v4, %v4382_v4 }
 0x148   : > { %v4366_v30 = vcombine.high %v4356_v54, %v4356_v54  ;;  %v5125_v18 = vunpack.i.l.s16 %v4356_v54  ;;  %v5126_v43 = vunpack.i.h.s16 %v4356_v54  ;;  %v5128_v10 = vunpack.i.h.s16 %v4364_v17  ;;  %v9548_v32 = vpop.f32.mrf.mxu0 }
 0x149   : > { %v5134_v1 = vunpack.i.h.s16 %v4363_v14  ;;  %v9227_v34 = vpack.i.b16 %v4363_v14, %v5132_v56  ;;  %v5926_v33 = vrot.slane %v5912_v11, %v10570_v62  ;;  %v4367_v35 = vcombine.high %v4363_v14, %v4363_v14 }
 0x14a   : > { %v5130_v36 = vunpack.i.h.s16 %v4366_v30  ;;  %v9224_v38 = vpack.i.b16 %v4364_v17, %v5126_v43  ;;  %v9225_v39 = vpack.i.b16 %v4366_v30, %v5128_v10  ;;  %v5941_v27 = vrot.slane %v5125_v18, %v10570_v62  ;;  %v10803_v40 = vpop.f32.mrf.mxu0 }
 0x14b   : > { %v5927_v41 = vcombine.low %v5919_v7, %v5926_v33  ;;  %v5979_v49 = vrot.slane %v5134_v1, %v10570_v62  ;;  %v4391_v45 = vrot.slane %v4375_v26, %v10039_v15  ;;  %v4398_v46 = vrot.slane %v4382_v4, %v10039_v15 }
 0x14c   : > { %v9226_v42 = vpack.i.b16 %v10785_v3, %v5130_v36  ;;  %v5948_v47 = vrot.slane %v5941_v27, %v10570_v62  ;;  %v5950_v51 = vcombine.low %v9225_v39, %v9227_v34  ;;  %v4405_v20 = vrot.slane %v4383_v13, %v10039_v15  ;;  %v9549_v48 = vpop.f32.mrf.mxu0  ;;  %v7024_v39 = vld [vmem:[#allocation2 + $0x64] sm:$0x1] }
 0x14d   : > { %v5934_v58 = vrot.slane %v5927_v41, %v10570_v62  ;;  %v5986_v6 = vrot.slane %v5979_v49, %v10570_v62  ;;  %v10817_v7 = vrot.slane %v4384_v28, %v10039_v15  ;;  %v4413_v59 = vcombine.high %v4391_v45, %v4391_v45  ;;  %v7028_v41 = vld [vmem:[#allocation2 + $0x6c] sm:$0x1] }
 0x14e   : > { %v5949_v50 = vcombine.low %v9224_v38, %v9226_v42  ;;  %v5964_v61 = vrot.slane %v5950_v51, %v10570_v62  ;;  %v7017_v22 = vsel %vm10577_vm5, %v5948_v47, %v7016_v37  ;;  %v4414_v44 = vcombine.high %v4398_v46, %v4398_v46  ;;  %v10822_v55 = vpop.f32.mrf.mxu0 }
 0x14f   : > { %7015 = vst.msk [vmem:[#allocation2 + $0x50] sm:$0xf] %vm6971_vm4, %v5934_v58  ;;  %7018 = vst [vmem:[#allocation2 + $0x54] sm:$0x1] %v7017_v22  ;;  %v7021_v0 = vsel %vm10577_vm5, %v5986_v6, %v7020_v53  ;;  %v4415_v3 = vcombine.high %v4405_v20, %v4405_v20  ;;  %v5143_v25 = vunpack.i.l.s16 %v4413_v59  ;;  %v5144_v26 = vunpack.i.h.s16 %v4413_v59 }
 0x150   : > { %v5957_v4 = vrot.slane %v5949_v50, %v10570_v62  ;;  %7022 = vst [vmem:[#allocation2 + $0x5c] sm:$0x1] %v7021_v0  ;;  %v5148_v54 = vunpack.i.h.s16 %v4398_v46  ;;  %v5150_v14 = vunpack.i.h.s16 %v10817_v7  ;;  %v5152_v17 = vunpack.i.h.s16 %v4414_v44  ;;  %v9552_v56 = vpop.f32.mrf.mxu0  ;;  %v10869_v0 = vld [vmem:[%s11577_s3] ss:$0 sm:$0xff] }
 0x151   : > { %v5146_v11 = vunpack.i.h.s16 %v4415_v3  ;;  %v9228_v13 = vpack.i.b16 %v4415_v3, %v5144_v26  ;;  %v5987_v28 = vcombine.low %v4365_v12, %v4391_v45  ;;  %v5988_v30 = vcombine.low %v4367_v35, %v4405_v20 }
 0x152   : > { %v5965_v18 = vcombine.low %v5957_v4, %v5964_v61  ;;  %v9230_v43 = vpack.i.b16 %v10817_v7, %v5148_v54  ;;  %v9231_v10 = vpack.i.b16 %v4414_v44, %v5150_v14  ;;  %v6017_v32 = vrot.slane %v5143_v25, %v10570_v62  ;;  %v10831_v1 = vpop.f32.mrf.mxu0 }
 0x153   : > { %v9229_v34 = vpack.i.b16 %v4398_v46, %v5146_v11  ;;  %v5995_v33 = vrot.slane %v5987_v28, %v10570_v62  ;;  %v6002_v36 = vrot.slane %v5988_v30, %v10570_v62  ;;  %v6055_v38 = vrot.slane %v5152_v17, %v10570_v62  ;;  %v10882_v17 = vpop.permute.xlu0 %3844 }
 0x154   : > { %v5972_v27 = vrot.slane %v5965_v18, %v10570_v62  ;;  %v6024_v12 = vrot.slane %v6017_v32, %v10570_v62  ;;  %v6025_v35 = vcombine.low %v9228_v13, %v9230_v43  ;;  %v4416_v49 = vcombine.high %v10817_v7, %v10817_v7  ;;  %v9553_v37 = vpop.f32.mrf.mxu0 }
 0x155   : > { %v6003_v45 = vcombine.low %v5995_v33, %v6002_v36  ;;  %v6026_v42 = vcombine.low %v9229_v34, %v9231_v10  ;;  %v6062_v46 = vrot.slane %v6055_v38, %v10570_v62  ;;  %v4424_v47 = vrot.slane %v3991_v2, %v10039_v15 }
 0x156   : > { %7019 = vst.msk [vmem:[#allocation2 + $0x58] sm:$0xf] %vm6971_vm4, %v5972_v27  ;;  %v6033_v51 = vrot.slane %v6025_v35, %v10570_v62  ;;  %v7025_v53 = vsel %vm10577_vm5, %v6024_v12, %v7024_v39  ;;  %v4431_v20 = vrot.slane %v9192_v23, %v10039_v15  ;;  %v3674_v48 = vmax.f32 %v10775_v52, 0.0  ;;  %v9775_v58 = vld [vmem:[#allocation2 + $0x48] ss:$8 sps:$4 sm:$0xff]   ;;  %v10854_v6 = vpop.f32.mrf.mxu0 }
 0x157   : > { %v6010_v5 = vrot.slane %v6003_v45, %v10570_v62  ;;  %v6040_v2 = vrot.slane %v6026_v42, %v10570_v62  ;;  %7026 = vst [vmem:[#allocation2 + $0x64] sm:$0x1] %v7025_v53  ;;  %v7029_v7 = vsel %vm10577_vm5, %v6062_v46, %v7028_v41  ;;  %v4432_v59 = vcombine.high %v4424_v47, %v4424_v47 }
 0x158   : > { %7030 = vst [vmem:[#allocation2 + $0x6c] sm:$0x1] %v7029_v7  ;;  %v4433_v50 = vcombine.high %v4431_v20, %v4431_v20  ;;  %v4440_v61 = vrot.slane %v4424_v47, %v10039_v15  ;;  %v4447_v16 = vrot.slane %v4431_v20, %v10039_v15  ;;  %v3961_v52 = vmul.f32 %v10560_v31, %v3674_v48  ;;  %v9556_v23 = vpop.f32.mrf.mxu0  ;;  %v9783_v20 = vld [vmem:[%s11578_s4] sm:$0xff]   ;;  %v10899_v48 = vpop.permute.xlu1 %3854 }
 0x159   : > { %9590 = vmatprep.mubr.msk.bf16.mxu1 %vm7176_vm6, %v9775_v58  ;;  %v6041_v22 = vcombine.low %v6033_v51, %v6040_v2  ;;  %7023 = vst.msk [vmem:[#allocation2 + $0x60] sm:$0xf] %vm6971_vm4, %v6010_v5  ;;  %v4454_v44 = vrot.slane %v4432_v59, %v10039_v15  ;;  %v10873_v3 = vadd.f32 %v10869_v0, %v10760_v9  ;;  %v10901_v58 = vpop.permute.xlu0 %3859  ;;  %v7036_v59 = vld [vmem:[#allocation2 + $0x7c] sm:$0x1] }
 0x15a   : > { %v10877_v31 = vadd.f32 %v10869_v0, %v10777_v19  ;;  %v4461_v25 = vrot.slane %v4433_v50, %v10039_v15  ;;  %v4462_v26 = vcombine.high %v4440_v61, %v4440_v61  ;;  %v4463_v4 = vcombine.high %v4447_v16, %v4447_v16  ;;  %v10880_v14 = vpop.f32.mrf.mxu0 }
 0x15b   : > { %v5164_v54 = vunpack.i.h.s16 %v4447_v16  ;;  %v6048_v56 = vrot.slane %v6041_v22, %v10570_v62  ;;  %v4464_v11 = vcombine.high %v4454_v44, %v4454_v44  ;;  %v6063_v13 = vcombine.low %v4416_v49, %v4454_v44  ;;  %v7032_v49 = vld [vmem:[#allocation2 + $0x74] sm:$0x1] }
 0x15c   : > { %v3992_v9 = vpack.c.bf16 %v3961_v52, %v10781_v21  ;;  %v4465_v28 = vcombine.high %v4461_v25, %v4461_v25  ;;  %v5166_v30 = vunpack.i.h.s16 %v4461_v25  ;;  %v5168_v18 = vunpack.i.h.s16 %v4463_v4  ;;  %v9557_v43 = vpop.f32.mrf.mxu0 }
 0x15d   : > { %v9233_v19 = vpack.i.b16 %v4461_v25, %v5164_v54  ;;  %7027 = vst.msk [vmem:[#allocation2 + $0x68] sm:$0xf] %vm6971_vm4, %v6048_v56  ;;  %v5161_v10 = vunpack.i.l.s16 %v4464_v11  ;;  %v5162_v32 = vunpack.i.h.s16 %v4464_v11  ;;  %v6064_v34 = vcombine.low %v4440_v61, %v4462_v26 }
 0x15e   : > { %v6071_v33 = vrot.slane %v6063_v13, %v10570_v62  ;;  %v5170_v36 = vunpack.i.h.s16 %v4465_v28  ;;  %v9234_v38 = vpack.i.b16 %v4463_v4, %v5166_v30  ;;  %v9235_v39 = vpack.i.b16 %v4465_v28, %v5168_v18  ;;  %v10888_v12 = vpop.f32.mrf.mxu0 }
 0x15f   : > { %v9193_v27 = vpack.c.bf16 %v3961_v52, %v3961_v52  ;;  %v9232_v35 = vpack.i.b16 %v4447_v16, %v5162_v32  ;;  %v6078_v21 = vrot.slane %v6064_v34, %v10570_v62  ;;  %v6093_v41 = vrot.slane %v5161_v10, %v10570_v62 }
 0x160   : > { %v4473_v37 = vrot.slane %v3992_v9, %v10039_v15  ;;  %v6102_v45 = vcombine.low %v9233_v19, %v9235_v39  ;;  %v6131_v42 = vrot.slane %v5170_v36, %v10570_v62  ;;  %v3675_v47 = vmax.f32 %v10873_v3, 0.0  ;;  %v9778_v51 = vld [vmem:[#allocation2 + $0x58] ss:$8 sps:$4 sm:$0xff]   ;;  %v9560_v53 = vpop.f32.mrf.mxu0  ;;  %v10923_v9 = vld [vmem:[%s11578_s4 + $0x28] sm:$0xff]   ;;  %v3840_v36 = vpop.permute.xlu0 %3839 }
 0x161   : > { %v4480_v46 = vrot.slane %v9193_v27, %v10039_v15  ;;  %v6079_v5 = vcombine.low %v6071_v33, %v6078_v21  ;;  %v6100_v2 = vrot.slane %v6093_v41, %v10570_v62  ;;  %v6101_v7 = vcombine.low %v9232_v35, %v9234_v38  ;;  %9591 = vmatmul.mubr.msk.bf16.vlgmr.msra.gmra.mxu1 %vm7176_vm6, %v9778_v51  ;;  %v3865_v33 = vpop.permute.xlu1 %3864 }
 0x162   : > { %v4481_v50 = vcombine.high %v4473_v37, %v4473_v37  ;;  %v6116_v61 = vrot.slane %v6102_v45, %v10570_v62  ;;  %v6138_v16 = vrot.slane %v6131_v42, %v10570_v62  ;;  %v4489_v23 = vrot.slane %v4473_v37, %v10039_v15  ;;  %v10908_v22 = vpop.f32.mrf.mxu0  ;;  %9599 = vmatpush3.bf16.msra.mxu1 %v10598_v63  ;;  %v7040_v37 = vld [vmem:[#allocation2 + $0x84] sm:$0x1] }
 0x163   : > { %v4482_v52 = vcombine.high %v4480_v46, %v4480_v46  ;;  %v6086_v44 = vrot.slane %v6079_v5, %v10570_v62  ;;  %v6109_v3 = vrot.slane %v6101_v7, %v10570_v62  ;;  %v7033_v25 = vsel %vm10577_vm5, %v6100_v2, %v7032_v49  ;;  %9600 = vmatprep.subr.bf16.mxu1 %v9783_v20 }
 0x164   : > { %v4496_v26 = vrot.slane %v4480_v46, %v10039_v15  ;;  %7034 = vst [vmem:[#allocation2 + $0x74] sm:$0x1] %v7033_v25  ;;  %v7037_v4 = vsel %vm10577_vm5, %v6138_v16, %v7036_v59  ;;  %v4503_v54 = vrot.slane %v4481_v50, %v10039_v15  ;;  %v4511_v11 = vcombine.high %v4489_v23, %v4489_v23  ;;  %v9561_v13 = vpop.f32.mrf.mxu0 }
 0x165   : > { %v4510_v56 = vrot.slane %v4482_v52, %v10039_v15  ;;  %v6117_v28 = vcombine.low %v6109_v3, %v6116_v61  ;;  %7031 = vst.msk [vmem:[#allocation2 + $0x70] sm:$0xf] %vm6971_vm4, %v6086_v44  ;;  %7038 = vst [vmem:[#allocation2 + $0x7c] sm:$0x1] %v7037_v4  ;;  %v3962_v45 = vmul.f32 %v3840_v36, %v3675_v47  ;;  %v3676_v53 = vmax.f32 %v10877_v31, 0.0  ;;  %v3850_v3 = vpop.permute.xlu1 %3849 }
 0x166   : > { %v4512_v63 = vcombine.high %v4496_v26, %v4496_v26  ;;  %v5179_v30 = vunpack.i.l.s16 %v4496_v26  ;;  %v5180_v18 = vunpack.i.h.s16 %v4496_v26  ;;  %v4513_v19 = vcombine.high %v4503_v54, %v4503_v54  ;;  %v10928_v34 = vpop.f32.mrf.mxu0  ;;  %9601 = vmatpush3.bf16.msra.mxu1 %v9783_v20 }
 0x167   : > { %v10926_v43 = vcombine.high %v4510_v56, %v4510_v56  ;;  %v5182_v10 = vunpack.i.h.s16 %v4510_v56  ;;  %v6139_v32 = vcombine.low %v4489_v23, %v4511_v11  ;;  %v6124_v38 = vrot.slane %v6117_v28, %v10570_v62  ;;  %9610 = vmatprep.subr.bf16.mxu1 %v10923_v9 }
 0x168   : > { %v5184_v39 = vunpack.i.h.s16 %v4512_v63  ;;  %v9236_v27 = vpack.i.b16 %v4510_v56, %v5180_v18  ;;  %v6169_v35 = vrot.slane %v5179_v30, %v10570_v62  ;;  %v6140_v41 = vcombine.low %v4503_v54, %v4513_v19  ;;  %v9564_v42 = vpop.f32.mrf.mxu0 }
 0x169   : > { %v10932_v21 = vpack.i.b16 %v4512_v63, %v5182_v10  ;;  %v6147_v49 = vrot.slane %v6139_v32, %v10570_v62  ;;  %7035 = vst.msk [vmem:[#allocation2 + $0x78] sm:$0xf] %vm6971_vm4, %v6124_v38  ;;  %v5186_v20 = vunpack.i.h.s16 %v10926_v43  ;;  %v3578_v2 = vadd.f32 %v10869_v0, %v10797_v57 }
 0x16a   : > { %v9238_v46 = vpack.i.b16 %v10926_v43, %v5184_v39  ;;  %v6176_v51 = vrot.slane %v6169_v35, %v10570_v62  ;;  %v6154_v5 = vrot.slane %v6140_v41, %v10570_v62  ;;  %v3581_v47 = vadd.f32 %v10869_v0, %v10803_v40  ;;  %v10948_v59 = vpop.f32.mrf.mxu0 }
 0x16b   : > { %v3586_v7 = vadd.f32 %v10869_v0, %v10822_v55  ;;  %v3963_v31 = vmul.f32 %v10882_v17, %v3676_v53  ;;  %v3589_v16 = vadd.f32 %v10869_v0, %v10831_v1  ;;  %v3677_v57 = vmax.f32 %v3578_v2, 0.0 }
 0x16c   : > { %v6177_v50 = vcombine.low %v9236_v27, %v9238_v46  ;;  %v7041_v61 = vsel %vm10577_vm5, %v6176_v51, %v7040_v37  ;;  %v6155_v52 = vcombine.low %v6147_v49, %v6154_v5  ;;  %v3678_v23 = vmax.f32 %v3581_v47, 0.0  ;;  %v9565_v40 = vpop.f32.mrf.mxu0  ;;  %v9779_v54 = vld [vmem:[#allocation2 + $0x68] ss:$8 sps:$4 sm:$0xff]  }
 0x16d   : > { %7042 = vst [vmem:[#allocation2 + $0x84] sm:$0x1] %v7041_v61  ;;  %v3679_v44 = vmax.f32 %v3586_v7, 0.0  ;;  %v3993_v25 = vpack.c.bf16 %v3963_v31, %v3962_v45  ;;  %v9194_v26 = vpack.c.bf16 %v3963_v31, %v3963_v31  ;;  %v3680_v4 = vmax.f32 %v3589_v16, 0.0  ;;  %9594 = vmatprep.mubr.msk.bf16.mxu1 %vm7176_vm6, %v9779_v54  ;;  %v7048_v54 = vld [vmem:[#allocation2 + $0x94] sm:$0x1] }
 0x16e   : > { %v10956_v55 = vrot.slane %v6177_v50, %v10570_v62  ;;  %v6162_v56 = vrot.slane %v6155_v52, %v10570_v62  ;;  %v3964_v17 = vmul.f32 %v3850_v3, %v3677_v57  ;;  %v3965_v11 = vmul.f32 %v10899_v48, %v3678_v23  ;;  %v10963_v13 = vpop.f32.mrf.mxu0 }
 0x16f   : > { %v10961_v1 = vmul.f32 %v10901_v58, %v3679_v44  ;;  %v4522_v28 = vrot.slane %v3993_v25, %v10039_v15  ;;  %v4529_v63 = vrot.slane %v9194_v26, %v10039_v15  ;;  %v10967_v30 = vmul.f32 %v3865_v33, %v3680_v4  ;;  %v7044_v44 = vld [vmem:[#allocation2 + $0x8c] sm:$0x1] }
 0x170   : > { %v10972_v18 = vadd.f32 %v10869_v0, %v10854_v6  ;;  %7039 = vst.msk [vmem:[#allocation2 + $0x80] sm:$0xf] %vm6971_vm4, %v6162_v56  ;;  %v3994_v48 = vpack.c.bf16 %v3965_v11, %v3964_v17  ;;  %v9195_v19 = vpack.c.bf16 %v3965_v11, %v3965_v11  ;;  %v10977_v58 = vadd.f32 %v10869_v0, %v10880_v14  ;;  %v9568_v10 = vpop.f32.mrf.mxu0  ;;  %v9782_v56 = vld [vmem:[#allocation2] ss:$8 sps:$4 sm:$0xff]  }
 0x171   : > { %v10981_v43 = vadd.f32 %v10869_v0, %v10888_v12  ;;  %v4530_v32 = vcombine.high %v4522_v28, %v4522_v28  ;;  %v4531_v33 = vcombine.high %v4529_v63, %v4529_v63  ;;  %v4538_v36 = vrot.slane %v4522_v28, %v10039_v15 }
 0x172   : > { %v4545_v6 = vrot.slane %v4529_v63, %v10039_v15  ;;  %v4571_v38 = vrot.slane %v3994_v48, %v10039_v15  ;;  %v4578_v39 = vrot.slane %v9195_v19, %v10039_v15  ;;  %v3995_v27 = vpack.c.bf16 %v10967_v30, %v10961_v1  ;;  %v10991_v35 = vpop.f32.mrf.mxu0 }
 0x173   : > { %v9196_v14 = vpack.c.bf16 %v10967_v30, %v10967_v30  ;;  %v4552_v12 = vrot.slane %v4530_v32, %v10039_v15  ;;  %v4559_v41 = vrot.slane %v4531_v33, %v10039_v15  ;;  %v4560_v49 = vcombine.high %v4538_v36, %v4538_v36 }
 0x174   : > { %v4561_v37 = vcombine.high %v4545_v6, %v4545_v6  ;;  %v5188_v45 = vunpack.i.h.s16 %v4538_v36  ;;  %v9239_v42 = vpack.i.b16 %v4538_v36, %v5186_v20  ;;  %v4579_v46 = vcombine.high %v4571_v38, %v4571_v38  ;;  %v9569_v53 = vpop.f32.mrf.mxu0 }
 0x175   : > { %v4580_v51 = vcombine.high %v4578_v39, %v4578_v39  ;;  %v4562_v5 = vcombine.high %v4552_v12, %v4552_v12  ;;  %v4563_v2 = vcombine.high %v4559_v41, %v4559_v41  ;;  %v5197_v47 = vunpack.i.l.s16 %v4559_v41 }
 0x176   : > { %v5198_v7 = vunpack.i.h.s16 %v4559_v41  ;;  %v5200_v50 = vunpack.i.h.s16 %v4561_v37  ;;  %v6178_v61 = vcombine.low %v10932_v21, %v9239_v42  ;;  %v6207_v31 = vrot.slane %v5188_v45, %v10570_v62  ;;  %v10997_v52 = vpop.f32.mrf.mxu0 }
 0x177   : > { %v6216_v16 = vcombine.low %v4560_v49, %v4545_v6  ;;  %v6215_v23 = vcombine.low %v4552_v12, %v4562_v5  ;;  %v6245_v20 = vrot.slane %v5197_v47, %v10570_v62  ;;  %v4587_v40 = vrot.slane %v4571_v38, %v10039_v15  ;;  %v9780_v3 = vld [vmem:[#allocation2 + $0x78] ss:$8 sps:$4 sm:$0xff]  }
 0x178   : > { %v10999_v57 = vpack.i.b16 %v4561_v37, %v5198_v7  ;;  %v9241_v25 = vpack.i.b16 %v4563_v2, %v5200_v50  ;;  %v6192_v26 = vrot.slane %v6178_v61, %v10570_v62  ;;  %v6214_v4 = vrot.slane %v6207_v31, %v10570_v62  ;;  %v9572_v17 = vpop.f32.mrf.mxu0  ;;  %9595 = vmatmul.mubr.msk.bf16.gmra.mxu1 %vm7176_vm6, %v9780_v3 }
 0x179   : > { %v6230_v21 = vrot.slane %v6216_v16, %v10570_v62  ;;  %v6223_v11 = vrot.slane %v6215_v23, %v10570_v62  ;;  %v6252_v28 = vrot.slane %v6245_v20, %v10570_v62  ;;  %v4594_v63 = vrot.slane %v4578_v39, %v10039_v15  ;;  %9602 = vmatprep.mubr.msk.bf16.mxu1 %vm7176_vm6, %v9782_v56  ;;  %v7052_v20 = vld [vmem:[#allocation2 + $0x9c] sm:$0x1]  ;;  %v9788_v56 = vld [vmem:[%s11578_s4 + $0x20] sm:$0xff]  }
 0x17a   : > { %v4601_v48 = vrot.slane %v4579_v46, %v10039_v15  ;;  %v6193_v19 = vcombine.low %v10956_v55, %v6192_v26  ;;  %v7045_v10 = vsel %vm10577_vm5, %v6214_v4, %v7044_v44  ;;  %v4608_v32 = vrot.slane %v4580_v51, %v10039_v15  ;;  %v11016_v36 = vpop.f32.mrf.mxu0  ;;  %v9784_v44 = vld [vmem:[#allocation2 + $0x10] ss:$8 sps:$4 sm:$0xff]   ;;  %v7056_v4 = vld [vmem:[#allocation2 + $0xa4] sm:$0x1] }
 0x17b   : > { %v4609_v33 = vcombine.high %v4587_v40, %v4587_v40  ;;  %v6231_v6 = vcombine.low %v6223_v11, %v6230_v21  ;;  %7046 = vst [vmem:[#allocation2 + $0x8c] sm:$0x1] %v7045_v10  ;;  %v7049_v38 = vsel %vm10577_vm5, %v6252_v28, %v7048_v54  ;;  %v4610_v39 = vcombine.high %v4594_v63, %v4594_v63  ;;  %v9785_v54 = vld [vmem:[#allocation2 + $0x20] ss:$8 sps:$4 sm:$0xff]   ;;  %v11053_v10 = vpop.permute.xlu0 %3879 }
 0x17c   : > { %v4611_v12 = vcombine.high %v4601_v48, %v4601_v48  ;;  %v6200_v41 = vrot.slane %v6193_v19, %v10570_v62  ;;  %7050 = vst [vmem:[#allocation2 + $0x94] sm:$0x1] %v7049_v38  ;;  %v4612_v55 = vcombine.high %v4608_v32, %v4608_v32  ;;  %v5202_v49 = vunpack.i.h.s16 %v4563_v2  ;;  %v9573_v45 = vpop.f32.mrf.mxu0 }
 0x17d   : > { %v5204_v37 = vunpack.i.h.s16 %v4587_v40  ;;  %v6238_v42 = vrot.slane %v6231_v6, %v10570_v62  ;;  %v5206_v46 = vunpack.i.h.s16 %v4601_v48  ;;  %v5215_v51 = vunpack.i.l.s16 %v4610_v39  ;;  %v11060_v6 = vpop.permute.xlu1 %3884 }
 0x17e   : > { %v5216_v53 = vunpack.i.h.s16 %v4610_v39  ;;  %7043 = vst.msk [vmem:[#allocation2 + $0x88] sm:$0xf] %vm6971_vm4, %v6200_v41  ;;  %v5218_v5 = vunpack.i.h.s16 %v4612_v55  ;;  %v9242_v47 = vpack.i.b16 %v4587_v40, %v5202_v49  ;;  %v6291_v50 = vcombine.low %v4609_v33, %v4594_v63  ;;  %v11023_v61 = vpop.f32.mrf.mxu0 }
 0x17f   : > { %v9243_v7 = vpack.i.b16 %v4601_v48, %v5204_v37  ;;  %7047 = vst.msk [vmem:[#allocation2 + $0x90] sm:$0xf] %vm6971_vm4, %v6238_v42  ;;  %v6283_v2 = vrot.slane %v5206_v46, %v10570_v62  ;;  %v6292_v16 = vcombine.low %v4611_v12, %v4608_v32  ;;  %v6321_v23 = vrot.slane %v5215_v51, %v10570_v62 }
 0x180   : > { %v11026_v31 = vpack.i.b16 %v4612_v55, %v5216_v53  ;;  %v6253_v3 = vcombine.low %v10999_v57, %v9242_v47  ;;  %v6299_v40 = vrot.slane %v6291_v50, %v10570_v62  ;;  %v4620_v21 = vrot.slane %v3995_v27, %v10039_v15  ;;  %v9576_v17 = vpop.f32.mrf.mxu0  ;;  %9603 = vmatmul.mubr.msk.bf16.vlgmr.msra.gmra.mxu1 %vm7176_vm6, %v9784_v44  ;;  %v11067_v55 = vld [vmem:[%s11578_s4 + $0x38] sm:$0xff]  }
 0x181   : > { %v6254_v26 = vcombine.low %v9241_v25, %v9243_v7  ;;  %v6290_v11 = vrot.slane %v6283_v2, %v10570_v62  ;;  %v6306_v28 = vrot.slane %v6292_v16, %v10570_v62  ;;  %v6328_v57 = vrot.slane %v6321_v23, %v10570_v62  ;;  %9606 = vmatprep.mubr.msk.bf16.mxu1 %vm7176_vm6, %v9785_v54 }
 0x182   : > { %v4627_v25 = vrot.slane %v9196_v14, %v10039_v15  ;;  %v6261_v1 = vrot.slane %v6253_v3, %v10570_v62  ;;  %v4628_v63 = vcombine.high %v4620_v21, %v4620_v21  ;;  %v4636_v48 = vrot.slane %v4620_v21, %v10039_v15  ;;  %v11051_v19 = vpop.f32.mrf.mxu0  ;;  %9611 = vmatpush3.bf16.msra.mxu1 %v10923_v9 }
 0x183   : > { %v6268_v27 = vrot.slane %v6254_v26, %v10570_v62  ;;  %v6307_v32 = vcombine.low %v6299_v40, %v6306_v28  ;;  %v7053_v30 = vsel %vm10577_vm5, %v6290_v11, %v7052_v20  ;;  %v7057_v14 = vsel %vm10577_vm5, %v6328_v57, %v7056_v4  ;;  %9612 = vmatprep.subr.bf16.mxu1 %v9788_v56  ;;  %v9786_v20 = vld [vmem:[#allocation2 + $0x30] ss:$8 sps:$4 sm:$0xff]   ;;  %v3870_v4 = vpop.permute.xlu0 %3869  ;;  %v7060_v57 = vld [vmem:[#allocation2 + $0xac] sm:$0x1] }
 0x184   : > { %v4629_v33 = vcombine.high %v4627_v25, %v4627_v25  ;;  %7054 = vst [vmem:[#allocation2 + $0x9c] sm:$0x1] %v7053_v30  ;;  %7058 = vst [vmem:[#allocation2 + $0xa4] sm:$0x1] %v7057_v14  ;;  %v4643_v39 = vrot.slane %v4627_v25, %v10039_v15  ;;  %v4650_v12 = vrot.slane %v4628_v63, %v10039_v15  ;;  %v9577_v49 = vpop.f32.mrf.mxu0  ;;  %v5220_v45 = vunpack.i.h.s16 %v4636_v48  ;;  %v7064_v14 = vld [vmem:[#allocation2 + $0xb4] sm:$0x1] }
 0x185   : > { %v6269_v38 = vcombine.low %v6261_v1, %v6268_v27  ;;  %v4658_v41 = vcombine.high %v4636_v48, %v4636_v48  ;;  %v6314_v37 = vrot.slane %v6307_v32, %v10570_v62  ;;  %v9245_v42 = vpack.i.b16 %v4636_v48, %v5218_v5 }
 0x186   : > { %v4657_v9 = vrot.slane %v4629_v33, %v10039_v15  ;;  %v4659_v51 = vcombine.high %v4643_v39, %v4643_v39  ;;  %v4660_v53 = vcombine.high %v4650_v12, %v4650_v12  ;;  %v5222_v47 = vunpack.i.h.s16 %v4650_v12  ;;  %v11072_v7 = vpop.f32.mrf.mxu0  ;;  %9613 = vmatpush3.bf16.msra.mxu1 %v9788_v56  ;;  %v3875_v56 = vpop.permute.xlu1 %3874 }
 0x187   : > { %v6276_v46 = vrot.slane %v6269_v38, %v10570_v62  ;;  %7055 = vst.msk [vmem:[#allocation2 + $0xa0] sm:$0xf] %vm6971_vm4, %v6314_v37  ;;  %v5224_v2 = vunpack.i.h.s16 %v4658_v41  ;;  %v9246_v16 = vpack.i.b16 %v4650_v12, %v5220_v45  ;;  %v3681_v23 = vmax.f32 %v10972_v18, 0.0  ;;  %9622 = vmatprep.subr.bf16.mxu1 %v11067_v55 }
 0x188   : > { %v11075_v50 = vcombine.high %v4657_v9, %v4657_v9  ;;  %v9247_v5 = vpack.i.b16 %v4658_v41, %v5222_v47  ;;  %v6367_v44 = vcombine.low %v4660_v53, %v4657_v9  ;;  %v6368_v3 = vcombine.low %v4643_v39, %v4659_v51  ;;  %v9580_v40 = vpop.f32.mrf.mxu0  ;;  %9607 = vmatmul.mubr.msk.bf16.gmra.mxu1 %vm7176_vm6, %v9786_v20 }
 0x189   : > { %7051 = vst.msk [vmem:[#allocation2 + $0x98] sm:$0xf] %vm6971_vm4, %v6276_v46  ;;  %v3682_v26 = vmax.f32 %v10977_v58, 0.0  ;;  %v6329_v17 = vcombine.low %v11026_v31, %v9246_v16  ;;  %v6359_v18 = vrot.slane %v5224_v2, %v10570_v62  ;;  %v3968_v25 = vmul.f32 %v3870_v4, %v3681_v23 }
 0x18a   : > { %v5233_v21 = vunpack.i.l.s16 %v11075_v50  ;;  %v5234_v54 = vunpack.i.h.s16 %v11075_v50  ;;  %v6330_v11 = vcombine.low %v9245_v42, %v9247_v5  ;;  %v6375_v28 = vrot.slane %v6367_v44, %v10570_v62  ;;  %v11088_v1 = vpop.f32.mrf.mxu0 }
 0x18b   : > { %v6382_v58 = vrot.slane %v6368_v3, %v10570_v62  ;;  %v6337_v27 = vrot.slane %v6329_v17, %v10570_v62  ;;  %v6366_v63 = vrot.slane %v6359_v18, %v10570_v62  ;;  %v3969_v48 = vmul.f32 %v3875_v56, %v3682_v26 }
 0x18c   : > { %v6397_v31 = vrot.slane %v5233_v21, %v10570_v62  ;;  %v6344_v32 = vrot.slane %v6330_v11, %v10570_v62  ;;  %v3683_v33 = vmax.f32 %v10981_v43, 0.0  ;;  %v3605_v38 = vadd.f32 %v10869_v0, %v10908_v22  ;;  %v9581_v39 = vpop.f32.mrf.mxu0 }
 0x18d   : > { %v6383_v30 = vcombine.low %v6375_v28, %v6382_v58  ;;  %v7061_v41 = vsel %vm10577_vm5, %v6366_v63, %v7060_v57  ;;  %v3996_v49 = vpack.c.bf16 %v3969_v48, %v3968_v25  ;;  %v9197_v37 = vpack.c.bf16 %v3969_v48, %v3969_v48 }
 0x18e   : > { %v6404_v12 = vrot.slane %v6397_v31, %v10570_v62  ;;  %v6345_v9 = vcombine.low %v6337_v27, %v6344_v32  ;;  %7062 = vst [vmem:[#allocation2 + $0xac] sm:$0x1] %v7061_v41  ;;  %v3970_v42 = vmul.f32 %v11053_v10, %v3683_v33  ;;  %v3684_v46 = vmax.f32 %v3605_v38, 0.0  ;;  %v11102_v51 = vpop.f32.mrf.mxu0 }
 0x18f   : > { %v6390_v45 = vrot.slane %v6383_v30, %v10570_v62  ;;  %v4669_v43 = vrot.slane %v3996_v49, %v10039_v15  ;;  %v4676_v53 = vrot.slane %v9197_v37, %v10039_v15  ;;  %v11110_v47 = vadd.f32 %v10869_v0, %v10928_v34 }
 0x190   : > { %v7065_v22 = vsel %vm10577_vm5, %v6404_v12, %v7064_v14  ;;  %v6352_v50 = vrot.slane %v6345_v9, %v10570_v62  ;;  %v3971_v10 = vmul.f32 %v11060_v6, %v3684_v46  ;;  %v11117_v2 = vadd.f32 %v10869_v0, %v10948_v59  ;;  %v9584_v23 = vpop.f32.mrf.mxu0 }
 0x191   : > { %7063 = vst.msk [vmem:[#allocation2 + $0xb0] sm:$0xf] %vm6971_vm4, %v6390_v45  ;;  %7066 = vst [vmem:[#allocation2 + $0xb4] sm:$0x1] %v7065_v22  ;;  %v11121_v16 = vadd.f32 %v10869_v0, %v10963_v13  ;;  %v4677_v20 = vcombine.high %v4669_v43, %v4669_v43  ;;  %v4678_v5 = vcombine.high %v4676_v53, %v4676_v53  ;;  %v3685_v6 = vmax.f32 %v11110_v47, 0.0 }
 0x192   : > { %v4685_v34 = vrot.slane %v4669_v43, %v10039_v15  ;;  %v4692_v44 = vrot.slane %v4676_v53, %v10039_v15  ;;  %7059 = vst.msk [vmem:[#allocation2 + $0xa8] sm:$0xf] %vm6971_vm4, %v6352_v50  ;;  %v3997_v3 = vpack.c.bf16 %v3971_v10, %v3970_v42  ;;  %v9198_v26 = vpack.c.bf16 %v3971_v10, %v3971_v10  ;;  %v3652_v40 = vpop.f32.mrf.mxu0  ;;  %v7068_v42 = vld [vmem:[#allocation2 + $0xbc] sm:$0x1] }
 0x193   : > { %v3686_v59 = vmax.f32 %v11117_v2, 0.0  ;;  %v4699_v4 = vrot.slane %v4677_v20, %v10039_v15  ;;  %v4706_v13 = vrot.slane %v4678_v5, %v10039_v15 }
 0x194   : > { %v4707_v21 = vcombine.high %v4685_v34, %v4685_v34  ;;  %v4708_v17 = vcombine.high %v4692_v44, %v4692_v44  ;;  %v5236_v18 = vunpack.i.h.s16 %v4685_v34  ;;  %v9248_v56 = vpack.i.b16 %v4685_v34, %v5234_v54  ;;  %v9585_v58 = vpop.f32.mrf.mxu0 }
 0x195   : > { %v4718_v11 = vrot.slane %v3997_v3, %v10039_v15  ;;  %v4725_v28 = vrot.slane %v9198_v26, %v10039_v15  ;;  %v4709_v57 = vcombine.high %v4699_v4, %v4699_v4  ;;  %v4710_v25 = vcombine.high %v4706_v13, %v4706_v13 }
 0x196   : > { %v5238_v27 = vunpack.i.h.s16 %v4699_v4  ;;  %v5240_v63 = vunpack.i.h.s16 %v4707_v21  ;;  %v9249_v31 = vpack.i.b16 %v4699_v4, %v5236_v18  ;;  %v6443_v48 = vcombine.low %v4692_v44, %v4708_v17  ;;  %v3895_v17 = vpop.permute.xlu1 %3894 }
 0x197   : > { %v4726_v32 = vcombine.high %v4718_v11, %v4718_v11  ;;  %v5242_v30 = vunpack.i.h.s16 %v4709_v57  ;;  %v6444_v38 = vcombine.low %v4706_v13, %v4710_v25  ;;  %v4734_v54 = vrot.slane %v4718_v11, %v10039_v15 }
 0x198   : > { %v9250_v14 = vpack.i.b16 %v4707_v21, %v5238_v27  ;;  %v9251_v33 = vpack.i.b16 %v4709_v57, %v5240_v63  ;;  %v6451_v39 = vrot.slane %v6443_v48, %v10570_v62  ;;  %v4741_v12 = vrot.slane %v4725_v28, %v10039_v15  ;;  %v3890_v21 = vpop.permute.xlu0 %3889  ;;  %v7072_v57 = vld [vmem:[#allocation2 + $0xc4] sm:$0x1]  ;;  %v7076_v48 = vld [vmem:[#allocation2 + $0xcc] sm:$0x1] }
 0x199   : > { %v4748_v41 = vrot.slane %v4726_v32, %v10039_v15  ;;  %v6435_v9 = vrot.slane %v5242_v30, %v10570_v62  ;;  %v6458_v45 = vrot.slane %v6444_v38, %v10570_v62  ;;  %v4756_v46 = vcombine.high %v4734_v54, %v4734_v54 }
 0x19a   : > { %v6405_v49 = vcombine.low %v9248_v56, %v9250_v14  ;;  %v6406_v37 = vcombine.low %v9249_v31, %v9251_v33  ;;  %v5251_v43 = vunpack.i.l.s16 %v4734_v54  ;;  %v5252_v2 = vunpack.i.h.s16 %v4734_v54  ;;  %v7365_v54 = vld [vmem:[#allocation2 + $0x8] sm:$0xf] }
 0x19b   : > { %v4758_v22 = vcombine.high %v4748_v41, %v4748_v41  ;;  %v6442_v50 = vrot.slane %v6435_v9, %v10570_v62  ;;  %v6459_v10 = vcombine.low %v6451_v39, %v6458_v45  ;;  %v5254_v23 = vunpack.i.h.s16 %v4748_v41  ;;  %v7364_v39 = vld [vmem:[#allocation2 + $0x4] sm:$0x1] }
 0x19c   : > { %v6413_v53 = vrot.slane %v6405_v49, %v10570_v62  ;;  %v6420_v47 = vrot.slane %v6406_v37, %v10570_v62  ;;  %v5256_v20 = vunpack.i.h.s16 %v4756_v46  ;;  %v5260_v26 = vunpack.i.h.s16 %v4741_v12 }
 0x19d   : > { %v6466_v34 = vrot.slane %v6459_v10, %v10570_v62  ;;  %v7069_v44 = vsel %vm10577_vm5, %v6442_v50, %v7068_v42  ;;  %v5258_v3 = vunpack.i.h.s16 %v4758_v22  ;;  %v9252_v40 = vpack.i.b16 %v4748_v41, %v5252_v2 }
 0x19e   : > { %v6421_v5 = vcombine.low %v6413_v53, %v6420_v47  ;;  %7070 = vst [vmem:[#allocation2 + $0xbc] sm:$0x1] %v7069_v44  ;;  %v9253_v4 = vpack.i.b16 %v4756_v46, %v5254_v23  ;;  %v9254_v13 = vpack.i.b16 %v4758_v22, %v5256_v20  ;;  %v6473_v11 = vrot.slane %v5251_v43, %v10570_v62  ;;  %v3900_v22 = vpop.permute.xlu0 %3899 }
 0x19f   : > { %7071 = vst.msk [vmem:[#allocation2 + $0xc0] sm:$0xf] %vm6971_vm4, %v6466_v34  ;;  %v9255_v56 = vpack.i.b16 %v4741_v12, %v5258_v3  ;;  %v6511_v58 = vrot.slane %v5260_v26, %v10570_v62  ;;  %v3972_v25 = vmul.f32 %v3890_v21, %v3685_v6  ;;  %v3973_v27 = vmul.f32 %v3895_v17, %v3686_v59 }
 0x1a0   : > { %v6428_v18 = vrot.slane %v6421_v5, %v10570_v62  ;;  %v6481_v28 = vcombine.low %v9252_v40, %v9254_v13  ;;  %v6480_v63 = vrot.slane %v6473_v11, %v10570_v62  ;;  %v7389_v32 = vrot.slane %v7387_v8, 4  ;;  %v7366_v5 = vld [vmem:[#allocation2 + $0xc] sm:$0x1] }
 0x1a1   : > { %v6482_v31 = vcombine.low %v9253_v4, %v9255_v56  ;;  %v6518_v14 = vrot.slane %v6511_v58, %v10570_v62  ;;  %v3998_v33 = vpack.c.bf16 %v3973_v27, %v3972_v25  ;;  %v9199_v38 = vpack.c.bf16 %v3973_v27, %v3973_v27  ;;  %v7080_v27 = vld [vmem:[#allocation2 + $0xd4] sm:$0x1] }
 0x1a2   : > { %7067 = vst.msk [vmem:[#allocation2 + $0xb8] sm:$0xf] %vm6971_vm4, %v6428_v18  ;;  %v6489_v30 = vrot.slane %v6481_v28, %v10570_v62  ;;  %v7073_v59 = vsel %vm10577_vm5, %v6480_v63, %v7072_v57  ;;  %v3687_v12 = vmax.f32 %v11121_v16, 0.0  ;;  %v7392_v8 = vrot.slane %v7390_v24, 5 }
 0x1a3   : > { %v6496_v6 = vrot.slane %v6482_v31, %v10570_v62  ;;  %7074 = vst [vmem:[#allocation2 + $0xc4] sm:$0x1] %v7073_v59  ;;  %v7077_v41 = vsel %vm10577_vm5, %v6518_v14, %v7076_v48  ;;  %v4767_v49 = vrot.slane %v3998_v33, %v10039_v15  ;;  %v4774_v37 = vrot.slane %v9199_v38, %v10039_v15  ;;  %v7084_v14 = vld [vmem:[#allocation2 + $0xdc] sm:$0x1]  ;;  %v7367_v38 = vld [vmem:[#allocation2 + $0x10] sm:$0xf] }
 0x1a4   : > { %7078 = vst [vmem:[#allocation2 + $0xcc] sm:$0x1] %v7077_v41  ;;  %v7393_v45 = vor.u32 %v7392_v8, %v7389_v32  ;;  %v7396_v42 = vshll.u32 %v7364_v39, 16  ;;  %v7401_v46 = vshrl.u32 %v7365_v54, 16  ;;  %v11169_v47 = vmul.f32 %v3900_v22, %v3687_v12  ;;  %v7368_v59 = vld [vmem:[#allocation2 + $0x14] sm:$0x1] }
 0x1a5   : > { %v6497_v9 = vcombine.low %v6489_v30, %v6496_v6  ;;  %v4775_v43 = vcombine.high %v4767_v49, %v4767_v49  ;;  %v4776_v53 = vcombine.high %v4774_v37, %v4774_v37  ;;  %v4783_v16 = vrot.slane %v4767_v49, %v10039_v15 }
 0x1a6   : > { %v11166_v60 = vrot.slane %v4774_v37, %v10039_v15  ;;  %v7394_v50 = vrot.slane %v7393_v45, 4  ;;  %v7398_v34 = vrot.slane %v7396_v42, 5  ;;  %v7403_v44 = vrot.slane %v7401_v46, 4  ;;  %v7369_v37 = vld [vmem:[#allocation2 + $0x18] sm:$0xf] }
 0x1a7   : > { %v6504_v24 = vrot.slane %v6497_v9, %v10570_v62  ;;  %v4797_v10 = vrot.slane %v4775_v43, %v10039_v15  ;;  %v11173_v2 = vrot.slane %v4776_v53, %v10039_v15  ;;  %v4805_v23 = vcombine.high %v4783_v16, %v4783_v16  ;;  %v3905_v9 = vpop.permute.xlu1 %3904  ;;  %v7370_v53 = vld [vmem:[#allocation2 + $0x1c] sm:$0x1] }
 0x1a8   : > { %v5276_v20 = vunpack.i.h.s16 %v11166_v60  ;;  %v7404_v3 = vshll.u32 %v7365_v54, 16  ;;  %v7410_v18 = vshll.u32 %v7366_v5, 16  ;;  %v3621_v33 = vadd.f32 %v10869_v0, %v10991_v35 }
 0x1a9   : > { %7075 = vst.msk [vmem:[#allocation2 + $0xc8] sm:$0xf] %vm6971_vm4, %v6504_v24  ;;  %v4807_v26 = vcombine.high %v4797_v10, %v4797_v10  ;;  %v5269_v40 = vunpack.i.l.s16 %v4797_v10  ;;  %v5270_v4 = vunpack.i.h.s16 %v4797_v10  ;;  %v5272_v13 = vunpack.i.h.s16 %v4805_v23 }
 0x1aa   : > { %v5278_v21 = vunpack.i.h.s16 %v11173_v2  ;;  %v7406_v17 = vrot.slane %v7404_v3, 5  ;;  %v9259_v28 = vpack.i.b16 %v11173_v2, %v5276_v20  ;;  %v7412_v6 = vrot.slane %v7410_v18, 5  ;;  %v11204_v3 = vld [vmem:[#allocation2 + $0x20] sm:$0xf] }
 0x1ab   : > { %v5274_v56 = vunpack.i.h.s16 %v4807_v26  ;;  %v9257_v11 = vpack.i.b16 %v4807_v26, %v5272_v13  ;;  %v6549_v58 = vrot.slane %v5269_v40, %v10570_v62  ;;  %v9256_v57 = vpack.i.b16 %v4805_v23, %v5270_v4 }
 0x1ac   : > { %v6587_v25 = vrot.slane %v5278_v21, %v10570_v62  ;;  %v7407_v31 = vor.u32 %v7406_v17, %v7403_v44  ;;  %v7399_v41 = vsel %vm11183_vm9, %v7394_v50, %v7398_v34  ;;  %v3688_v49 = vmax.f32 %v3621_v33, 0.0 }
 0x1ad   : > { %v9258_v48 = vpack.i.b16 %v11166_v60, %v5274_v56  ;;  %v6556_v32 = vrot.slane %v6549_v58, %v10570_v62  ;;  %v6558_v30 = vcombine.low %v9257_v11, %v9259_v28  ;;  %v7415_v42 = vshrl.u32 %v7367_v38, 16 }
 0x1ae   : > { %v6594_v39 = vrot.slane %v6587_v25, %v10570_v62  ;;  %v7408_v54 = vrot.slane %v7407_v31, 4  ;;  %v3975_v43 = vmul.f32 %v3905_v9, %v3688_v49  ;;  %v7418_v16 = vshll.u32 %v7367_v38, 16 }
 0x1af   : > { %v6557_v12 = vcombine.low %v9256_v57, %v9258_v48  ;;  %v7081_v8 = vsel %vm10577_vm5, %v6556_v32, %v7080_v27  ;;  %v6572_v45 = vrot.slane %v6558_v30, %v10570_v62  ;;  %v7417_v24 = vrot.slane %v7415_v42, 4  ;;  %v11220_v30 = vld [vmem:[%s11577_s3] ss:$0 sm:$0xff] }
 0x1b0   : > { %7082 = vst [vmem:[#allocation2 + $0xd4] sm:$0x1] %v7081_v8  ;;  %v7085_v0 = vsel %vm10577_vm5, %v6594_v39, %v7084_v14  ;;  %v7413_v35 = vsel %vm11183_vm9, %v7408_v54, %v7412_v6  ;;  %v7424_v50 = vshll.u32 %v7368_v59, 16  ;;  %v7429_v10 = vshrl.u32 %v7369_v37, 16 }
 0x1b1   : > { %v6565_v46 = vrot.slane %v6557_v12, %v10570_v62  ;;  %7086 = vst [vmem:[#allocation2 + $0xdc] sm:$0x1] %v7085_v0  ;;  %v9296_v22 = vcombine.low %v7399_v41, %v7413_v35  ;;  %v7432_v23 = vshll.u32 %v7369_v37, 16  ;;  %v3999_v5 = vpack.c.bf16 %v3975_v43, %v11169_v47 }
 0x1b2   : > { %v9200_v34 = vpack.c.bf16 %v3975_v43, %v3975_v43  ;;  %v7420_v44 = vrot.slane %v7418_v16, 5  ;;  %v4806_v26 = vcombine.high %v11166_v60, %v11166_v60  ;;  %v7431_v40 = vrot.slane %v7429_v10, 4  ;;  %v7372_v43 = vld [vmem:[#allocation2 + $0x24] sm:$0x1] }
 0x1b3   : > { %v6573_v20 = vcombine.low %v6565_v46, %v6572_v45  ;;  %9614 = vmatprep.mubr.msk.bf16.mxu1 %vm7176_vm6, %v9296_v22  ;;  %v7434_v4 = vrot.slane %v7432_v23, 5  ;;  %v7438_v13 = vshll.u32 %v7370_v53, 16  ;;  %v4816_v17 = vrot.slane %v3999_v5, %v10039_v15  ;;  %v7373_v53 = vld [vmem:[#allocation2 + $0x28] sm:$0xf]  ;;  %v7088_v10 = vld [vmem:[#allocation2 + $0xe4] sm:$0x1] }
 0x1b4   : > { %v4823_v18 = vrot.slane %v9200_v34, %v10039_v15  ;;  %v7421_v56 = vor.u32 %v7420_v44, %v7417_v24  ;;  %v4808_v47 = vcombine.high %v11173_v2, %v11173_v2  ;;  %v7426_v11 = vrot.slane %v7424_v50, 5 }
 0x1b5   : > { %v6580_v21 = vrot.slane %v6573_v20, %v10570_v62  ;;  %v7435_v28 = vor.u32 %v7434_v4, %v7431_v40  ;;  %v7443_v58 = vshrl.u32 %v11204_v3, 16  ;;  %v4824_v60 = vcombine.high %v4816_v17, %v4816_v17  ;;  %v9791_v20 = vld [vmem:[%s11578_s4 + $0x30] sm:$0xff]  }
 0x1b6   : > { %v4825_v57 = vcombine.high %v4823_v18, %v4823_v18  ;;  %v4832_v25 = vrot.slane %v4816_v17, %v10039_v15  ;;  %v4839_v27 = vrot.slane %v4823_v18, %v10039_v15  ;;  %v7422_v31 = vrot.slane %v7421_v56, 4  ;;  %v7374_v17 = vld [vmem:[#allocation2 + $0x2c] sm:$0x1] }
 0x1b7   : > { %7083 = vst.msk [vmem:[#allocation2 + $0xd8] sm:$0xf] %vm6971_vm4, %v6580_v21  ;;  %v7436_v48 = vrot.slane %v7435_v28, 4  ;;  %v7440_v32 = vrot.slane %v7438_v13, 5  ;;  %v3626_v2 = vadd.f32 %v11220_v30, %v10997_v52  ;;  %v4846_v14 = vrot.slane %v4824_v60, %v10039_v15 }
 0x1b8   : > { %v11226_v33 = vrot.slane %v4825_v57, %v10039_v15  ;;  %v4854_v38 = vcombine.high %v4832_v25, %v4832_v25  ;;  %v4855_v39 = vcombine.high %v4839_v27, %v4839_v27  ;;  %v5292_v54 = vunpack.i.h.s16 %v4839_v27 }
 0x1b9   : > { %v6595_v6 = vcombine.low %v4806_v26, %v4832_v25  ;;  %v7441_v59 = vsel %vm11183_vm9, %v7436_v48, %v7440_v32  ;;  %v7445_v12 = vrot.slane %v7443_v58, 4  ;;  %v4856_v8 = vcombine.high %v4846_v14, %v4846_v14  ;;  %v7092_v26 = vld [vmem:[#allocation2 + $0xec] sm:$0x1]  ;;  %v7375_v58 = vld [vmem:[#allocation2 + $0x30] sm:$0xf] }
 0x1ba   : > { %v5287_v41 = vunpack.i.l.s16 %v4854_v38  ;;  %v5288_v49 = vunpack.i.h.s16 %v4854_v38  ;;  %v5294_v37 = vunpack.i.h.s16 %v11226_v33  ;;  %v5296_v9 = vunpack.i.h.s16 %v4855_v39 }
 0x1bb   : > { %v9262_v52 = vpack.i.b16 %v11226_v33, %v5292_v54  ;;  %v6596_v45 = vcombine.low %v4808_v47, %v4846_v14  ;;  %v7427_v0 = vsel %vm11183_vm9, %v7422_v31, %v7426_v11  ;;  %v5290_v35 = vunpack.i.h.s16 %v4856_v8  ;;  %v3910_v31 = vpop.permute.xlu0 %3909  ;;  %v7377_v54 = vld [vmem:[#allocation2 + $0x38] sm:$0xf] }
 0x1bc   : > { %v9260_v42 = vpack.i.b16 %v4856_v8, %v5288_v49  ;;  %v6603_v46 = vrot.slane %v6595_v6, %v10570_v62  ;;  %v6625_v22 = vrot.slane %v5287_v41, %v10570_v62  ;;  %v9263_v16 = vpack.i.b16 %v4855_v39, %v5294_v37  ;;  %v7376_v39 = vld [vmem:[#allocation2 + $0x34] sm:$0x1] }
 0x1bd   : > { %v6610_v24 = vrot.slane %v6596_v45, %v10570_v62  ;;  %v6663_v50 = vrot.slane %v5296_v9, %v10570_v62  ;;  %v9297_v23 = vcombine.low %v7427_v0, %v7441_v59  ;;  %v9261_v5 = vpack.i.b16 %v4839_v27, %v5290_v35  ;;  %v11255_v27 = vld [vmem:[%s11578_s4 + $0x48] sm:$0xff]   ;;  %v3915_v35 = vpop.permute.xlu1 %3914 }
 0x1be   : > { %v6632_v34 = vrot.slane %v6625_v22, %v10570_v62  ;;  %v6633_v44 = vcombine.low %v9260_v42, %v9262_v52  ;;  %v7446_v40 = vshll.u32 %v11204_v3, 16  ;;  %v3689_v21 = vmax.f32 %v3626_v2, 0.0 }
 0x1bf   : > { %v6611_v4 = vcombine.low %v6603_v46, %v6610_v24  ;;  %v6670_v13 = vrot.slane %v6663_v50, %v10570_v62  ;;  %9615 = vmatmul.mubr.msk.bf16.vlgmr.msra.gmra.mxu1 %vm7176_vm6, %v9297_v23  ;;  %v7457_v18 = vshrl.u32 %v7373_v53, 16  ;;  %v6634_v56 = vcombine.low %v9261_v5, %v9263_v16 }
 0x1c0   : > { %v7089_v47 = vsel %vm10577_vm5, %v6632_v34, %v7088_v10  ;;  %v7448_v11 = vrot.slane %v7446_v40, 5  ;;  %v7452_v28 = vshll.u32 %v7372_v43, 16  ;;  %9623 = vmatpush3.bf16.msra.mxu1 %v11067_v55  ;;  %v6641_v3 = vrot.slane %v6633_v44, %v10570_v62 }
 0x1c1   : > { %v6618_v60 = vrot.slane %v6611_v4, %v10570_v62  ;;  %7090 = vst [vmem:[#allocation2 + $0xe4] sm:$0x1] %v7089_v47  ;;  %v7093_v57 = vsel %vm10577_vm5, %v6670_v13, %v7092_v26  ;;  %v7459_v25 = vrot.slane %v7457_v18, 4  ;;  %9624 = vmatprep.subr.bf16.mxu1 %v9791_v20  ;;  %v6648_v48 = vrot.slane %v6634_v56, %v10570_v62 }
 0x1c2   : > { %7094 = vst [vmem:[#allocation2 + $0xec] sm:$0x1] %v7093_v57  ;;  %v7449_v55 = vor.u32 %v7448_v11, %v7445_v12  ;;  %v7460_v32 = vshll.u32 %v7373_v53, 16  ;;  %v7466_v2 = vshll.u32 %v7374_v17, 16  ;;  %v3976_v14 = vmul.f32 %v3910_v31, %v3689_v21  ;;  %v7378_v12 = vld [vmem:[#allocation2 + $0x3c] sm:$0x1] }
 0x1c3   : > { %7087 = vst.msk [vmem:[#allocation2 + $0xe0] sm:$0xf] %vm6971_vm4, %v6618_v60  ;;  %v3629_v38 = vadd.f32 %v11220_v30, %v11016_v36  ;;  %v7471_v6 = vshrl.u32 %v7375_v58, 16  ;;  %v7474_v59 = vshll.u32 %v7375_v58, 16  ;;  %v6649_v8 = vcombine.low %v6641_v3, %v6648_v48  ;;  %v3925_v60 = vpop.permute.xlu0 %3924  ;;  %v3920_v3 = vpop.permute.xlu1 %3919 }
 0x1c4   : > { %v7450_v41 = vrot.slane %v7449_v55, 4  ;;  %v7454_v49 = vrot.slane %v7452_v28, 5  ;;  %v7462_v37 = vrot.slane %v7460_v32, 5  ;;  %9625 = vmatpush3.bf16.msra.mxu1 %v9791_v20  ;;  %v7468_v9 = vrot.slane %v7466_v2, 5 }
 0x1c5   : > { %v3690_v52 = vmax.f32 %v3629_v38, 0.0  ;;  %v7473_v45 = vrot.slane %v7471_v6, 4  ;;  %v7476_v0 = vrot.slane %v7474_v59, 5  ;;  %9634 = vmatprep.subr.bf16.mxu1 %v11255_v27  ;;  %v6656_v42 = vrot.slane %v6649_v8, %v10570_v62 }
 0x1c6   : > { %v7463_v36 = vor.u32 %v7462_v37, %v7459_v25  ;;  %v7480_v46 = vshll.u32 %v7376_v39, 16  ;;  %v7485_v22 = vshrl.u32 %v7377_v54, 16  ;;  %v7455_v43 = vsel %vm11183_vm9, %v7450_v41, %v7454_v49 }
 0x1c7   : > { %v3977_v53 = vmul.f32 %v3915_v35, %v3690_v52  ;;  %v7477_v16 = vor.u32 %v7476_v0, %v7473_v45  ;;  %v7488_v24 = vshll.u32 %v7377_v54, 16  ;;  %7091 = vst.msk [vmem:[#allocation2 + $0xe8] sm:$0xf] %vm6971_vm4, %v6656_v42  ;;  %v7494_v23 = vshll.u32 %v7378_v12, 16 }
 0x1c8   : > { %v7464_v50 = vrot.slane %v7463_v36, 4  ;;  %v7487_v10 = vrot.slane %v7485_v22, 4  ;;  %v3634_v20 = vadd.f32 %v11220_v30, %v11023_v61  ;;  %v7482_v4 = vrot.slane %v7480_v46, 5  ;;  %v9790_v46 = vld [vmem:[#allocation2 + $0x90] ss:$8 sps:$4 sm:$0xff]  }
 0x1c9   : > { %v4000_v5 = vpack.c.bf16 %v3977_v53, %v3976_v14  ;;  %v9201_v34 = vpack.c.bf16 %v3977_v53, %v3977_v53  ;;  %v7478_v44 = vrot.slane %v7477_v16, 4  ;;  %v7490_v26 = vrot.slane %v7488_v24, 5 }
 0x1ca   : > { %v7469_v40 = vsel %vm11183_vm9, %v7464_v50, %v7468_v9  ;;  %v3691_v13 = vmax.f32 %v3634_v20, 0.0  ;;  %v3637_v21 = vadd.f32 %v11220_v30, %v11051_v19  ;;  %v4857_v18 = vcombine.high %v11226_v33, %v11226_v33 }
 0x1cb   : > { %v9298_v17 = vcombine.low %v7455_v43, %v7469_v40  ;;  %v4865_v56 = vrot.slane %v4000_v5, %v10039_v15  ;;  %v4872_v61 = vrot.slane %v9201_v34, %v10039_v15  ;;  %v7483_v47 = vsel %vm11183_vm9, %v7478_v44, %v7482_v4  ;;  %v7096_v34 = vld [vmem:[#allocation2 + $0xf4] sm:$0x1]  ;;  %v7100_v44 = vld [vmem:[#allocation2 + $0xfc] sm:$0x1] }
 0x1cc   : > { %v7491_v11 = vor.u32 %v7490_v26, %v7487_v10  ;;  %v7496_v28 = vrot.slane %v7494_v23, 5  ;;  %v3692_v58 = vmax.f32 %v3637_v21, 0.0  ;;  %v3978_v48 = vmul.f32 %v3920_v3, %v3691_v13 }
 0x1cd   : > { %9618 = vmatprep.mubr.msk.bf16.mxu1 %vm7176_vm6, %v9298_v17  ;;  %v4873_v57 = vcombine.high %v4865_v56, %v4865_v56  ;;  %v4874_v19 = vcombine.high %v4872_v61, %v4872_v61  ;;  %v4881_v25 = vrot.slane %v4865_v56, %v10039_v15  ;;  %v4888_v33 = vrot.slane %v4872_v61, %v10039_v15 }
 0x1ce   : > { %v7492_v31 = vrot.slane %v7491_v11, 4  ;;  %v3979_v55 = vmul.f32 %v3925_v60, %v3692_v58  ;;  %v11283_v32 = vadd.f32 %v11220_v30, %v11072_v7 }
 0x1cf   : > { %v4895_v2 = vrot.slane %v4873_v57, %v10039_v15  ;;  %v4902_v14 = vrot.slane %v4874_v19, %v10039_v15  ;;  %v4903_v38 = vcombine.high %v4881_v25, %v4881_v25  ;;  %v4904_v39 = vcombine.high %v4888_v33, %v4888_v33 }
 0x1d0   : > { %v5308_v54 = vunpack.i.h.s16 %v4888_v33  ;;  %v7497_v6 = vsel %vm11183_vm9, %v7492_v31, %v7496_v28  ;;  %v4001_v59 = vpack.c.bf16 %v3979_v55, %v3978_v48  ;;  %v9202_v8 = vpack.c.bf16 %v3979_v55, %v3979_v55 }
 0x1d1   : > { %v4905_v41 = vcombine.high %v4895_v2, %v4895_v2  ;;  %v4906_v49 = vcombine.high %v4902_v14, %v4902_v14  ;;  %v5310_v37 = vunpack.i.h.s16 %v4902_v14  ;;  %v5312_v9 = vunpack.i.h.s16 %v4904_v39 }
 0x1d2   : > { %v9265_v52 = vpack.i.b16 %v4902_v14, %v5308_v54  ;;  %v6671_v12 = vcombine.low %v4857_v18, %v4895_v2  ;;  %v6672_v7 = vcombine.low %v4881_v25, %v4903_v38  ;;  %v9299_v45 = vcombine.low %v7483_v47, %v7497_v6  ;;  %v9793_v2 = vld [vmem:[#allocation2 + $0xb0] ss:$8 sps:$4 sm:$0xff]   ;;  %v9797_v38 = vld [vmem:[%s11578_s4 + $0x40] sm:$0xff]  }
 0x1d3   : > { %v5305_v0 = vunpack.i.l.s16 %v4905_v41  ;;  %v5306_v35 = vunpack.i.h.s16 %v4905_v41  ;;  %v5314_v42 = vunpack.i.h.s16 %v4906_v49  ;;  %v9266_v36 = vpack.i.b16 %v4904_v39, %v5310_v37  ;;  %v3930_v39 = vpop.permute.xlu0 %3929 }
 0x1d4   : > { %v9267_v22 = vpack.i.b16 %v4906_v49, %v5312_v9  ;;  %v6679_v43 = vrot.slane %v6671_v12, %v10570_v62  ;;  %v6686_v53 = vrot.slane %v6672_v7, %v10570_v62  ;;  %9619 = vmatmul.mubr.msk.bf16.gmra.mxu1 %vm7176_vm6, %v9299_v45  ;;  %v4914_v16 = vrot.slane %v4001_v59, %v10039_v15  ;;  %v7104_v49 = vld [vmem:[#allocation2 + $0x104] sm:$0x1] }
 0x1d5   : > { %v9264_v24 = vpack.i.b16 %v4888_v33, %v5306_v35  ;;  %v6701_v50 = vrot.slane %v5305_v0, %v10570_v62  ;;  %v6739_v10 = vrot.slane %v5314_v42, %v10570_v62  ;;  %9626 = vmatprep.mubr.msk.bf16.mxu1 %vm7176_vm6, %v9790_v46  ;;  %v4921_v23 = vrot.slane %v9202_v8, %v10039_v15  ;;  %v9792_v33 = vld [vmem:[#allocation2 + $0xa0] ss:$8 sps:$4 sm:$0xff]   ;;  %v7867_v0 = vld [vmem:[#allocation2 + $0x90] sm:$0xf]  ;;  %v3935_v35 = vpop.permute.xlu1 %3934 }
 0x1d6   : > { %v6687_v20 = vcombine.low %v6679_v43, %v6686_v53  ;;  %v6710_v5 = vcombine.low %v9265_v52, %v9267_v22  ;;  %v4922_v26 = vcombine.high %v4914_v16, %v4914_v16  ;;  %v4930_v40 = vrot.slane %v4914_v16, %v10039_v15  ;;  %v7869_v22 = vld [vmem:[#allocation2 + $0x98] sm:$0xf] }
 0x1d7   : > { %v6708_v4 = vrot.slane %v6701_v50, %v10570_v62  ;;  %v6709_v13 = vcombine.low %v9264_v24, %v9266_v36  ;;  %v6746_v21 = vrot.slane %v6739_v10, %v10570_v62  ;;  %v4923_v17 = vcombine.high %v4921_v23, %v4921_v23  ;;  %v9794_v10 = vld [vmem:[#allocation2 + $0xc0] ss:$8 sps:$4 sm:$0xff]  }
 0x1d8   : > { %v6694_v18 = vrot.slane %v6687_v20, %v10570_v62  ;;  %v6724_v56 = vrot.slane %v6710_v5, %v10570_v62  ;;  %v4937_v61 = vrot.slane %v4921_v23, %v10039_v15  ;;  %v4944_v47 = vrot.slane %v4922_v26, %v10039_v15 }
 0x1d9   : > { %v6717_v11 = vrot.slane %v6709_v13, %v10570_v62  ;;  %v7097_v28 = vsel %vm10577_vm5, %v6708_v4, %v7096_v34  ;;  %v7101_v58 = vsel %vm10577_vm5, %v6746_v21, %v7100_v44  ;;  %v4951_v60 = vrot.slane %v4923_v17, %v10039_v15 }
 0x1da   : > { %7095 = vst.msk [vmem:[#allocation2 + $0xf0] sm:$0xf] %vm6971_vm4, %v6694_v18  ;;  %7098 = vst [vmem:[#allocation2 + $0xf4] sm:$0x1] %v7097_v28  ;;  %v4952_v3 = vcombine.high %v4930_v40, %v4930_v40  ;;  %v4953_v57 = vcombine.high %v4937_v61, %v4937_v61  ;;  %v4954_v19 = vcombine.high %v4944_v47, %v4944_v47  ;;  %v5323_v25 = vunpack.i.l.s16 %v4937_v61  ;;  %v11345_v18 = vld [vmem:[#allocation2 + $0x94] sm:$0x1] }
 0x1db   : > { %7102 = vst [vmem:[#allocation2 + $0xfc] sm:$0x1] %v7101_v58  ;;  %v6725_v31 = vcombine.low %v6717_v11, %v6724_v56  ;;  %v11311_v48 = vcombine.high %v4951_v60, %v4951_v60  ;;  %v5324_v55 = vunpack.i.h.s16 %v4937_v61  ;;  %v3645_v14 = vadd.f32 %v11220_v30, %v11088_v1 }
 0x1dc   : > { %v5328_v54 = vunpack.i.h.s16 %v4953_v57  ;;  %v6747_v6 = vcombine.low %v4930_v40, %v4952_v3  ;;  %v6748_v59 = vcombine.low %v4944_v47, %v4954_v19  ;;  %v6777_v8 = vrot.slane %v5323_v25, %v10570_v62  ;;  %9627 = vmatmul.mubr.msk.bf16.vlgmr.msra.gmra.mxu1 %vm7176_vm6, %v9792_v33 }
 0x1dd   : > { %v6732_v41 = vrot.slane %v6725_v31, %v10570_v62  ;;  %v3693_v37 = vmax.f32 %v11283_v32, 0.0  ;;  %9630 = vmatprep.mubr.msk.bf16.mxu1 %vm7176_vm6, %v9793_v2  ;;  %9635 = vmatpush3.bf16.msra.mxu1 %v11255_v27  ;;  %v3694_v7 = vmax.f32 %v3645_v14, 0.0  ;;  %v3650_v45 = vadd.f32 %v11220_v30, %v11102_v51  ;;  %v11334_v32 = vld [vmem:[%s11578_s4 + $0x58] sm:$0xff]   ;;  %v3940_v30 = vpop.permute.xlu0 %3939 }
 0x1de   : > { %v9270_v1 = vpack.i.b16 %v11311_v48, %v5328_v54  ;;  %v6755_v9 = vrot.slane %v6747_v6, %v10570_v62  ;;  %v6762_v52 = vrot.slane %v6748_v59, %v10570_v62  ;;  %v6784_v12 = vrot.slane %v6777_v8, %v10570_v62  ;;  %9636 = vmatprep.subr.bf16.mxu1 %v9797_v38  ;;  %v9796_v51 = vld [vmem:[#allocation2 + $0xd8] ss:$8 sps:$4 sm:$0xff]  }
 0x1df   : > { %7099 = vst.msk [vmem:[#allocation2 + $0xf8] sm:$0xf] %vm6971_vm4, %v6732_v41  ;;  %v5326_v42 = vunpack.i.h.s16 %v4951_v60  ;;  %v9268_v36 = vpack.i.b16 %v4951_v60, %v5324_v55  ;;  %v3980_v43 = vmul.f32 %v3930_v39, %v3693_v37  ;;  %v3981_v53 = vmul.f32 %v3935_v35, %v3694_v7  ;;  %v9801_v41 = vld [vmem:[%s11578_s4 + $0x50] sm:$0xff]  }
 0x1e0   : > { %v6763_v46 = vcombine.low %v6755_v9, %v6762_v52  ;;  %v7105_v27 = vsel %vm10577_vm5, %v6784_v12, %v7104_v49  ;;  %v3695_v16 = vmax.f32 %v3650_v45, 0.0  ;;  %v7888_v23 = vshrl.u32 %v7867_v0, 16  ;;  %v7108_v12 = vld [vmem:[#allocation2 + $0x10c] sm:$0x1] }
 0x1e1   : > { %7106 = vst [vmem:[#allocation2 + $0x104] sm:$0x1] %v7105_v27  ;;  %v6785_v50 = vcombine.low %v9268_v36, %v9270_v1  ;;  %9637 = vmatpush3.bf16.msra.mxu1 %v9797_v38  ;;  %v4002_v20 = vpack.c.bf16 %v3981_v53, %v3980_v43  ;;  %v9203_v5 = vpack.c.bf16 %v3981_v53, %v3981_v53  ;;  %v7902_v44 = vshrl.u32 %v7869_v22, 16  ;;  %v9798_v25 = vld [vmem:[#allocation2 + $0xe8] ss:$8 sps:$4 sm:$0xff]  }
 0x1e2   : > { %v6770_v24 = vrot.slane %v6763_v46, %v10570_v62  ;;  %v3982_v34 = vmul.f32 %v3940_v30, %v3695_v16  ;;  %9646 = vmatprep.subr.bf16.mxu1 %v11334_v32  ;;  %v9269_v26 = vpack.i.b16 %v4953_v57, %v5326_v42  ;;  %v7891_v40 = vshll.u32 %v7867_v0, 16  ;;  %v7112_v42 = vld [vmem:[#allocation2 + $0x114] sm:$0x1]  ;;  %v7870_v16 = vld [vmem:[#allocation2 + $0x9c] sm:$0x1] }
 0x1e3   : > { %v7905_v4 = vshll.u32 %v7869_v22, 16  ;;  %v4963_v13 = vrot.slane %v4002_v20, %v10039_v15  ;;  %v4970_v21 = vrot.slane %v9203_v5, %v10039_v15  ;;  %v11347_v56 = vrot.slane %v7902_v44, 4  ;;  %v7871_v22 = vld [vmem:[#allocation2 + $0xa0] sm:$0xf] }
 0x1e4   : > { %7103 = vst.msk [vmem:[#allocation2 + $0x100] sm:$0xf] %vm6971_vm4, %v6770_v24  ;;  %9631 = vmatmul.mubr.msk.bf16.gmra.mxu1 %vm7176_vm6, %v9794_v10  ;;  %v4003_v17 = vpack.c.bf16 %v3982_v34, %v3982_v34  ;;  %v6793_v61 = vrot.slane %v6785_v50, %v10570_v62  ;;  %v5330_v47 = vunpack.i.h.s16 %v11311_v48  ;;  %v11351_v11 = vrot.slane %v7888_v23, 4  ;;  %v7873_v24 = vld [vmem:[#allocation2 + $0xa8] sm:$0xf] }
 0x1e5   : > { %9638 = vmatprep.mubr.msk.bf16.mxu1 %vm7176_vm6, %v9796_v51  ;;  %v11353_v28 = vrot.slane %v7905_v4, 5  ;;  %v4971_v58 = vcombine.high %v4963_v13, %v4963_v13  ;;  %v4972_v60 = vcombine.high %v4970_v21, %v4970_v21  ;;  %v4979_v3 = vrot.slane %v4963_v13, %v10039_v15  ;;  %v7116_v10 = vld [vmem:[#allocation2 + $0x11c] sm:$0x1]  ;;  %v7875_v4 = vld [vmem:[#allocation2 + $0xb0] sm:$0xf] }
 0x1e6   : > { %v4986_v57 = vrot.slane %v4970_v21, %v10039_v15  ;;  %v5011_v19 = vrot.slane %v4003_v17, %v10039_v15  ;;  %v11358_v33 = vrot.slane %v7891_v40, 5  ;;  %v7897_v31 = vshll.u32 %v11345_v18, 16  ;;  %v7872_v18 = vld [vmem:[#allocation2 + $0xa4] sm:$0x1] }
 0x1e7   : > { %v7908_v48 = vor.u32 %v11353_v28, %v11347_v56  ;;  %v4993_v55 = vrot.slane %v4971_v58, %v10039_v15  ;;  %v5000_v2 = vrot.slane %v4972_v60, %v10039_v15  ;;  %v5001_v14 = vcombine.high %v4979_v3, %v4979_v3  ;;  %v7877_v56 = vld [vmem:[#allocation2 + $0xb8] sm:$0xf]  ;;  %v7874_v60 = vld [vmem:[#allocation2 + $0xac] sm:$0x1] }
 0x1e8   : > { %v5332_v38 = vunpack.i.h.s16 %v4979_v3  ;;  %v9271_v39 = vpack.i.b16 %v4979_v3, %v5330_v47  ;;  %v5012_v54 = vcombine.high %v5011_v19, %v5011_v19  ;;  %v7916_v23 = vshrl.u32 %v7871_v22, 16 }
 0x1e9   : > { %v5003_v6 = vcombine.high %v4993_v55, %v4993_v55  ;;  %v5341_v59 = vunpack.i.l.s16 %v5000_v2  ;;  %v6824_v1 = vcombine.low %v5001_v14, %v4986_v57  ;;  %v7919_v20 = vshll.u32 %v7871_v22, 16  ;;  %v7880_v22 = vld [vmem:[#allocation2 + $0xc4] sm:$0x1] }
 0x1ea   : > { %v6786_v49 = vcombine.low %v9269_v26, %v9271_v39  ;;  %v6815_v37 = vrot.slane %v5332_v38, %v10570_v62  ;;  %v5026_v7 = vrot.slane %v5012_v54, %v10039_v15  ;;  %v11382_v15 = vld [vmem:[%s11578_s4 + $0x68] sm:$0xff]   ;;  %v7911_v44 = vshll.u32 %v7870_v16, 16  ;;  %v7876_v39 = vld [vmem:[#allocation2 + $0xb4] sm:$0x1] }
 0x1eb   : > { %v9800_v8 = vld [vmem:[#allocation2 + $0xf8] ss:$8 sps:$4 sm:$0xff]   ;;  %v6823_v9 = vcombine.low %v4993_v55, %v5003_v6  ;;  %v6853_v52 = vrot.slane %v5341_v59, %v10570_v62  ;;  %v6838_v35 = vrot.slane %v6824_v1, %v10570_v62  ;;  %v7894_v26 = vor.u32 %v11358_v33, %v11351_v11  ;;  %v7881_v59 = vld [vmem:[#allocation2 + $0xc8] sm:$0xf] }
 0x1ec   : > { %9639 = vmatmul.mubr.msk.bf16.vlgmr.msra.gmra.mxu1 %vm7176_vm6, %v9798_v25  ;;  %v6800_v45 = vrot.slane %v6786_v49, %v10570_v62  ;;  %v6822_v0 = vrot.slane %v6815_v37, %v10570_v62  ;;  %v5350_v27 = vunpack.i.h.s16 %v5026_v7  ;;  %v7930_v40 = vshrl.u32 %v7873_v24, 16  ;;  %v7879_v55 = vld [vmem:[#allocation2 + $0xc0] sm:$0xf] }
 0x1ed   : > { %9642 = vmatprep.mubr.msk.bf16.mxu1 %vm7176_vm6, %v9800_v8  ;;  %9647 = vmatpush3.bf16.msra.mxu1 %v11334_v32  ;;  %v6831_v36 = vrot.slane %v6823_v9, %v10570_v62  ;;  %v6860_v46 = vrot.slane %v6853_v52, %v10570_v62  ;;  %v7899_v21 = vrot.slane %v7897_v31, 5  ;;  %v7909_v17 = vrot.slane %v7908_v48, 4  ;;  %v7878_v31 = vld [vmem:[#allocation2 + $0xbc] sm:$0x1] }
 0x1ee   : > { %9648 = vmatprep.subr.bf16.mxu1 %v9801_v41  ;;  %v6801_v43 = vcombine.low %v6793_v61, %v6800_v45  ;;  %v7109_v53 = vsel %vm10577_vm5, %v6822_v0, %v7108_v12  ;;  %v6891_v30 = vrot.slane %v5350_v27, %v10570_v62  ;;  %v7921_v61 = vrot.slane %v7919_v20, 5 }
 0x1ef   : > { %v6839_v51 = vcombine.low %v6831_v36, %v6838_v35  ;;  %7110 = vst [vmem:[#allocation2 + $0x10c] sm:$0x1] %v7109_v53  ;;  %v7113_v32 = vsel %vm10577_vm5, %v6860_v46, %v7112_v42  ;;  %v7932_v47 = vrot.slane %v7930_v40, 4  ;;  %v7933_v28 = vshll.u32 %v7873_v24, 16  ;;  %v7882_v24 = vld [vmem:[#allocation2 + $0xcc] sm:$0x1] }
 0x1f0   : > { %v6808_v50 = vrot.slane %v6801_v43, %v10570_v62  ;;  %7114 = vst [vmem:[#allocation2 + $0x114] sm:$0x1] %v7113_v32  ;;  %v6898_v34 = vrot.slane %v6891_v30, %v10570_v62  ;;  %v7913_v58 = vrot.slane %v7911_v44, 5  ;;  %v7944_v3 = vshrl.u32 %v7875_v4, 16 }
 0x1f1   : > { %9649 = vmatpush3.bf16.msra.mxu1 %v9801_v41  ;;  %v6846_v5 = vrot.slane %v6839_v51, %v10570_v62  ;;  %v7918_v62 = vrot.slane %v7916_v23, 4  ;;  %v7947_v11 = vshll.u32 %v7875_v4, 16  ;;  %v7895_v57 = vrot.slane %v7894_v26, 4 }
 0x1f2   : > { %9658 = vmatprep.subr.bf16.mxu1 %v11382_v15  ;;  %7107 = vst.msk [vmem:[#allocation2 + $0x108] sm:$0xf] %vm6971_vm4, %v6808_v50  ;;  %v7117_v13 = vsel %vm10577_vm5, %v6898_v34, %v7116_v10  ;;  %v7925_v19 = vshll.u32 %v7872_v18, 16  ;;  %v7935_v25 = vrot.slane %v7933_v28, 5  ;;  %v7958_v33 = vshrl.u32 %v7877_v56, 16  ;;  %v9806_v28 = vld [vmem:[%s11578_s4 + $0x78] sm:$0xff]  }
 0x1f3   : > { %7111 = vst.msk [vmem:[#allocation2 + $0x110] sm:$0xf] %vm6971_vm4, %v6846_v5  ;;  %7118 = vst [vmem:[#allocation2 + $0x11c] sm:$0x1] %v7117_v13  ;;  %v7914_v29 = vsel %vm11183_vm9, %v7909_v17, %v7913_v58  ;;  %v7946_v48 = vrot.slane %v7944_v3, 4  ;;  %v7949_v2 = vrot.slane %v7947_v11, 5  ;;  %v7922_v14 = vor.u32 %v7921_v61, %v7918_v62 }
 0x1f4   : > { %v7936_v38 = vor.u32 %v7935_v25, %v7932_v47  ;;  %v7960_v54 = vrot.slane %v7958_v33, 4  ;;  %v7961_v6 = vshll.u32 %v7877_v56, 16  ;;  %v7939_v8 = vshll.u32 %v7874_v60, 16  ;;  %v9804_v17 = vld [vmem:[%s11578_s4 + $0x60] sm:$0xff]   ;;  %v8370_v25 = vld [vmem:[#allocation2 + $0x10] sm:$0xf] }
 0x1f5   : > { %v7972_v41 = vshrl.u32 %v7879_v55, 16  ;;  %v7975_v49 = vshll.u32 %v7879_v55, 16  ;;  %v7900_v1 = vsel %vm11183_vm9, %v7895_v57, %v7899_v21  ;;  %v7950_v9 = vor.u32 %v7949_v2, %v7946_v48  ;;  %v9807_v11 = vld [vmem:[#allocation2 + $0x18] ss:$8 sps:$4 sm:$0xff]   ;;  %v9809_v57 = vld [vmem:[%s11578_s4 + $0x70] sm:$0xff]   ;;  %v9812_v33 = vld [vmem:[%s11578_s4 + $0x88] sm:$0xff]  }
 0x1f6   : > { %v7963_v52 = vrot.slane %v7961_v6, 5  ;;  %v7967_v12 = vshll.u32 %v7878_v31, 16  ;;  %v9326_v7 = vcombine.low %v7900_v1, %v7914_v29  ;;  %v7927_v45 = vrot.slane %v7925_v19, 5  ;;  %v9808_v19 = vld [vmem:[#allocation2 + $0x28] ss:$8 sps:$4 sm:$0xff]  }
 0x1f7   : > { %v7937_v0 = vrot.slane %v7936_v38, 4  ;;  %v7923_v35 = vrot.slane %v7922_v14, 4  ;;  %v7953_v42 = vshll.u32 %v7876_v39, 16  ;;  %v7986_v46 = vshrl.u32 %v7881_v59, 16  ;;  %v8368_v55 = vld [vmem:[#allocation2 + $0x8] sm:$0xf] }
 0x1f8   : > { %v7964_v36 = vor.u32 %v7963_v52, %v7960_v54  ;;  %v7941_v27 = vrot.slane %v7939_v8, 5  ;;  %v7974_v43 = vrot.slane %v7972_v41, 4  ;;  %v7977_v53 = vrot.slane %v7975_v49, 5  ;;  %v9810_v14 = vld [vmem:[#allocation2 + $0x38] ss:$8 sps:$4 sm:$0xff]  }
 0x1f9   : > { %v7989_v16 = vshll.u32 %v7881_v59, 16  ;;  %v7951_v51 = vrot.slane %v7950_v9, 4  ;;  %v7969_v30 = vrot.slane %v7967_v12, 5  ;;  %v7988_v50 = vrot.slane %v7986_v46, 4  ;;  %v9811_v38 = vld [vmem:[#allocation2 + $0x50] ss:$8 sps:$4 sm:$0xff]  }
 0x1fa   : > { %v9802_v37 = vld [vmem:[#allocation2 + $0x108] ss:$8 sps:$4 sm:$0xff]   ;;  %v7965_v32 = vrot.slane %v7964_v36, 4  ;;  %v7942_v10 = vsel %vm11183_vm9, %v7937_v0, %v7941_v27  ;;  %v7928_v20 = vsel %vm11183_vm9, %v7923_v35, %v7927_v45  ;;  %v7955_v5 = vrot.slane %v7953_v42, 5  ;;  %v8372_v39 = vld [vmem:[#allocation2 + $0x18] sm:$0xf] }
 0x1fb   : > { %9643 = vmatmul.mubr.msk.bf16.gmra.mxu1 %vm7176_vm6, %v9802_v37  ;;  %v7991_v23 = vrot.slane %v7989_v16, 5  ;;  %v7978_v44 = vor.u32 %v7977_v53, %v7974_v43  ;;  %v7981_v26 = vshll.u32 %v7880_v22, 16  ;;  %v7995_v4 = vshll.u32 %v7882_v24, 16  ;;  %v8374_v59 = vld [vmem:[#allocation2 + $0x20] sm:$0xf] }
 0x1fc   : > { %9650 = vmatprep.mubr.msk.bf16.mxu1 %vm7176_vm6, %v9326_v7  ;;  %v7970_v34 = vsel %vm11183_vm9, %v7965_v32, %v7969_v30  ;;  %v9327_v13 = vcombine.low %v7928_v20, %v7942_v10  ;;  %v7956_v21 = vsel %vm11183_vm9, %v7951_v51, %v7955_v5  ;;  %v8403_v29 = vshrl.u32 %v8370_v25, 16  ;;  %v8376_v49 = vld [vmem:[#allocation2 + $0x28] sm:$0xf]  ;;  %v8371_v37 = vld [vmem:[#allocation2 + $0x14] sm:$0x1]  ;;  %v9815_v22 = vld [vmem:[%s11578_s4 + $0x80] sm:$0xff]  }
 0x1fd   : > { %v7992_v40 = vor.u32 %v7991_v23, %v7988_v50  ;;  %v9328_v18 = vcombine.low %v7956_v21, %v7970_v34  ;;  %v7979_v62 = vrot.slane %v7978_v44, 4  ;;  %v7983_v61 = vrot.slane %v7981_v26, 5  ;;  %v8378_v7 = vld [vmem:[#allocation2 + $0x30] sm:$0xf]  ;;  %v9813_v42 = vld [vmem:[#allocation2 + $0x60] ss:$8 sps:$4 sm:$0xff]  }
 0x1fe   : > { %v7997_v47 = vrot.slane %v7995_v4, 5  ;;  %v8406_v31 = vshll.u32 %v8370_v25, 16  ;;  %v8389_v48 = vshrl.u32 %v8368_v55, 16  ;;  %v8392_v2 = vshll.u32 %v8368_v55, 16  ;;  %v8369_v36 = vld [vmem:[#allocation2 + $0xc] sm:$0x1] }
 0x1ff   : > { %v7993_v56 = vrot.slane %v7992_v40, 4  ;;  %v7984_v60 = vsel %vm11183_vm9, %v7979_v62, %v7983_v61  ;;  %v8405_v54 = vrot.slane %v8403_v29, 4  ;;  %v8417_v1 = vshrl.u32 %v8372_v39, 16  ;;  %v9814_v32 = vld [vmem:[#allocation2 + $0x70] ss:$8 sps:$4 sm:$0xff]  }
 0x200   : > { %v8408_v6 = vrot.slane %v8406_v31, 5  ;;  %v8391_v8 = vrot.slane %v8389_v48, 4  ;;  %v8394_v41 = vrot.slane %v8392_v2, 5  ;;  %v8420_v9 = vshll.u32 %v8372_v39, 16  ;;  %v8380_v5 = vld [vmem:[#allocation2 + $0x38] sm:$0xf] }
 0x201   : > { %v7998_v58 = vsel %vm11183_vm9, %v7993_v56, %v7997_v47  ;;  %v8431_v52 = vshrl.u32 %v8374_v59, 16  ;;  %v8434_v12 = vshll.u32 %v8374_v59, 16  ;;  %v8445_v0 = vshrl.u32 %v8376_v49, 16  ;;  %v8373_v44 = vld [vmem:[#allocation2 + $0x1c] sm:$0x1] }
 0x202   : > { %v9329_v3 = vcombine.low %v7984_v60, %v7998_v58  ;;  %v8409_v45 = vor.u32 %v8408_v6, %v8405_v54  ;;  %v8448_v35 = vshll.u32 %v8376_v49, 16  ;;  %v8395_v46 = vor.u32 %v8394_v41, %v8391_v8  ;;  %v8375_v26 = vld [vmem:[#allocation2 + $0x24] sm:$0x1]  ;;  %v8377_v56 = vld [vmem:[#allocation2 + $0x2c] sm:$0x1] }
 0x203   : > { %9651 = vmatmul.mubr.msk.bf16.vlgmr.msra.gmra.mxu1 %vm7176_vm6, %v9327_v13  ;;  %v8412_v27 = vshll.u32 %v8371_v37, 16  ;;  %v8419_v43 = vrot.slane %v8417_v1, 4  ;;  %v8422_v53 = vrot.slane %v8420_v9, 5  ;;  %v8459_v16 = vshrl.u32 %v8378_v7, 16  ;;  %v9816_v25 = vld [vmem:[#allocation2 + $0x80] ss:$8 sps:$4 sm:$0xff]  }
 0x204   : > { %9659 = vmatpush3.bf16.msra.mxu1 %v11382_v15  ;;  %9654 = vmatprep.mubr.msk.bf16.mxu1 %vm7176_vm6, %v9328_v18  ;;  %v9805_v15 = vld [vmem:[#allocation2 + $0x8] ss:$8 sps:$4 sm:$0xff]   ;;  %v8462_v51 = vshll.u32 %v8378_v7, 16  ;;  %v8433_v30 = vrot.slane %v8431_v52, 4  ;;  %v8436_v24 = vrot.slane %v8434_v12, 5  ;;  %v8398_v50 = vshll.u32 %v8369_v36, 16 }
 0x205   : > { %9660 = vmatprep.subr.bf16.mxu1 %v9804_v17  ;;  %v8410_v10 = vrot.slane %v8409_v45, 4  ;;  %v8447_v23 = vrot.slane %v8445_v0, 4  ;;  %v8450_v20 = vrot.slane %v8448_v35, 5  ;;  %v8414_v34 = vrot.slane %v8412_v27, 5  ;;  %v8381_v9 = vld [vmem:[#allocation2 + $0x3c] sm:$0x1] }
 0x206   : > { %v8396_v40 = vrot.slane %v8395_v46, 4  ;;  %v8423_v4 = vor.u32 %v8422_v53, %v8419_v43  ;;  %v8461_v13 = vrot.slane %v8459_v16, 4  ;;  %v8464_v21 = vrot.slane %v8462_v51, 5  ;;  %v8383_v52 = vld [vmem:[#allocation2 + $0x44] sm:$0x1] }
 0x207   : > { %v8437_v18 = vor.u32 %v8436_v24, %v8433_v30  ;;  %v8473_v62 = vshrl.u32 %v8380_v5, 16  ;;  %v8476_v61 = vshll.u32 %v8380_v5, 16  ;;  %v8415_v58 = vsel %vm11183_vm9, %v8410_v10, %v8414_v34 }
 0x208   : > { %9661 = vmatpush3.bf16.msra.mxu1 %v9804_v17  ;;  %v8382_v17 = vld [vmem:[#allocation2 + $0x40] sm:$0xf]  ;;  %v8451_v60 = vor.u32 %v8450_v20, %v8447_v23  ;;  %v8424_v55 = vrot.slane %v8423_v4, 4  ;;  %v8454_v29 = vshll.u32 %v8377_v56, 16  ;;  %v8465_v31 = vor.u32 %v8464_v21, %v8461_v13 }
 0x209   : > { %9670 = vmatprep.subr.bf16.mxu1 %v9806_v28  ;;  %v8438_v2 = vrot.slane %v8437_v18, 4  ;;  %v8482_v36 = vshll.u32 %v8381_v9, 16  ;;  %v8496_v27 = vshll.u32 %v8383_v52, 16 }
 0x20a   : > { %v8452_v54 = vrot.slane %v8451_v60, 4  ;;  %v8456_v37 = vrot.slane %v8454_v29, 5  ;;  %v8466_v1 = vrot.slane %v8465_v31, 4 }
 0x20b   : > { %9655 = vmatmul.mubr.msk.bf16.gmra.mxu1 %vm7176_vm6, %v9329_v3  ;;  %v8426_v3 = vshll.u32 %v8373_v44, 16  ;;  %v8498_v24 = vrot.slane %v8496_v27, 5 }
 0x20c   : > { %9662 = vmatprep.mubr.msk.bf16.mxu1 %vm7176_vm6, %v9805_v15  ;;  %v8440_v15 = vshll.u32 %v8375_v26, 16  ;;  %v8457_v35 = vsel %vm11183_vm9, %v8452_v54, %v8456_v37 }
 0x20d   : > { %v8428_v59 = vrot.slane %v8426_v3, 5 }
 0x20e   : > { %v8442_v8 = vrot.slane %v8440_v15, 5 }
 0x20f   : > { %v8429_v12 = vsel %vm11183_vm9, %v8424_v55, %v8428_v59  ;;  %v9818_v55 = vld [vmem:[%s11580_s6] sm:$0xff]  }
 0x210   : > { %v8443_v7 = vsel %vm11183_vm9, %v8438_v2, %v8442_v8  ;;  %v11473_v2 = vld [vmem:[%s11582_s8 + $0x18] sm:$0xff]  }
 0x213   : > { %9663 = vmatmul.mubr.msk.bf16.vlgmr.msra.gmra.mxu1 %vm7176_vm6, %v9807_v11  ;;  %v8379_v11 = vld [vmem:[#allocation2 + $0x34] sm:$0x1] }
 0x214   : > { %9671 = vmatpush3.bf16.msra.mxu1 %v9806_v28  ;;  %9666 = vmatprep.mubr.msk.bf16.mxu1 %vm7176_vm6, %v9808_v19  ;;  %v8400_v28 = vrot.slane %v8398_v50, 5  ;;  %v8490_v19 = vshll.u32 %v8382_v17, 16  ;;  %v8468_v6 = vshll.u32 %v8379_v11, 16  ;;  %v9817_v11 = vld [vmem:[%s11580_s6 + $0x8] sm:$0xff]  }
 0x215   : > { %9672 = vmatprep.subr.bf16.mxu1 %v9809_v57 }
 0x216   : > { %v8492_v49 = vrot.slane %v8490_v19, 5 }
 0x218   : > { %9673 = vmatpush3.bf16.msra.mxu1 %v9809_v57  ;;  %v8487_v57 = vshrl.u32 %v8382_v17, 16 }
 0x219   : > { %9682 = vmatprep.subr.bf16.mxu1 %v9812_v33 }
 0x21a   : > { %v8489_v41 = vrot.slane %v8487_v57, 4 }
 0x21b   : > { %9667 = vmatmul.mubr.msk.bf16.gmra.mxu1 %vm7176_vm6, %v9810_v14  ;;  %v8475_v14 = vrot.slane %v8473_v62, 4 }
 0x21c   : > { %9674 = vmatprep.mubr.msk.bf16.mxu1 %vm7176_vm6, %v9811_v38  ;;  %v8478_v38 = vrot.slane %v8476_v61, 5  ;;  %v8493_v46 = vor.u32 %v8492_v49, %v8489_v41 }
 0x21e   : > { %v8479_v45 = vor.u32 %v8478_v38, %v8475_v14  ;;  %v8494_v30 = vrot.slane %v8493_v46, 4 }
 0x220   : > { %v8480_v16 = vrot.slane %v8479_v45, 4  ;;  %v8499_v20 = vsel %vm11183_vm9, %v8494_v30, %v8498_v24 }
 0x221   : > { %v9592_v47 = vpop.f32.mrf.mxu1 }
 0x223   : > { %9675 = vmatmul.mubr.msk.bf16.vlgmr.msra.gmra.mxu1 %vm7176_vm6, %v9813_v42  ;;  %v7223_v39 = vpop.f32.mrf.mxu1  ;;  %v8470_v42 = vrot.slane %v8468_v6, 5 }
 0x224   : > { %9683 = vmatpush3.bf16.msra.mxu1 %v9812_v33  ;;  %9678 = vmatprep.mubr.msk.bf16.mxu1 %vm7176_vm6, %v9814_v32  ;;  %v8401_v33 = vsel %vm11183_vm9, %v8396_v40, %v8400_v28  ;;  %v8484_v32 = vrot.slane %v8482_v36, 5 }
 0x225   : > { %9684 = vmatprep.subr.bf16.mxu1 %v9815_v22  ;;  %v9356_v48 = vcombine.low %v8401_v33, %v8415_v58  ;;  %v9593_v0 = vpop.f32.mrf.mxu1  ;;  %v8471_v43 = vsel %vm11183_vm9, %v8466_v1, %v8470_v42 }
 0x226   : > { %v9358_v53 = vcombine.low %v8457_v35, %v8471_v43  ;;  %v8485_v10 = vsel %vm11183_vm9, %v8480_v16, %v8484_v32 }
 0x227   : > { %v7226_v51 = vpop.f32.mrf.mxu1  ;;  %v9359_v34 = vcombine.low %v8485_v10, %v8499_v20 }
 0x228   : > { %9685 = vmatpush3.bf16.msra.mxu1 %v9815_v22  ;;  %v9357_v22 = vcombine.low %v8429_v12, %v8443_v7 }
 0x229   : > { %9694 = vmatprep.subr.bf16.mxu1 %v9817_v11 }
 0x22b   : > { %9679 = vmatmul.mubr.msk.bf16.gmra.mxu1 %vm7176_vm6, %v9816_v25 }
 0x22c   : > { %9686 = vmatprep.mubr.msk.bf16.mxu1 %vm7176_vm6, %v9356_v48 }
 0x233   : > { %9687 = vmatmul.mubr.msk.bf16.vlgmr.msra.gmra.mxu1 %vm7176_vm6, %v9357_v22 }
 0x234   : > { %9690 = vmatprep.mubr.msk.bf16.mxu1 %vm7176_vm6, %v9358_v53  ;;  %9695 = vmatpush3.bf16.msra.mxu1 %v9817_v11 }
 0x235   : > { %9696 = vmatprep.subr.bf16.mxu1 %v9818_v55 }
 0x238   : > { %v9596_v50 = vpop.f32.mrf.mxu1  ;;  %9697 = vmatpush3.bf16.msra.mxu1 %v9818_v55 }
 0x239   : > { %9706 = vmatprep.subr.bf16.mxu1 %v11473_v2 }
 0x23a   : > { %v7239_v23 = vpop.f32.mrf.mxu1 }
 0x23b   : > { %9691 = vmatmul.mubr.msk.bf16.gmra.mxu1 %vm7176_vm6, %v9359_v34 }
 0x23c   : > { %v9597_v5 = vpop.f32.mrf.mxu1 }
 0x23e   : > { %v7242_v44 = vpop.f32.mrf.mxu1 }
 0x240   : > { %v9604_v26 = vpop.f32.mrf.mxu1 }
 0x241   : > { %v7341_v40 = vadd.f32 %v9604_v26, %v9592_v47 }
 0x242   : > { %v7332_v4 = vpop.f32.mrf.mxu1 }
 0x243   : > { %v7333_v13 = vadd.f32 %v7332_v4, %v7223_v39 }
 0x244   : > { %v9605_v21 = vpop.f32.mrf.mxu1 }
 0x245   : > { %v7344_v17 = vadd.f32 %v9605_v21, %v9593_v0 }
 0x246   : > { %v7335_v18 = vpop.f32.mrf.mxu1 }
 0x247   : > { %v7336_v56 = vadd.f32 %v7335_v18, %v7226_v51 }
 0x248   : > { %v9608_v62 = vpop.f32.mrf.mxu1 }
 0x249   : > { %v7357_v61 = vadd.f32 %v9608_v62, %v9596_v50 }
 0x24a   : > { %v7348_v28 = vpop.f32.mrf.mxu1 }
 0x24b   : > { %v7349_v58 = vadd.f32 %v7348_v28, %v7239_v23 }
 0x24c   : > { %v9609_v60 = vpop.f32.mrf.mxu1 }
 0x24d   : > { %v7360_v63 = vadd.f32 %v9609_v60, %v9597_v5 }
 0x24e   : > { %v7351_v3 = vpop.f32.mrf.mxu1 }
 0x24f   : > { %v7352_v15 = vadd.f32 %v7351_v3, %v7242_v44 }
 0x27f   : > { %v9616_v47 = vpop.f32.mrf.mxu1 }
 0x280   : > { %v7601_v57 = vadd.f32 %v9616_v47, %v7341_v40 }
 0x281   : > { %v7568_v19 = vpop.f32.mrf.mxu1 }
 0x282   : > { %v7599_v25 = vadd.f32 %v7568_v19, %v7333_v13 }
 0x283   : > { %v9617_v33 = vpop.f32.mrf.mxu1 }
 0x284   : > { %v7602_v29 = vadd.f32 %v9617_v33, %v7344_v17 }
 0x285   : > { %v7571_v31 = vpop.f32.mrf.mxu1 }
 0x286   : > { %v7600_v48 = vadd.f32 %v7571_v31, %v7336_v56 }
 0x294   : > { %v9620_v14 = vpop.f32.mrf.mxu1 }
 0x295   : > { %v7605_v38 = vadd.f32 %v9620_v14, %v7357_v61 }
 0x296   : > { %v7584_v39 = vpop.f32.mrf.mxu1 }
 0x297   : > { %v7603_v54 = vadd.f32 %v7584_v39, %v7349_v58 }
 0x298   : > { %v9621_v6 = vpop.f32.mrf.mxu1 }
 0x299   : > { %v7606_v59 = vadd.f32 %v9621_v6, %v7360_v63 }
 0x29a   : > { %v7587_v8 = vpop.f32.mrf.mxu1 }
 0x29b   : > { %v7604_v41 = vadd.f32 %v7587_v8, %v7352_v15 }
 0x29c   : > { %v9628_v49 = vpop.f32.mrf.mxu1 }
 0x29d   : > { %v7731_v37 = vadd.f32 %v9628_v49, %v7601_v57 }
 0x29e   : > { %v7698_v1 = vpop.f32.mrf.mxu1 }
 0x29f   : > { %v7729_v9 = vadd.f32 %v7698_v1, %v7599_v25 }
 0x2a0   : > { %v9629_v52 = vpop.f32.mrf.mxu1 }
 0x2a1   : > { %v7732_v12 = vadd.f32 %v9629_v52, %v7602_v29 }
 0x2a2   : > { %v7701_v7 = vpop.f32.mrf.mxu1 }
 0x2a3   : > { %v7730_v45 = vadd.f32 %v7701_v7, %v7600_v48 }
 0x2a4   : > { %v9632_v0 = vpop.f32.mrf.mxu1 }
 0x2a5   : > { %v7735_v35 = vadd.f32 %v9632_v0, %v7605_v38 }
 0x2a6   : > { %v7714_v42 = vpop.f32.mrf.mxu1 }
 0x2a7   : > { %v7733_v36 = vadd.f32 %v7714_v42, %v7603_v54 }
 0x2a8   : > { %v9633_v46 = vpop.f32.mrf.mxu1 }
 0x2a9   : > { %v7736_v27 = vadd.f32 %v9633_v46, %v7606_v59 }
 0x2aa   : > { %v7717_v22 = vpop.f32.mrf.mxu1 }
 0x2ab   : > { %v11476_v43 = vadd.f32 %v7717_v22, %v7604_v41 }
 0x2ac   : > { %v9640_v53 = vpop.f32.mrf.mxu1 }
 0x2ad   : > { %v7861_v11 = vadd.f32 %v9640_v53, %v7731_v37  ;;  %v9366_v37 = vld [vmem:[%s11579_s5] ss:$0 sm:$0xff] }
 0x2ae   : > { %v7828_v16 = vpop.f32.mrf.mxu1 }
 0x2af   : > { %v7859_v57 = vadd.f32 %v7828_v16, %v7729_v9 }
 0x2b0   : > { %v9641_v51 = vpop.f32.mrf.mxu1 }
 0x2b1   : > { %v7862_v33 = vadd.f32 %v9641_v51, %v7732_v12 }
 0x2b2   : > { %v7831_v32 = vpop.f32.mrf.mxu1 }
 0x2b3   : > { %v7860_v48 = vadd.f32 %v7831_v32, %v7730_v45 }
 0x2bb   : > { %v9644_v30 = vpop.f32.mrf.mxu1 }
 0x2bc   : > { %v7865_v54 = vadd.f32 %v9644_v30, %v7735_v35 }
 0x2bd   : > { %v7844_v24 = vpop.f32.mrf.mxu1 }
 0x2be   : > { %v7863_v1 = vadd.f32 %v7844_v24, %v7733_v36 }
 0x2bf   : > { %v9645_v50 = vpop.f32.mrf.mxu1 }
 0x2c0   : > { %v7866_v45 = vadd.f32 %v9645_v50, %v7736_v27 }
 0x2c1   : > { %v7847_v10 = vpop.f32.mrf.mxu1 }
 0x2c2   : > { %v7864_v51 = vadd.f32 %v7847_v10, %v11476_v43 }
 0x2c3   : > { %v9652_v23 = vpop.f32.mrf.mxu1 }
 0x2c4   : > { %v8102_v19 = vadd.f32 %v9652_v23, %v7861_v11 }
 0x2c5   : > { %v8069_v20 = vpop.f32.mrf.mxu1 }
 0x2c6   : > { %v8100_v55 = vadd.f32 %v8069_v20, %v7859_v57 }
 0x2c7   : > { %v9653_v5 = vpop.f32.mrf.mxu1 }
 0x2c8   : > { %v8103_v14 = vadd.f32 %v9653_v5, %v7862_v33 }
 0x2c9   : > { %v8072_v34 = vpop.f32.mrf.mxu1 }
 0x2ca   : > { %v8101_v59 = vadd.f32 %v8072_v34, %v7860_v48 }
 0x2cb   : > { %v9656_v44 = vpop.f32.mrf.mxu1 }
 0x2cc   : > { %v8106_v52 = vadd.f32 %v9656_v44, %v7865_v54  ;;  %v9825_v54 = vld [vmem:[%s10032_s11 + $0xf8] ss:$8 sps:$4 sm:$0xff]  }
 0x2cd   : > { %v8085_v26 = vpop.f32.mrf.mxu1 }
 0x2ce   : > { %v8104_v42 = vadd.f32 %v8085_v26, %v7863_v1 }
 0x2cf   : > { %v9657_v40 = vpop.f32.mrf.mxu1 }
 0x2d0   : > { %v8107_v32 = vadd.f32 %v9657_v40, %v7866_v45 }
 0x2d1   : > { %v8088_v4 = vpop.f32.mrf.mxu1 }
 0x2d2   : > { %v8105_v34 = vadd.f32 %v8088_v4, %v7864_v51 }
 0x2d3   : > { %v9664_v13 = vpop.f32.mrf.mxu1 }
 0x2d4   : > { %v8232_v29 = vadd.f32 %v9664_v13, %v8102_v19 }
 0x2d5   : > { %v8199_v21 = vpop.f32.mrf.mxu1 }
 0x2d6   : > { %v8230_v38 = vadd.f32 %v8199_v21, %v8100_v55  ;;  %v9821_v55 = vld [vmem:[%s11582_s8 + $0x8] sm:$0xff]  }
 0x2d7   : > { %v9665_v17 = vpop.f32.mrf.mxu1 }
 0x2d8   : > { %v8233_v8 = vadd.f32 %v9665_v17, %v8103_v14 }
 0x2d9   : > { %v8202_v18 = vpop.f32.mrf.mxu1 }
 0x2da   : > { %v8231_v12 = vadd.f32 %v8202_v18, %v8101_v59 }
 0x2db   : > { %v9668_v56 = vpop.f32.mrf.mxu1 }
 0x2dc   : > { %v8236_v22 = vadd.f32 %v9668_v56, %v8106_v52  ;;  %v9367_v52 = vld [vmem:[%s11581_s7] ss:$0 sm:$0xff] }
 0x2dd   : > { %v8215_v62 = vpop.f32.mrf.mxu1 }
 0x2de   : > { %v8234_v36 = vadd.f32 %v8215_v62, %v8104_v42 }
 0x2df   : > { %v9669_v61 = vpop.f32.mrf.mxu1 }
 0x2e0   : > { %v8237_v44 = vadd.f32 %v9669_v61, %v8107_v32  ;;  %v9820_v61 = vld [vmem:[%s11582_s8 + $0x10] sm:$0xff]  }
 0x2e1   : > { %v8218_v28 = vpop.f32.mrf.mxu1 }
 0x2e2   : > { %v8235_v18 = vadd.f32 %v8218_v28, %v8105_v34 }
 0x2e3   : > { %v9676_v58 = vpop.f32.mrf.mxu1 }
 0x2e4   : > { %v8362_v39 = vadd.f32 %v9676_v58, %v8232_v29 }
 0x2e5   : > { %v8329_v60 = vpop.f32.mrf.mxu1 }
 0x2e6   : > { %v8360_v41 = vadd.f32 %v8329_v60, %v8230_v38  ;;  %v9823_v38 = vld [vmem:[%s10032_s11 + $0xd8] ss:$8 sps:$4 sm:$0xff]  }
 0x2e7   : > { %v9677_v63 = vpop.f32.mrf.mxu1 }
 0x2e8   : > { %v8363_v7 = vadd.f32 %v9677_v63, %v8233_v8 }
 0x2e9   : > { %v8332_v3 = vpop.f32.mrf.mxu1 }
 0x2ea   : > { %v8361_v35 = vadd.f32 %v8332_v3, %v8231_v12 }
 0x2eb   : > { %v9680_v15 = vpop.f32.mrf.mxu1 }
 0x2ec   : > { %v8366_v24 = vadd.f32 %v9680_v15, %v8236_v22 }
 0x2ed   : > { %v8345_v47 = vpop.f32.mrf.mxu1 }
 0x2ee   : > { %v8364_v13 = vadd.f32 %v8345_v47, %v8234_v36 }
 0x2ef   : > { %v9681_v25 = vpop.f32.mrf.mxu1 }
 0x2f0   : > { %v8367_v56 = vadd.f32 %v9681_v25, %v8237_v44 }
 0x2f1   : > { %v8348_v31 = vpop.f32.mrf.mxu1 }
 0x2f2   : > { %v8365_v63 = vadd.f32 %v8348_v31, %v8235_v18 }
 0x2f3   : > { %v9688_v6 = vpop.f32.mrf.mxu1 }
 0x2f4   : > { %v8603_v49 = vadd.f32 %v9688_v6, %v8362_v39  ;;  %v9822_v39 = vld [vmem:[%s11582_s8] sm:$0xff]   ;;  %v9826_v6 = vld [vmem:[%s10032_s11 + $0x108] ss:$8 sps:$4 sm:$0xff]  }
 0x2f5   : > { %v8570_v9 = vpop.f32.mrf.mxu1 }
 0x2f6   : > { %v8601_v0 = vadd.f32 %v8570_v9, %v8360_v41  ;;  %v8618_v53 = vadd.f32 %v9366_v37, %v8603_v49 }
 0x2f7   : > { %v9689_v46 = vpop.f32.mrf.mxu1 }
 0x2f8   : > { %v8604_v16 = vadd.f32 %v9689_v46, %v8363_v7  ;;  %v8616_v23 = vadd.f32 %v9366_v37, %v8601_v0  ;;  %v8626_v27 = vmax.f32 %v8618_v53, 0.0  ;;  %v9382_v7 = vld [vmem:[%s11583_s9] ss:$0 sm:$0xff] }
 0x2f9   : > { %v8573_v30 = vpop.f32.mrf.mxu1 }
 0x2fa   : > { %v8619_v20 = vadd.f32 %v9366_v37, %v8604_v16  ;;  %v8602_v5 = vadd.f32 %v8573_v30, %v8361_v35  ;;  %v8624_v60 = vmax.f32 %v8616_v23, 0.0 }
 0x2fb   : > { %v9692_v21 = vpop.f32.mrf.mxu1 }
 0x2fc   : > { %v8627_v50 = vmax.f32 %v8619_v20, 0.0  ;;  %v8617_v26 = vadd.f32 %v9366_v37, %v8602_v5  ;;  %v8607_v17 = vadd.f32 %v9692_v21, %v8366_v24 }
 0x2fd   : > { %v8586_v58 = vpop.f32.mrf.mxu1 }
 0x2fe   : > { %v8633_v43 = vpack.c.bf16 %v8627_v50, %v8626_v27  ;;  %v8625_v10 = vmax.f32 %v8617_v26, 0.0  ;;  %v8605_v40 = vadd.f32 %v8586_v58, %v8364_v13  ;;  %v8622_v15 = vadd.f32 %v9366_v37, %v8607_v17 }
 0x2ff   : > { %v9693_v62 = vpop.f32.mrf.mxu1 }
 0x300   : > { %v8632_v3 = vpack.c.bf16 %v8625_v10, %v8624_v60  ;;  %v8608_v11 = vadd.f32 %v9693_v62, %v8367_v56  ;;  %v8620_v47 = vadd.f32 %v9366_v37, %v8605_v40  ;;  %v8630_v19 = vmax.f32 %v8622_v15, 0.0 }
 0x301   : > { %v8589_v4 = vpop.f32.mrf.mxu1 }
 0x302   : > { %v8623_v57 = vadd.f32 %v9366_v37, %v8608_v11  ;;  %v8606_v28 = vadd.f32 %v8589_v4, %v8365_v63  ;;  %9698 = vmatprep.mubr.msk.bf16.mxu1 %vm7176_vm6, %v8632_v3  ;;  %v8628_v29 = vmax.f32 %v8620_v47, 0.0 }
 0x303   : > { %9699 = vmatmul.mubr.msk.bf16.vlgmr.msra.gmra.mxu1 %vm7176_vm6, %v8633_v43 }
 0x304   : > { %v8631_v25 = vmax.f32 %v8623_v57, 0.0  ;;  %v8621_v33 = vadd.f32 %v9366_v37, %v8606_v28  ;;  %9707 = vmatpush3.bf16.msra.mxu1 %v11473_v2  ;;  %v9824_v2 = vld [vmem:[%s10032_s11 + $0xe8] ss:$8 sps:$4 sm:$0xff]   ;;  %s8985_s11 = sshll.u32 %s350_s26, 6 }
 0x305   : > { %9708 = vmatprep.subr.bf16.mxu1 %v9820_v61  ;;  %s11513_s30 = scalar_lea.vmem [#allocation3], %s8985_s11  ;;  %s9835_s11 = scalar_lea.vmem %s9834_s28, 2048 }
 0x306   : > { %v8635_v31 = vpack.c.bf16 %v8631_v25, %v8630_v19  ;;  %v8629_v48 = vmax.f32 %v8621_v33, 0.0  ;;  %s8919_s18 = sshll.u32 %s11513_s30, 4  ;;  %s11528_s18 = int_to_ptr.vmem [resolvable:$true] %s8919_s18 }
 0x307   : > { %s9829_s17 = scalar_lea.vmem %s11528_s18, 1024  ;;  %p9836_p0 = scmp.lt.s32.totalorder %s11528_s18, %s9834_s28 }
 0x308   : > { %v8634_v14 = vpack.c.bf16 %v8629_v48, %v8628_v29  ;;  %9709 = vmatpush3.bf16.msra.mxu1 %v9820_v61  ;;  %p9830_p11 = scmp.ne.s32.totalorder %s11528_s18, %s9829_s17  ;;  %p9837_p1 = scmp.lt.s32.totalorder %s9835_s11, %s9829_s17 }
 0x309   : > { %9710 = vmatprep.subr.bf16.mxu1 %v9821_v55 }
 0x30a   : > { %9702 = vmatprep.mubr.msk.bf16.mxu1 %vm7176_vm6, %v8634_v14  ;;  %p9831_p12 = pnand %p9830_p11, %p9992_p5  ;;  %p9838_p2 = por %p9837_p1, %p9836_p0 }
 0x30b   : > { %9703 = vmatmul.mubr.msk.bf16.gmra.mxu1 %vm7176_vm6, %v8635_v31 }
 0x30c   : > { %9711 = vmatpush3.bf16.msra.mxu1 %v9821_v55  ;;  %9714 = vmatprep.mubr.msk.bf16.mxu1 %vm3391_vm1, %v9823_v38  ;;  %p9832_p13 = pneg %p9831_p12 }
 0x30d   : > { %9712 = vmatprep.subr.bf16.mxu1 %v9822_v39 }
 0x30e   : > { %p9839_p3 = pnand %p9838_p2, %p9832_p13 }
 0x310   : > { %9713 = vmatpush3.bf16.msra.mxu1 %v9822_v39 }
 0x313   : > { %9715 = vmatmul.mubr.msk.bf16.vlgmr.msra.gmra.mxu1 %vm3391_vm1, %v9824_v2 }
 0x314   : > { %9718 = vmatprep.mubr.msk.bf16.mxu1 %vm3391_vm1, %v9825_v54 }
 0x31b   : > { %9719 = vmatmul.mubr.msk.bf16.gmra.mxu1 %vm3391_vm1, %v9826_v6 }
 0x3c3   : > { %v9700_v59 = vpop.f32.mrf.mxu1 }
 0x3c4   : > { %v8714_v45 = vadd.f32 %v9700_v59, %v9367_v52 }
 0x3c5   : > { %v8705_v8 = vpop.f32.mrf.mxu1 }
 0x3c6   : > { %v8706_v22 = vadd.f32 %v9367_v52, %v8705_v8 }
 0x3c7   : > { %v9701_v41 = vpop.f32.mrf.mxu1 }
 0x3c8   : > { %v8717_v51 = vadd.f32 %v9701_v41, %v9367_v52 }
 0x3c9   : > { %v8708_v49 = vpop.f32.mrf.mxu1 }
 0x3ca   : > { %v8709_v23 = vadd.f32 %v9367_v52, %v8708_v49 }
 0x3cb   : > { %v9704_v1 = vpop.f32.mrf.mxu1 }
 0x3cc   : > { %v8730_v13 = vadd.f32 %v9704_v1, %v9367_v52 }
 0x3cd   : > { %v8721_v37 = vpop.f32.mrf.mxu1 }
 0x3ce   : > { %v8722_v17 = vadd.f32 %v9367_v52, %v8721_v37 }
 0x3cf   : > { %v9705_v9 = vpop.f32.mrf.mxu1 }
 0x3d0   : > { %v8733_v43 = vadd.f32 %v9705_v9, %v9367_v52 }
 0x3d1   : > { %v8724_v12 = vpop.f32.mrf.mxu1 }
 0x3d2   : > { %v8725_v3 = vadd.f32 %v9367_v52, %v8724_v12 }
 0x3d3   : > { %v9716_v0 = vpop.f32.mrf.mxu1 }
 0x3d4   : > { %v8859_v42 = vadd.f32 %v9716_v0, %v9382_v7 }
 0x3d5   : > { %v8850_v46 = vpop.f32.mrf.mxu1 }
 0x3d6   : > { %v8883_v35 = vadd.f32 %v8859_v42, %v8714_v45  ;;  %v8851_v53 = vadd.f32 %v9382_v7, %v8850_v46 }
 0x3d7   : > { %v9717_v16 = vpop.f32.mrf.mxu1 }
 0x3d8   : > { %v8891_v32 = vmax.f32 %v8883_v35, 0.0  ;;  %v8881_v36 = vadd.f32 %v8851_v53, %v8706_v22  ;;  %v8862_v30 = vadd.f32 %v9717_v16, %v9382_v7 }
 0x3d9   : > { %v8853_v24 = vpop.f32.mrf.mxu1 }
 0x3da   : > { %8899 = vst [vmem:[%s11513_s30 + $0x10] sm:$0xff] %v8891_v32  ;;  %v8889_v20 = vmax.f32 %v8881_v36, 0.0  ;;  %v8884_v5 = vadd.f32 %v8862_v30, %v8717_v51  ;;  %v8854_v34 = vadd.f32 %v9382_v7, %v8853_v24 }
 0x3db   : > { %v9720_v44 = vpop.f32.mrf.mxu1 }
 0x3dc   : > { %8897 = vst [vmem:[%s11513_s30] sm:$0xff] %v8889_v20  ;;  %v8892_v21 = vmax.f32 %v8884_v5, 0.0  ;;  %v8882_v27 = vadd.f32 %v8854_v34, %v8709_v23  ;;  %v8875_v50 = vadd.f32 %v9720_v44, %v9382_v7 }
 0x3dd   : > { %v8866_v26 = vpop.f32.mrf.mxu1 }
 0x3de   : > { %8900 = vst [vmem:[%s11513_s30 + $0x18] sm:$0xff] %v8892_v21  ;;  %v8890_v18 = vmax.f32 %v8882_v27, 0.0  ;;  %v8887_v56 = vadd.f32 %v8875_v50, %v8730_v13  ;;  %v8867_v58 = vadd.f32 %v9382_v7, %v8866_v26 }
 0x3df   : > { %v9721_v60 = vpop.f32.mrf.mxu1 }
 0x3e0   : > { %8898 = vst [vmem:[%s11513_s30 + $0x8] sm:$0xff] %v8890_v18  ;;  %v8895_v10 = vmax.f32 %v8887_v56, 0.0  ;;  %v8885_v40 = vadd.f32 %v8867_v58, %v8722_v17  ;;  %v8878_v62 = vadd.f32 %v9721_v60, %v9382_v7 }
 0x3e1   : > { %v8869_v63 = vpop.f32.mrf.mxu1 }
 0x3e2   : > { %8903 = vst [vmem:[%s11513_s30 + $0x30] sm:$0xff] %v8895_v10  ;;  %v8893_v15 = vmax.f32 %v8885_v40, 0.0  ;;  %v8888_v11 = vadd.f32 %v8878_v62, %v8733_v43  ;;  %v8870_v4 = vadd.f32 %v9382_v7, %v8869_v63 }
 0x3e4   : > { %8901 = vst [vmem:[%s11513_s30 + $0x20] sm:$0xff] %v8893_v15  ;;  %v8896_v61 = vmax.f32 %v8888_v11, 0.0  ;;  %v8886_v47 = vadd.f32 %v8870_v4, %v8725_v3 }
 0x3e6   : > { %8904 = vst [vmem:[%s11513_s30 + $0x38] sm:$0xff] %v8896_v61  ;;  %v8894_v57 = vmax.f32 %v8886_v47, 0.0 }
 0x3e8   : > { %8902 = vst [vmem:[%s11513_s30 + $0x28] sm:$0xff] %v8894_v57 }
 0x3e9   : > { %9842 = shalt.err (!%p9839_p3)
}
 0x3ea   : > { %s9843_s26 = scalar_lea.hbm %s11526_s21, 1024  ;;  %s9847_s29 = scalar_lea.hbm %s11584_s10, 2048 }
 0x3eb   : > { %p9844_p4 = scmp.ne.s32.totalorder %s11526_s21, %s9843_s26  ;;  %p9848_p9 = scmp.lt.s32.totalorder %s11526_s21, %s11584_s10 }
 0x3ec   : > { %p9849_p10 = scmp.lt.s32.totalorder %s9847_s29, %s9843_s26 }
 0x3ed   : > { %p9845_p7 = pnand %p9844_p4, %p9992_p5 }
 0x3ee   : > { %p9850_p11 = por %p9849_p10, %p9848_p9 }
 0x3ef   : > { %p9846_p8 = pneg %p9845_p7 }
 0x3f1   : > { %p9851_p12 = pnand %p9850_p11, %p9846_p8 }
 0x3f3   : > { %9854 = shalt.err (!%p9851_p12)
}
 0x3f4   : > { %s9897_s17 = smov 128   ;;  %s9898_s28 = smov 8  }
 0x3f5   : > { %9723 = dma.vmem_to_hbm [thread:$0]  (%p9992_p5), %s11528_s18, 1024, %s11526_s21, %s11534_s25, %s9897_s17, %s9897_s17, %s9898_s28  }
 0x3f6 PF: > { %p9729_p13 = scmp.ge.s32.totalorder %s9889_s16, 2  ;;  %s8934_s11 = sand.u32 1, %s9877_s13  }
 0x3f7   : > { %s8935_s26 = scalar_lea.sflag [#allocation4], %s8934_s11 }
 0x3f8   : > { %p9726_p0 = pnand %p9729_p13, %p9996_p6 }
 0x3fa   : > { %p9727_p1 = pneg %p9726_p0 }
 0x3fc   : > { %9872 = dma.done.wait (%p9727_p1), %s8935_s26, 1024  }
 0x3fd   : > { %9874 = vsyncadd (%p9727_p1), %s8935_s26, 4294966272  ;;  %p20_p2 = scmp.ge.s32.totalorder %s9979_s19, 4   ;;  %s11591_s13 = smov %s9881_s14 }
 0x3fe   : > { %s11592_s14 = smov %s9885_s15  ;;  %s11593_s15 = smov %s9990_s22 }
 0x3ff   : > { %s11594_s16 = smov %s9979_s19  ;;  %22 = sbr.rel (!%p20_p2) target bundleno = 3 (0x3), region = 101 }
 0x404   :  { %8940 = vsyncpa [#allocation4], 1 }
 0x405   :  { %8942 = vsyncpa [#allocation4 + $0x1], 1 }

</bundles_post_ra>
